<compile_context>
chip_gen: v6e
topology: v6e:2x2x1
jax: 0.10.0
libtpu: 0.0.40
codegen_flags: <defaults>
</compile_context>

<pallas_src>
import jax
import jax.numpy as jnp
from jax.experimental import pallas as pl
from jax.experimental.pallas import tpu as pltpu

# ----------------------------- configuration --------------------------------
VOCAB_SIZE = 16        # sequence length ("vocab_size" in the module)
INPUT_DIM  = 8         # sEMG channels
HIDDEN     = 32        # BERT hidden size
N_LAYERS   = 2         # transformer blocks (small demo config)
ATTN_HEADS = 4         # hidden % attn_heads == 0
FF_DIM     = 4 * HIDDEN
HEAD_DIM   = HIDDEN // ATTN_HEADS
OUT_DIM    = 10        # fc output features
LN_EPS     = 1e-5      # PyTorch nn.LayerNorm default

BATCH      = 8         # total batch
BATCH_TILE = 4         # rows per grid step (grid = BATCH // BATCH_TILE)

POS_ROW = 8            # positional rows start (8-sublane aligned, row 0 = bias)


# ------------------------------ kernel helpers -------------------------------
def _layernorm(x, g, b):
    mu = jnp.mean(x, axis=-1, keepdims=True)
    var = jnp.mean((x - mu) * (x - mu), axis=-1, keepdims=True)
    return (x - mu) * jax.lax.rsqrt(var + LN_EPS) * g + b


def _gelu(x):
    # tanh-approximate GELU (tanh -> EUP slot).
    # TODO(synk): use exact erf GELU if the hidden BERT class uses nn.GELU() default.
    c = 0.7978845608028654  # sqrt(2/pi)
    return 0.5 * x * (1.0 + jnp.tanh(c * (x + 0.044715 * x * x * x)))


# ------------------------------- fused kernel --------------------------------
def bert_encoder_kernel(x_ref, emb_ref, we_ref, wa_ref, w2_ref, bias_ref,
                        distr_ref):
    TB, S, H = BATCH_TILE, VOCAB_SIZE, HIDDEN
    TBS = TB * S

    # ------------- embedding: Linear(C->H) + bias + positional --------------
    we  = we_ref[...].astype(jnp.float32)            # (C, H)   (bf16 -> f32)
    be  = emb_ref[0:1, :]                            # (1, H)
    pos = emb_ref[POS_ROW:POS_ROW + TBS, :]          # (TBS, H) pre-tiled over tile
    h = jnp.dot(x_ref[...], we, preferred_element_type=jnp.float32) + be + pos

    # ---------------- transformer blocks (statically unrolled) --------------
    # TODO(synk): stream per-layer weights via an "arbitrary" grid axis once
    # HIDDEN / N_LAYERS approach real BERT sizes (v7x VMEM = 64 MiB).
    for l in range(N_LAYERS):
        wa = wa_ref[l].astype(jnp.float32)           # (H, 4H+FF) = [Wq*s|Wk|Wv|Wo|W1]
        w2 = w2_ref[l].astype(jnp.float32)           # (FF, H)
        bl = bias_ref[l]                             # (8, FF) packed bias / LN rows

        w_qkv = wa[:, :3 * H]                        # softmax scale folded into Wq
        w_o   = wa[:, 3 * H:4 * H]
        w_1   = wa[:, 4 * H:]

        b_qkv = bl[0:1, :3 * H]
        b_o   = bl[1:2, :H]
        b_1   = bl[2:3, :FF_DIM]
        b_2   = bl[3:4, :H]
        ln1g, ln1b = bl[4:5, :H], bl[5:6, :H]
        ln2g, ln2b = bl[6:7, :H], bl[7:8, :H]

        # fused QKV projection (one matmul), then ONE reshape per tensor
        qkv = jnp.dot(h, w_qkv, preferred_element_type=jnp.float32) + b_qkv   # (TBS, 3H)
        q_all = qkv[:, :H].reshape(TB, S, H)
        k_all = qkv[:, H:2 * H].reshape(TB, S, H)
        v_all = qkv[:, 2 * H:3 * H].reshape(TB, S, H)

        # multi-head attention; head outputs accumulated through Wo (no concat)
        attn = None
        for hh in range(ATTN_HEADS):
            lo = hh * HEAD_DIM
            q3 = q_all[:, :, lo:lo + HEAD_DIM]
            k3 = k_all[:, :, lo:lo + HEAD_DIM]
            v3 = v_all[:, :, lo:lo + HEAD_DIM]
            sc = jnp.einsum('bqd,bkd->bqk', q3, k3,
                            preferred_element_type=jnp.float32)               # (TB,S,S)
            sc = sc - jnp.max(sc, axis=-1, keepdims=True)
            p = jnp.exp(sc)
            # approx reciprocal (EUP): rows sum to ~1, tiny deviation vs exact softmax
            p = p * pl.reciprocal(jnp.sum(p, axis=-1, keepdims=True), approx=True)
            o3 = jnp.einsum('bqk,bkd->bqd', p, v3,
                            preferred_element_type=jnp.float32)               # (TB,S,hd)
            contrib = jnp.dot(o3.reshape(TBS, HEAD_DIM),
                              w_o[lo:lo + HEAD_DIM, :],
                              preferred_element_type=jnp.float32)             # (TBS,H)
            attn = contrib if attn is None else attn + contrib
        attn = attn + b_o

        h1 = _layernorm(h + attn, ln1g, ln1b)

        ff = _gelu(jnp.dot(h1, w_1, preferred_element_type=jnp.float32) + b_1)   # (TBS,FF)
        ff = jnp.dot(ff, w2, preferred_element_type=jnp.float32) + b_2
        h = _layernorm(h1 + ff, ln2g, ln2b)

    # distr emitted exactly in the layout the encoder produced: (TB*S, H)
    distr_ref[...] = h


# ----------------------------- pallas_call wrapper ---------------------------
def _cost_estimate():
    BS = BATCH * VOCAB_SIZE
    flops = 2 * BS * INPUT_DIM * HIDDEN
    per_layer = (2 * BS * HIDDEN * 3 * HIDDEN                      # qkv
                 + 2 * 2 * BATCH * VOCAB_SIZE * VOCAB_SIZE * HIDDEN  # scores + p@v
                 + 2 * BS * HIDDEN * HIDDEN                         # wo
                 + 2 * 2 * BS * HIDDEN * FF_DIM)                    # ffn
    flops += N_LAYERS * per_layer
    transcend = N_LAYERS * (BATCH * ATTN_HEADS * VOCAB_SIZE * VOCAB_SIZE
                            + BS * FF_DIM)
    bytes_accessed = (BS * INPUT_DIM * 4                              # x
                      + (POS_ROW + BATCH_TILE * VOCAB_SIZE) * HIDDEN * 4   # emb
                      + INPUT_DIM * HIDDEN * 2                        # we (bf16)
                      + N_LAYERS * HIDDEN * (4 * HIDDEN + FF_DIM) * 2  # wa (bf16)
                      + N_LAYERS * FF_DIM * HIDDEN * 2                # w2 (bf16)
                      + N_LAYERS * 8 * FF_DIM * 4                     # bias/LN
                      + BS * HIDDEN * 4)                              # distr out
    return pl.CostEstimate(flops=int(flops), transcendentals=int(transcend),
                           bytes_accessed=int(bytes_accessed))


@jax.jit
def semg_bert_forward(x, packed):
    B, S, C = x.shape
    assert B % BATCH_TILE == 0 and S == VOCAB_SIZE and C == INPUT_DIM
    TBS = BATCH_TILE * S
    x2d = x.reshape(B * S, C)                        # fold batch into rows

    distr2d = pl.pallas_call(
        bert_encoder_kernel,
        out_shape=jax.ShapeDtypeStruct((B * S, HIDDEN), jnp.float32),
        grid=(B // BATCH_TILE,),
        in_specs=[
            pl.BlockSpec((TBS, C), lambda i: (i, 0)),                         # x tile
            pl.BlockSpec((POS_ROW + TBS, HIDDEN), lambda i: (0, 0)),          # be/pos
            pl.BlockSpec((INPUT_DIM, HIDDEN), lambda i: (0, 0)),              # We (bf16)
            pl.BlockSpec((N_LAYERS, HIDDEN, 4 * HIDDEN + FF_DIM),
                         lambda i: (0, 0, 0)),                                # wa (bf16)
            pl.BlockSpec((N_LAYERS, FF_DIM, HIDDEN), lambda i: (0, 0, 0)),    # w2 (bf16)
            pl.BlockSpec((N_LAYERS, 8, FF_DIM), lambda i: (0, 0, 0)),         # bias/LN
        ],
        out_specs=pl.BlockSpec((TBS, HIDDEN), lambda i: (i, 0)),
        compiler_params=pltpu.CompilerParams(
            dimension_semantics=("parallel",)),       # v7x: shard tiles over 2 TCs
        cost_estimate=_cost_estimate(),
    )(x2d, packed['emb'], packed['we'], packed['wa'], packed['w2'],
      packed['bias'])

    distr = distr2d.reshape(B, S, HIDDEN)            # == x1 in PyTorch
    # Tiny final FC done as an XLA dot in the wrapper (per perf review):
    # flatten order matches x1.view(B, -1) (s-major, then h).
    flat = distr2d.reshape(B, S * HIDDEN)
    output = (jnp.dot(flat, packed['wf']) + packed['bf']).reshape(B, 1, OUT_DIM)
    return output, distr


# ------------------------------ parameter init -------------------------------
def init_params(key):
    scale = 0.02
    keys = jax.random.split(key, 3 + N_LAYERS)
    f32 = jnp.float32

    params = {
        'we':  scale * jax.random.normal(keys[0], (INPUT_DIM, HIDDEN), f32),
        'be':  jnp.zeros((HIDDEN,), f32),
        'pos': scale * jax.random.normal(keys[1], (VOCAB_SIZE, HIDDEN), f32),
        # stored as (S*H, 10), used as x @ W (a loaded torch nn.Linear weight
        # would need a transpose).
        'wf':  scale * jax.random.normal(keys[2], (VOCAB_SIZE * HIDDEN, OUT_DIM), f32),
        'bf':  jnp.zeros((OUT_DIM,), f32),
        'layers': [],
    }
    for l in range(N_LAYERS):
        lk = jax.random.split(keys[3 + l], 6)
        params['layers'].append({
            'wq': scale * jax.random.normal(lk[0], (HIDDEN, HIDDEN), f32),
            'bq': jnp.zeros((HIDDEN,), f32),
            'wk': scale * jax.random.normal(lk[1], (HIDDEN, HIDDEN), f32),
            'bk': jnp.zeros((HIDDEN,), f32),
            'wv': scale * jax.random.normal(lk[2], (HIDDEN, HIDDEN), f32),
            'bv': jnp.zeros((HIDDEN,), f32),
            'wo': scale * jax.random.normal(lk[3], (HIDDEN, HIDDEN), f32),
            'bo': jnp.zeros((HIDDEN,), f32),
            'ln1g': jnp.ones((HIDDEN,), f32),
            'ln1b': jnp.zeros((HIDDEN,), f32),
            'w1': scale * jax.random.normal(lk[4], (HIDDEN, FF_DIM), f32),
            'b1': jnp.zeros((FF_DIM,), f32),
            'w2': scale * jax.random.normal(lk[5], (FF_DIM, HIDDEN), f32),
            'b2': jnp.zeros((HIDDEN,), f32),
            'ln2g': jnp.ones((HIDDEN,), f32),
            'ln2b': jnp.zeros((HIDDEN,), f32),
        })
    return params


def pack_params(params):
    """Pack tensors into a few DMA-friendly arrays; matmul weights in bf16."""
    H, FF, S = HIDDEN, FF_DIM, VOCAB_SIZE
    scale = 1.0 / float(HEAD_DIM) ** 0.5
    TBS = BATCH_TILE * S

    # emb pack (f32): row 0 = embedding bias, rows POS_ROW.. = pos tiled per batch tile
    emb = jnp.zeros((POS_ROW + TBS, H), jnp.float32)
    emb = emb.at[0, :].set(params['be'])
    emb = emb.at[POS_ROW:POS_ROW + TBS, :].set(jnp.tile(params['pos'], (BATCH_TILE, 1)))

    def bias_row(v):
        return jnp.pad(v, (0, FF - v.shape[0]))[None, :]

    wa_list, w2_list, bias_list = [], [], []
    for lp in params['layers']:
        # fold 1/sqrt(head_dim) into Wq AND bq (q = x@Wq + bq scaled as a whole)
        wa_list.append(jnp.concatenate(
            [lp['wq'] * scale, lp['wk'], lp['wv'], lp['wo'], lp['w1']], axis=1))
        w2_list.append(lp['w2'])
        bias_list.append(jnp.concatenate([
            bias_row(jnp.concatenate([lp['bq'] * scale, lp['bk'], lp['bv']])),
            bias_row(lp['bo']),
            bias_row(lp['b1']),
            bias_row(lp['b2']),
            bias_row(lp['ln1g']), bias_row(lp['ln1b']),
            bias_row(lp['ln2g']), bias_row(lp['ln2b']),
        ], axis=0))

    return {
        'emb':  emb,                                                   # (8+TBS, H) f32
        'we':   params['we'].astype(jnp.bfloat16),                     # (C, H)
        'wa':   jnp.stack(wa_list, 0).astype(jnp.bfloat16),            # (L, H, 4H+FF)
        'w2':   jnp.stack(w2_list, 0).astype(jnp.bfloat16),            # (L, FF, H)
        'bias': jnp.stack(bias_list, 0),                               # (L, 8, FF) f32
        'wf':   params['wf'],                                          # (S*H, 10) f32 (wrapper)
        'bf':   params['bf'],                                          # (10,)     f32 (wrapper)
    }


# ----------------------------------- main -------------------------------------
if __name__ == "__main__":
    key = jax.random.PRNGKey(0)
    kx, kp = jax.random.split(key)
    x = jax.random.normal(kx, (BATCH, VOCAB_SIZE, INPUT_DIM), jnp.float32)
    params = init_params(kp)
    packed = pack_params(params)

    output, distr = semg_bert_forward(x, packed)
    jax.block_until_ready((output, distr))

    assert output.shape == (BATCH, 1, OUT_DIM), output.shape
    assert distr.shape == (BATCH, VOCAB_SIZE, HIDDEN), distr.shape
    assert jnp.isfinite(output).all() and jnp.isfinite(distr).all()
    print("KERNEL_OK")
</pallas_src>

<mosaic_0001>
module attributes {stable_mosaic.version = 11 : i64} {
  func.func @bert_encoder_kernel(%arg0: i32, %arg1: memref<64x8xf32, #tpu.memory_space<vmem>>, %arg2: memref<72x32xf32, #tpu.memory_space<vmem>>, %arg3: memref<8x32xbf16, #tpu.memory_space<vmem>>, %arg4: memref<2x32x256xbf16, #tpu.memory_space<vmem>>, %arg5: memref<2x128x32xbf16, #tpu.memory_space<vmem>>, %arg6: memref<2x8x128xf32, #tpu.memory_space<vmem>>, %arg7: memref<64x32xf32, #tpu.memory_space<vmem>>) attributes {dimension_semantics = [#tpu.dimension_semantics<parallel>], iteration_bounds = array<i64: 2>, scalar_prefetch = 0 : i64, scratch_operands = 0 : i64, tpu.core_type = #tpu.core_type<tc>, window_params = [{transform_indices = @transform_0, window_bounds = array<i64: 64, 8>}, {pipeline_mode = #tpu.pipeline_mode<synchronous>, transform_indices = @transform_1, window_bounds = array<i64: 72, 32>}, {pipeline_mode = #tpu.pipeline_mode<synchronous>, transform_indices = @transform_2, window_bounds = array<i64: 8, 32>}, {pipeline_mode = #tpu.pipeline_mode<synchronous>, transform_indices = @transform_3, window_bounds = array<i64: 2, 32, 256>}, {pipeline_mode = #tpu.pipeline_mode<synchronous>, transform_indices = @transform_4, window_bounds = array<i64: 2, 128, 32>}, {pipeline_mode = #tpu.pipeline_mode<synchronous>, transform_indices = @transform_5, window_bounds = array<i64: 2, 8, 128>}, {transform_indices = @transform_6, window_bounds = array<i64: 64, 32>}]} {
    %c0 = arith.constant 0 : index
    %c0_0 = arith.constant 0 : index
    %0 = vector.load %arg3[%c0, %c0_0] : memref<8x32xbf16, #tpu.memory_space<vmem>>, vector<8x32xbf16>
    %1 = arith.extf %0 : vector<8x32xbf16> to vector<8x32xf32>
    %c0_1 = arith.constant 0 : index
    %c0_2 = arith.constant 0 : index
    %2 = vector.load %arg2[%c0_1, %c0_2] : memref<72x32xf32, #tpu.memory_space<vmem>>, vector<1x32xf32>
    %c8 = arith.constant 8 : index
    %c0_3 = arith.constant 0 : index
    %3 = vector.load %arg2[%c8, %c0_3] : memref<72x32xf32, #tpu.memory_space<vmem>>, vector<64x32xf32>
    %c0_4 = arith.constant 0 : index
    %c0_5 = arith.constant 0 : index
    %4 = vector.load %arg1[%c0_4, %c0_5] : memref<64x8xf32, #tpu.memory_space<vmem>>, vector<64x8xf32>
    %cst = arith.constant dense<0.000000e+00> : vector<64x32xf32>
    %5 = tpu.matmul %4, %1, %cst {dimension_numbers = #tpu.dot_dimension_numbers<[1], [0], [0], [1], [0, 0, 1, 1], [], []>} : vector<64x8xf32>, vector<8x32xf32>, vector<64x32xf32> -> vector<64x32xf32>
    %6 = vector.broadcast %2 : vector<1x32xf32> to vector<64x32xf32>
    %7 = arith.addf %5, %6 : vector<64x32xf32>
    %8 = arith.addf %7, %3 : vector<64x32xf32>
    %c0_6 = arith.constant 0 : index
    %c0_7 = arith.constant 0 : index
    %c0_8 = arith.constant 0 : index
    %9 = vector.load %arg4[%c0_6, %c0_7, %c0_8] : memref<2x32x256xbf16, #tpu.memory_space<vmem>>, vector<1x32x256xbf16>
    %10 = vector.shape_cast %9 : vector<1x32x256xbf16> to vector<32x256xbf16>
    %11 = arith.extf %10 : vector<32x256xbf16> to vector<32x256xf32>
    %c0_9 = arith.constant 0 : index
    %c0_10 = arith.constant 0 : index
    %c0_11 = arith.constant 0 : index
    %12 = vector.load %arg5[%c0_9, %c0_10, %c0_11] : memref<2x128x32xbf16, #tpu.memory_space<vmem>>, vector<1x128x32xbf16>
    %13 = vector.shape_cast %12 : vector<1x128x32xbf16> to vector<128x32xbf16>
    %14 = arith.extf %13 : vector<128x32xbf16> to vector<128x32xf32>
    %c0_12 = arith.constant 0 : index
    %c0_13 = arith.constant 0 : index
    %c0_14 = arith.constant 0 : index
    %15 = vector.load %arg6[%c0_12, %c0_13, %c0_14] : memref<2x8x128xf32, #tpu.memory_space<vmem>>, vector<1x8x128xf32>
    %16 = vector.shape_cast %15 : vector<1x8x128xf32> to vector<8x128xf32>
    %17 = vector.extract_strided_slice %11 {offsets = [0, 0], sizes = [32, 96], strides = [1, 1]} : vector<32x256xf32> to vector<32x96xf32>
    %18 = vector.extract_strided_slice %11 {offsets = [0, 96], sizes = [32, 32], strides = [1, 1]} : vector<32x256xf32> to vector<32x32xf32>
    %19 = vector.extract_strided_slice %11 {offsets = [0, 128], sizes = [32, 128], strides = [1, 1]} : vector<32x256xf32> to vector<32x128xf32>
    %20 = vector.extract_strided_slice %16 {offsets = [0, 0], sizes = [1, 96], strides = [1, 1]} : vector<8x128xf32> to vector<1x96xf32>
    %21 = vector.extract_strided_slice %16 {offsets = [1, 0], sizes = [1, 32], strides = [1, 1]} : vector<8x128xf32> to vector<1x32xf32>
    %22 = vector.extract_strided_slice %16 {offsets = [2, 0], sizes = [1, 128], strides = [1, 1]} : vector<8x128xf32> to vector<1x128xf32>
    %23 = vector.extract_strided_slice %16 {offsets = [3, 0], sizes = [1, 32], strides = [1, 1]} : vector<8x128xf32> to vector<1x32xf32>
    %24 = vector.extract_strided_slice %16 {offsets = [4, 0], sizes = [1, 32], strides = [1, 1]} : vector<8x128xf32> to vector<1x32xf32>
    %25 = vector.extract_strided_slice %16 {offsets = [5, 0], sizes = [1, 32], strides = [1, 1]} : vector<8x128xf32> to vector<1x32xf32>
    %26 = vector.extract_strided_slice %16 {offsets = [6, 0], sizes = [1, 32], strides = [1, 1]} : vector<8x128xf32> to vector<1x32xf32>
    %27 = vector.extract_strided_slice %16 {offsets = [7, 0], sizes = [1, 32], strides = [1, 1]} : vector<8x128xf32> to vector<1x32xf32>
    %cst_15 = arith.constant dense<0.000000e+00> : vector<64x96xf32>
    %28 = tpu.matmul %8, %17, %cst_15 {dimension_numbers = #tpu.dot_dimension_numbers<[1], [0], [0], [1], [0, 0, 1, 1], [], []>} : vector<64x32xf32>, vector<32x96xf32>, vector<64x96xf32> -> vector<64x96xf32>
    %29 = vector.broadcast %20 : vector<1x96xf32> to vector<64x96xf32>
    %30 = arith.addf %28, %29 : vector<64x96xf32>
    %31 = vector.extract_strided_slice %30 {offsets = [0, 0], sizes = [64, 32], strides = [1, 1]} : vector<64x96xf32> to vector<64x32xf32>
    %32 = vector.shape_cast %31 : vector<64x32xf32> to vector<4x16x32xf32>
    %33 = vector.extract_strided_slice %30 {offsets = [0, 32], sizes = [64, 32], strides = [1, 1]} : vector<64x96xf32> to vector<64x32xf32>
    %34 = vector.shape_cast %33 : vector<64x32xf32> to vector<4x16x32xf32>
    %35 = vector.extract_strided_slice %30 {offsets = [0, 64], sizes = [64, 32], strides = [1, 1]} : vector<64x96xf32> to vector<64x32xf32>
    %36 = vector.shape_cast %35 : vector<64x32xf32> to vector<4x16x32xf32>
    %37 = vector.extract_strided_slice %32 {offsets = [0, 0, 0], sizes = [4, 16, 8], strides = [1, 1, 1]} : vector<4x16x32xf32> to vector<4x16x8xf32>
    %38 = vector.extract_strided_slice %34 {offsets = [0, 0, 0], sizes = [4, 16, 8], strides = [1, 1, 1]} : vector<4x16x32xf32> to vector<4x16x8xf32>
    %39 = vector.extract_strided_slice %36 {offsets = [0, 0, 0], sizes = [4, 16, 8], strides = [1, 1, 1]} : vector<4x16x32xf32> to vector<4x16x8xf32>
    "tpu.trace_start"() <{level = 10 : i32, message = "bqd,bkd->bqk"}> : () -> ()
    %cst_16 = arith.constant dense<0.000000e+00> : vector<4x16x16xf32>
    %40 = tpu.matmul %37, %38, %cst_16 {dimension_numbers = #tpu.dot_dimension_numbers<[2], [2], [1], [1], [0, 0, 0, 1, 1, 1], [0], [0]>} : vector<4x16x8xf32>, vector<4x16x8xf32>, vector<4x16x16xf32> -> vector<4x16x16xf32>
    "tpu.trace_stop"() : () -> ()
    %cst_17 = arith.constant dense<0xFF800000> : vector<4x16xf32>
    %41 = vector.multi_reduction <maximumf>, %40, %cst_17 [2] : vector<4x16x16xf32> to vector<4x16xf32>
    %42 = vector.shape_cast %41 : vector<4x16xf32> to vector<4x16x1xf32>
    %43 = vector.broadcast %42 : vector<4x16x1xf32> to vector<4x16x16xf32>
    %44 = arith.subf %40, %43 : vector<4x16x16xf32>
    %45 = math.exp %44 : vector<4x16x16xf32>
    %cst_18 = arith.constant dense<0.000000e+00> : vector<4x16xf32>
    %46 = vector.multi_reduction <add>, %45, %cst_18 [2] : vector<4x16x16xf32> to vector<4x16xf32>
    %47 = vector.shape_cast %46 : vector<4x16xf32> to vector<4x16x1xf32>
    %48 = tpu.reciprocal %47 {approx = true} : vector<4x16x1xf32> -> vector<4x16x1xf32>
    %49 = vector.broadcast %48 : vector<4x16x1xf32> to vector<4x16x16xf32>
    %50 = arith.mulf %45, %49 : vector<4x16x16xf32>
    "tpu.trace_start"() <{level = 10 : i32, message = "bqk,bkd->bqd"}> : () -> ()
    %cst_19 = arith.constant dense<0.000000e+00> : vector<4x16x8xf32>
    %51 = tpu.matmul %50, %39, %cst_19 {dimension_numbers = #tpu.dot_dimension_numbers<[2], [1], [1], [2], [0, 0, 0, 1, 1, 2], [0], [0]>} : vector<4x16x16xf32>, vector<4x16x8xf32>, vector<4x16x8xf32> -> vector<4x16x8xf32>
    "tpu.trace_stop"() : () -> ()
    %52 = vector.shape_cast %51 : vector<4x16x8xf32> to vector<64x8xf32>
    %53 = vector.extract_strided_slice %18 {offsets = [0, 0], sizes = [8, 32], strides = [1, 1]} : vector<32x32xf32> to vector<8x32xf32>
    %cst_20 = arith.constant dense<0.000000e+00> : vector<64x32xf32>
    %54 = tpu.matmul %52, %53, %cst_20 {dimension_numbers = #tpu.dot_dimension_numbers<[1], [0], [0], [1], [0, 0, 1, 1], [], []>} : vector<64x8xf32>, vector<8x32xf32>, vector<64x32xf32> -> vector<64x32xf32>
    %55 = vector.extract_strided_slice %32 {offsets = [0, 0, 8], sizes = [4, 16, 8], strides = [1, 1, 1]} : vector<4x16x32xf32> to vector<4x16x8xf32>
    %56 = vector.extract_strided_slice %34 {offsets = [0, 0, 8], sizes = [4, 16, 8], strides = [1, 1, 1]} : vector<4x16x32xf32> to vector<4x16x8xf32>
    %57 = vector.extract_strided_slice %36 {offsets = [0, 0, 8], sizes = [4, 16, 8], strides = [1, 1, 1]} : vector<4x16x32xf32> to vector<4x16x8xf32>
    "tpu.trace_start"() <{level = 10 : i32, message = "bqd,bkd->bqk"}> : () -> ()
    %cst_21 = arith.constant dense<0.000000e+00> : vector<4x16x16xf32>
    %58 = tpu.matmul %55, %56, %cst_21 {dimension_numbers = #tpu.dot_dimension_numbers<[2], [2], [1], [1], [0, 0, 0, 1, 1, 1], [0], [0]>} : vector<4x16x8xf32>, vector<4x16x8xf32>, vector<4x16x16xf32> -> vector<4x16x16xf32>
    "tpu.trace_stop"() : () -> ()
    %cst_22 = arith.constant dense<0xFF800000> : vector<4x16xf32>
    %59 = vector.multi_reduction <maximumf>, %58, %cst_22 [2] : vector<4x16x16xf32> to vector<4x16xf32>
    %60 = vector.shape_cast %59 : vector<4x16xf32> to vector<4x16x1xf32>
    %61 = vector.broadcast %60 : vector<4x16x1xf32> to vector<4x16x16xf32>
    %62 = arith.subf %58, %61 : vector<4x16x16xf32>
    %63 = math.exp %62 : vector<4x16x16xf32>
    %cst_23 = arith.constant dense<0.000000e+00> : vector<4x16xf32>
    %64 = vector.multi_reduction <add>, %63, %cst_23 [2] : vector<4x16x16xf32> to vector<4x16xf32>
    %65 = vector.shape_cast %64 : vector<4x16xf32> to vector<4x16x1xf32>
    %66 = tpu.reciprocal %65 {approx = true} : vector<4x16x1xf32> -> vector<4x16x1xf32>
    %67 = vector.broadcast %66 : vector<4x16x1xf32> to vector<4x16x16xf32>
    %68 = arith.mulf %63, %67 : vector<4x16x16xf32>
    "tpu.trace_start"() <{level = 10 : i32, message = "bqk,bkd->bqd"}> : () -> ()
    %cst_24 = arith.constant dense<0.000000e+00> : vector<4x16x8xf32>
    %69 = tpu.matmul %68, %57, %cst_24 {dimension_numbers = #tpu.dot_dimension_numbers<[2], [1], [1], [2], [0, 0, 0, 1, 1, 2], [0], [0]>} : vector<4x16x16xf32>, vector<4x16x8xf32>, vector<4x16x8xf32> -> vector<4x16x8xf32>
    "tpu.trace_stop"() : () -> ()
    %70 = vector.shape_cast %69 : vector<4x16x8xf32> to vector<64x8xf32>
    %71 = vector.extract_strided_slice %18 {offsets = [8, 0], sizes = [8, 32], strides = [1, 1]} : vector<32x32xf32> to vector<8x32xf32>
    %cst_25 = arith.constant dense<0.000000e+00> : vector<64x32xf32>
    %72 = tpu.matmul %70, %71, %cst_25 {dimension_numbers = #tpu.dot_dimension_numbers<[1], [0], [0], [1], [0, 0, 1, 1], [], []>} : vector<64x8xf32>, vector<8x32xf32>, vector<64x32xf32> -> vector<64x32xf32>
    %73 = arith.addf %54, %72 : vector<64x32xf32>
    %74 = vector.extract_strided_slice %32 {offsets = [0, 0, 16], sizes = [4, 16, 8], strides = [1, 1, 1]} : vector<4x16x32xf32> to vector<4x16x8xf32>
    %75 = vector.extract_strided_slice %34 {offsets = [0, 0, 16], sizes = [4, 16, 8], strides = [1, 1, 1]} : vector<4x16x32xf32> to vector<4x16x8xf32>
    %76 = vector.extract_strided_slice %36 {offsets = [0, 0, 16], sizes = [4, 16, 8], strides = [1, 1, 1]} : vector<4x16x32xf32> to vector<4x16x8xf32>
    "tpu.trace_start"() <{level = 10 : i32, message = "bqd,bkd->bqk"}> : () -> ()
    %cst_26 = arith.constant dense<0.000000e+00> : vector<4x16x16xf32>
    %77 = tpu.matmul %74, %75, %cst_26 {dimension_numbers = #tpu.dot_dimension_numbers<[2], [2], [1], [1], [0, 0, 0, 1, 1, 1], [0], [0]>} : vector<4x16x8xf32>, vector<4x16x8xf32>, vector<4x16x16xf32> -> vector<4x16x16xf32>
    "tpu.trace_stop"() : () -> ()
    %cst_27 = arith.constant dense<0xFF800000> : vector<4x16xf32>
    %78 = vector.multi_reduction <maximumf>, %77, %cst_27 [2] : vector<4x16x16xf32> to vector<4x16xf32>
    %79 = vector.shape_cast %78 : vector<4x16xf32> to vector<4x16x1xf32>
    %80 = vector.broadcast %79 : vector<4x16x1xf32> to vector<4x16x16xf32>
    %81 = arith.subf %77, %80 : vector<4x16x16xf32>
    %82 = math.exp %81 : vector<4x16x16xf32>
    %cst_28 = arith.constant dense<0.000000e+00> : vector<4x16xf32>
    %83 = vector.multi_reduction <add>, %82, %cst_28 [2] : vector<4x16x16xf32> to vector<4x16xf32>
    %84 = vector.shape_cast %83 : vector<4x16xf32> to vector<4x16x1xf32>
    %85 = tpu.reciprocal %84 {approx = true} : vector<4x16x1xf32> -> vector<4x16x1xf32>
    %86 = vector.broadcast %85 : vector<4x16x1xf32> to vector<4x16x16xf32>
    %87 = arith.mulf %82, %86 : vector<4x16x16xf32>
    "tpu.trace_start"() <{level = 10 : i32, message = "bqk,bkd->bqd"}> : () -> ()
    %cst_29 = arith.constant dense<0.000000e+00> : vector<4x16x8xf32>
    %88 = tpu.matmul %87, %76, %cst_29 {dimension_numbers = #tpu.dot_dimension_numbers<[2], [1], [1], [2], [0, 0, 0, 1, 1, 2], [0], [0]>} : vector<4x16x16xf32>, vector<4x16x8xf32>, vector<4x16x8xf32> -> vector<4x16x8xf32>
    "tpu.trace_stop"() : () -> ()
    %89 = vector.shape_cast %88 : vector<4x16x8xf32> to vector<64x8xf32>
    %90 = vector.extract_strided_slice %18 {offsets = [16, 0], sizes = [8, 32], strides = [1, 1]} : vector<32x32xf32> to vector<8x32xf32>
    %cst_30 = arith.constant dense<0.000000e+00> : vector<64x32xf32>
    %91 = tpu.matmul %89, %90, %cst_30 {dimension_numbers = #tpu.dot_dimension_numbers<[1], [0], [0], [1], [0, 0, 1, 1], [], []>} : vector<64x8xf32>, vector<8x32xf32>, vector<64x32xf32> -> vector<64x32xf32>
    %92 = arith.addf %73, %91 : vector<64x32xf32>
    %93 = vector.extract_strided_slice %32 {offsets = [0, 0, 24], sizes = [4, 16, 8], strides = [1, 1, 1]} : vector<4x16x32xf32> to vector<4x16x8xf32>
    %94 = vector.extract_strided_slice %34 {offsets = [0, 0, 24], sizes = [4, 16, 8], strides = [1, 1, 1]} : vector<4x16x32xf32> to vector<4x16x8xf32>
    %95 = vector.extract_strided_slice %36 {offsets = [0, 0, 24], sizes = [4, 16, 8], strides = [1, 1, 1]} : vector<4x16x32xf32> to vector<4x16x8xf32>
    "tpu.trace_start"() <{level = 10 : i32, message = "bqd,bkd->bqk"}> : () -> ()
    %cst_31 = arith.constant dense<0.000000e+00> : vector<4x16x16xf32>
    %96 = tpu.matmul %93, %94, %cst_31 {dimension_numbers = #tpu.dot_dimension_numbers<[2], [2], [1], [1], [0, 0, 0, 1, 1, 1], [0], [0]>} : vector<4x16x8xf32>, vector<4x16x8xf32>, vector<4x16x16xf32> -> vector<4x16x16xf32>
    "tpu.trace_stop"() : () -> ()
    %cst_32 = arith.constant dense<0xFF800000> : vector<4x16xf32>
    %97 = vector.multi_reduction <maximumf>, %96, %cst_32 [2] : vector<4x16x16xf32> to vector<4x16xf32>
    %98 = vector.shape_cast %97 : vector<4x16xf32> to vector<4x16x1xf32>
    %99 = vector.broadcast %98 : vector<4x16x1xf32> to vector<4x16x16xf32>
    %100 = arith.subf %96, %99 : vector<4x16x16xf32>
    %101 = math.exp %100 : vector<4x16x16xf32>
    %cst_33 = arith.constant dense<0.000000e+00> : vector<4x16xf32>
    %102 = vector.multi_reduction <add>, %101, %cst_33 [2] : vector<4x16x16xf32> to vector<4x16xf32>
    %103 = vector.shape_cast %102 : vector<4x16xf32> to vector<4x16x1xf32>
    %104 = tpu.reciprocal %103 {approx = true} : vector<4x16x1xf32> -> vector<4x16x1xf32>
    %105 = vector.broadcast %104 : vector<4x16x1xf32> to vector<4x16x16xf32>
    %106 = arith.mulf %101, %105 : vector<4x16x16xf32>
    "tpu.trace_start"() <{level = 10 : i32, message = "bqk,bkd->bqd"}> : () -> ()
    %cst_34 = arith.constant dense<0.000000e+00> : vector<4x16x8xf32>
    %107 = tpu.matmul %106, %95, %cst_34 {dimension_numbers = #tpu.dot_dimension_numbers<[2], [1], [1], [2], [0, 0, 0, 1, 1, 2], [0], [0]>} : vector<4x16x16xf32>, vector<4x16x8xf32>, vector<4x16x8xf32> -> vector<4x16x8xf32>
    "tpu.trace_stop"() : () -> ()
    %108 = vector.shape_cast %107 : vector<4x16x8xf32> to vector<64x8xf32>
    %109 = vector.extract_strided_slice %18 {offsets = [24, 0], sizes = [8, 32], strides = [1, 1]} : vector<32x32xf32> to vector<8x32xf32>
    %cst_35 = arith.constant dense<0.000000e+00> : vector<64x32xf32>
    %110 = tpu.matmul %108, %109, %cst_35 {dimension_numbers = #tpu.dot_dimension_numbers<[1], [0], [0], [1], [0, 0, 1, 1], [], []>} : vector<64x8xf32>, vector<8x32xf32>, vector<64x32xf32> -> vector<64x32xf32>
    %111 = arith.addf %92, %110 : vector<64x32xf32>
    %112 = vector.broadcast %21 : vector<1x32xf32> to vector<64x32xf32>
    %113 = arith.addf %111, %112 : vector<64x32xf32>
    %114 = arith.addf %8, %113 : vector<64x32xf32>
    %cst_36 = arith.constant dense<0.000000e+00> : vector<64xf32>
    %115 = vector.multi_reduction <add>, %114, %cst_36 [1] : vector<64x32xf32> to vector<64xf32>
    %116 = vector.shape_cast %115 : vector<64xf32> to vector<64x1xf32>
    %cst_37 = arith.constant 3.200000e+01 : f32
    %117 = vector.broadcast %cst_37 : f32 to vector<64x1xf32>
    %118 = arith.divf %116, %117 : vector<64x1xf32>
    %119 = vector.broadcast %118 : vector<64x1xf32> to vector<64x32xf32>
    %120 = arith.subf %114, %119 : vector<64x32xf32>
    %121 = vector.broadcast %118 : vector<64x1xf32> to vector<64x32xf32>
    %122 = arith.subf %114, %121 : vector<64x32xf32>
    %123 = arith.mulf %120, %122 : vector<64x32xf32>
    %cst_38 = arith.constant dense<0.000000e+00> : vector<64xf32>
    %124 = vector.multi_reduction <add>, %123, %cst_38 [1] : vector<64x32xf32> to vector<64xf32>
    %125 = vector.shape_cast %124 : vector<64xf32> to vector<64x1xf32>
    %cst_39 = arith.constant 3.200000e+01 : f32
    %126 = vector.broadcast %cst_39 : f32 to vector<64x1xf32>
    %127 = arith.divf %125, %126 : vector<64x1xf32>
    %128 = vector.broadcast %118 : vector<64x1xf32> to vector<64x32xf32>
    %129 = arith.subf %114, %128 : vector<64x32xf32>
    %cst_40 = arith.constant 9.99999974E-6 : f32
    %130 = vector.broadcast %cst_40 : f32 to vector<64x1xf32>
    %131 = arith.addf %127, %130 : vector<64x1xf32>
    %132 = math.rsqrt %131 : vector<64x1xf32>
    %133 = vector.broadcast %132 : vector<64x1xf32> to vector<64x32xf32>
    %134 = arith.mulf %129, %133 : vector<64x32xf32>
    %135 = vector.broadcast %24 : vector<1x32xf32> to vector<64x32xf32>
    %136 = arith.mulf %134, %135 : vector<64x32xf32>
    %137 = vector.broadcast %25 : vector<1x32xf32> to vector<64x32xf32>
    %138 = arith.addf %136, %137 : vector<64x32xf32>
    %cst_41 = arith.constant dense<0.000000e+00> : vector<64x128xf32>
    %139 = tpu.matmul %138, %19, %cst_41 {dimension_numbers = #tpu.dot_dimension_numbers<[1], [0], [0], [1], [0, 0, 1, 1], [], []>} : vector<64x32xf32>, vector<32x128xf32>, vector<64x128xf32> -> vector<64x128xf32>
    %140 = vector.broadcast %22 : vector<1x128xf32> to vector<64x128xf32>
    %141 = arith.addf %139, %140 : vector<64x128xf32>
    %cst_42 = arith.constant 5.000000e-01 : f32
    %142 = vector.broadcast %cst_42 : f32 to vector<64x128xf32>
    %143 = arith.mulf %142, %141 : vector<64x128xf32>
    %cst_43 = arith.constant 4.471500e-02 : f32
    %144 = vector.broadcast %cst_43 : f32 to vector<64x128xf32>
    %145 = arith.mulf %144, %141 : vector<64x128xf32>
    %146 = arith.mulf %145, %141 : vector<64x128xf32>
    %147 = arith.mulf %146, %141 : vector<64x128xf32>
    %148 = arith.addf %141, %147 : vector<64x128xf32>
    %cst_44 = arith.constant 0.797884583 : f32
    %149 = vector.broadcast %cst_44 : f32 to vector<64x128xf32>
    %150 = arith.mulf %149, %148 : vector<64x128xf32>
    %151 = math.tanh %150 : vector<64x128xf32>
    %cst_45 = arith.constant 1.000000e+00 : f32
    %152 = vector.broadcast %cst_45 : f32 to vector<64x128xf32>
    %153 = arith.addf %152, %151 : vector<64x128xf32>
    %154 = arith.mulf %143, %153 : vector<64x128xf32>
    %cst_46 = arith.constant dense<0.000000e+00> : vector<64x32xf32>
    %155 = tpu.matmul %154, %14, %cst_46 {dimension_numbers = #tpu.dot_dimension_numbers<[1], [0], [0], [1], [0, 0, 1, 1], [], []>} : vector<64x128xf32>, vector<128x32xf32>, vector<64x32xf32> -> vector<64x32xf32>
    %156 = vector.broadcast %23 : vector<1x32xf32> to vector<64x32xf32>
    %157 = arith.addf %155, %156 : vector<64x32xf32>
    %158 = arith.addf %138, %157 : vector<64x32xf32>
    %cst_47 = arith.constant dense<0.000000e+00> : vector<64xf32>
    %159 = vector.multi_reduction <add>, %158, %cst_47 [1] : vector<64x32xf32> to vector<64xf32>
    %160 = vector.shape_cast %159 : vector<64xf32> to vector<64x1xf32>
    %cst_48 = arith.constant 3.200000e+01 : f32
    %161 = vector.broadcast %cst_48 : f32 to vector<64x1xf32>
    %162 = arith.divf %160, %161 : vector<64x1xf32>
    %163 = vector.broadcast %162 : vector<64x1xf32> to vector<64x32xf32>
    %164 = arith.subf %158, %163 : vector<64x32xf32>
    %165 = vector.broadcast %162 : vector<64x1xf32> to vector<64x32xf32>
    %166 = arith.subf %158, %165 : vector<64x32xf32>
    %167 = arith.mulf %164, %166 : vector<64x32xf32>
    %cst_49 = arith.constant dense<0.000000e+00> : vector<64xf32>
    %168 = vector.multi_reduction <add>, %167, %cst_49 [1] : vector<64x32xf32> to vector<64xf32>
    %169 = vector.shape_cast %168 : vector<64xf32> to vector<64x1xf32>
    %cst_50 = arith.constant 3.200000e+01 : f32
    %170 = vector.broadcast %cst_50 : f32 to vector<64x1xf32>
    %171 = arith.divf %169, %170 : vector<64x1xf32>
    %172 = vector.broadcast %162 : vector<64x1xf32> to vector<64x32xf32>
    %173 = arith.subf %158, %172 : vector<64x32xf32>
    %cst_51 = arith.constant 9.99999974E-6 : f32
    %174 = vector.broadcast %cst_51 : f32 to vector<64x1xf32>
    %175 = arith.addf %171, %174 : vector<64x1xf32>
    %176 = math.rsqrt %175 : vector<64x1xf32>
    %177 = vector.broadcast %176 : vector<64x1xf32> to vector<64x32xf32>
    %178 = arith.mulf %173, %177 : vector<64x32xf32>
    %179 = vector.broadcast %26 : vector<1x32xf32> to vector<64x32xf32>
    %180 = arith.mulf %178, %179 : vector<64x32xf32>
    %181 = vector.broadcast %27 : vector<1x32xf32> to vector<64x32xf32>
    %182 = arith.addf %180, %181 : vector<64x32xf32>
    %c1 = arith.constant 1 : index
    %c0_52 = arith.constant 0 : index
    %c0_53 = arith.constant 0 : index
    %183 = vector.load %arg4[%c1, %c0_52, %c0_53] : memref<2x32x256xbf16, #tpu.memory_space<vmem>>, vector<1x32x256xbf16>
    %184 = vector.shape_cast %183 : vector<1x32x256xbf16> to vector<32x256xbf16>
    %185 = arith.extf %184 : vector<32x256xbf16> to vector<32x256xf32>
    %c1_54 = arith.constant 1 : index
    %c0_55 = arith.constant 0 : index
    %c0_56 = arith.constant 0 : index
    %186 = vector.load %arg5[%c1_54, %c0_55, %c0_56] : memref<2x128x32xbf16, #tpu.memory_space<vmem>>, vector<1x128x32xbf16>
    %187 = vector.shape_cast %186 : vector<1x128x32xbf16> to vector<128x32xbf16>
    %188 = arith.extf %187 : vector<128x32xbf16> to vector<128x32xf32>
    %c1_57 = arith.constant 1 : index
    %c0_58 = arith.constant 0 : index
    %c0_59 = arith.constant 0 : index
    %189 = vector.load %arg6[%c1_57, %c0_58, %c0_59] : memref<2x8x128xf32, #tpu.memory_space<vmem>>, vector<1x8x128xf32>
    %190 = vector.shape_cast %189 : vector<1x8x128xf32> to vector<8x128xf32>
    %191 = vector.extract_strided_slice %185 {offsets = [0, 0], sizes = [32, 96], strides = [1, 1]} : vector<32x256xf32> to vector<32x96xf32>
    %192 = vector.extract_strided_slice %185 {offsets = [0, 96], sizes = [32, 32], strides = [1, 1]} : vector<32x256xf32> to vector<32x32xf32>
    %193 = vector.extract_strided_slice %185 {offsets = [0, 128], sizes = [32, 128], strides = [1, 1]} : vector<32x256xf32> to vector<32x128xf32>
    %194 = vector.extract_strided_slice %190 {offsets = [0, 0], sizes = [1, 96], strides = [1, 1]} : vector<8x128xf32> to vector<1x96xf32>
    %195 = vector.extract_strided_slice %190 {offsets = [1, 0], sizes = [1, 32], strides = [1, 1]} : vector<8x128xf32> to vector<1x32xf32>
    %196 = vector.extract_strided_slice %190 {offsets = [2, 0], sizes = [1, 128], strides = [1, 1]} : vector<8x128xf32> to vector<1x128xf32>
    %197 = vector.extract_strided_slice %190 {offsets = [3, 0], sizes = [1, 32], strides = [1, 1]} : vector<8x128xf32> to vector<1x32xf32>
    %198 = vector.extract_strided_slice %190 {offsets = [4, 0], sizes = [1, 32], strides = [1, 1]} : vector<8x128xf32> to vector<1x32xf32>
    %199 = vector.extract_strided_slice %190 {offsets = [5, 0], sizes = [1, 32], strides = [1, 1]} : vector<8x128xf32> to vector<1x32xf32>
    %200 = vector.extract_strided_slice %190 {offsets = [6, 0], sizes = [1, 32], strides = [1, 1]} : vector<8x128xf32> to vector<1x32xf32>
    %201 = vector.extract_strided_slice %190 {offsets = [7, 0], sizes = [1, 32], strides = [1, 1]} : vector<8x128xf32> to vector<1x32xf32>
    %cst_60 = arith.constant dense<0.000000e+00> : vector<64x96xf32>
    %202 = tpu.matmul %182, %191, %cst_60 {dimension_numbers = #tpu.dot_dimension_numbers<[1], [0], [0], [1], [0, 0, 1, 1], [], []>} : vector<64x32xf32>, vector<32x96xf32>, vector<64x96xf32> -> vector<64x96xf32>
    %203 = vector.broadcast %194 : vector<1x96xf32> to vector<64x96xf32>
    %204 = arith.addf %202, %203 : vector<64x96xf32>
    %205 = vector.extract_strided_slice %204 {offsets = [0, 0], sizes = [64, 32], strides = [1, 1]} : vector<64x96xf32> to vector<64x32xf32>
    %206 = vector.shape_cast %205 : vector<64x32xf32> to vector<4x16x32xf32>
    %207 = vector.extract_strided_slice %204 {offsets = [0, 32], sizes = [64, 32], strides = [1, 1]} : vector<64x96xf32> to vector<64x32xf32>
    %208 = vector.shape_cast %207 : vector<64x32xf32> to vector<4x16x32xf32>
    %209 = vector.extract_strided_slice %204 {offsets = [0, 64], sizes = [64, 32], strides = [1, 1]} : vector<64x96xf32> to vector<64x32xf32>
    %210 = vector.shape_cast %209 : vector<64x32xf32> to vector<4x16x32xf32>
    %211 = vector.extract_strided_slice %206 {offsets = [0, 0, 0], sizes = [4, 16, 8], strides = [1, 1, 1]} : vector<4x16x32xf32> to vector<4x16x8xf32>
    %212 = vector.extract_strided_slice %208 {offsets = [0, 0, 0], sizes = [4, 16, 8], strides = [1, 1, 1]} : vector<4x16x32xf32> to vector<4x16x8xf32>
    %213 = vector.extract_strided_slice %210 {offsets = [0, 0, 0], sizes = [4, 16, 8], strides = [1, 1, 1]} : vector<4x16x32xf32> to vector<4x16x8xf32>
    "tpu.trace_start"() <{level = 10 : i32, message = "bqd,bkd->bqk"}> : () -> ()
    %cst_61 = arith.constant dense<0.000000e+00> : vector<4x16x16xf32>
    %214 = tpu.matmul %211, %212, %cst_61 {dimension_numbers = #tpu.dot_dimension_numbers<[2], [2], [1], [1], [0, 0, 0, 1, 1, 1], [0], [0]>} : vector<4x16x8xf32>, vector<4x16x8xf32>, vector<4x16x16xf32> -> vector<4x16x16xf32>
    "tpu.trace_stop"() : () -> ()
    %cst_62 = arith.constant dense<0xFF800000> : vector<4x16xf32>
    %215 = vector.multi_reduction <maximumf>, %214, %cst_62 [2] : vector<4x16x16xf32> to vector<4x16xf32>
    %216 = vector.shape_cast %215 : vector<4x16xf32> to vector<4x16x1xf32>
    %217 = vector.broadcast %216 : vector<4x16x1xf32> to vector<4x16x16xf32>
    %218 = arith.subf %214, %217 : vector<4x16x16xf32>
    %219 = math.exp %218 : vector<4x16x16xf32>
    %cst_63 = arith.constant dense<0.000000e+00> : vector<4x16xf32>
    %220 = vector.multi_reduction <add>, %219, %cst_63 [2] : vector<4x16x16xf32> to vector<4x16xf32>
    %221 = vector.shape_cast %220 : vector<4x16xf32> to vector<4x16x1xf32>
    %222 = tpu.reciprocal %221 {approx = true} : vector<4x16x1xf32> -> vector<4x16x1xf32>
    %223 = vector.broadcast %222 : vector<4x16x1xf32> to vector<4x16x16xf32>
    %224 = arith.mulf %219, %223 : vector<4x16x16xf32>
    "tpu.trace_start"() <{level = 10 : i32, message = "bqk,bkd->bqd"}> : () -> ()
    %cst_64 = arith.constant dense<0.000000e+00> : vector<4x16x8xf32>
    %225 = tpu.matmul %224, %213, %cst_64 {dimension_numbers = #tpu.dot_dimension_numbers<[2], [1], [1], [2], [0, 0, 0, 1, 1, 2], [0], [0]>} : vector<4x16x16xf32>, vector<4x16x8xf32>, vector<4x16x8xf32> -> vector<4x16x8xf32>
    "tpu.trace_stop"() : () -> ()
    %226 = vector.shape_cast %225 : vector<4x16x8xf32> to vector<64x8xf32>
    %227 = vector.extract_strided_slice %192 {offsets = [0, 0], sizes = [8, 32], strides = [1, 1]} : vector<32x32xf32> to vector<8x32xf32>
    %cst_65 = arith.constant dense<0.000000e+00> : vector<64x32xf32>
    %228 = tpu.matmul %226, %227, %cst_65 {dimension_numbers = #tpu.dot_dimension_numbers<[1], [0], [0], [1], [0, 0, 1, 1], [], []>} : vector<64x8xf32>, vector<8x32xf32>, vector<64x32xf32> -> vector<64x32xf32>
    %229 = vector.extract_strided_slice %206 {offsets = [0, 0, 8], sizes = [4, 16, 8], strides = [1, 1, 1]} : vector<4x16x32xf32> to vector<4x16x8xf32>
    %230 = vector.extract_strided_slice %208 {offsets = [0, 0, 8], sizes = [4, 16, 8], strides = [1, 1, 1]} : vector<4x16x32xf32> to vector<4x16x8xf32>
    %231 = vector.extract_strided_slice %210 {offsets = [0, 0, 8], sizes = [4, 16, 8], strides = [1, 1, 1]} : vector<4x16x32xf32> to vector<4x16x8xf32>
    "tpu.trace_start"() <{level = 10 : i32, message = "bqd,bkd->bqk"}> : () -> ()
    %cst_66 = arith.constant dense<0.000000e+00> : vector<4x16x16xf32>
    %232 = tpu.matmul %229, %230, %cst_66 {dimension_numbers = #tpu.dot_dimension_numbers<[2], [2], [1], [1], [0, 0, 0, 1, 1, 1], [0], [0]>} : vector<4x16x8xf32>, vector<4x16x8xf32>, vector<4x16x16xf32> -> vector<4x16x16xf32>
    "tpu.trace_stop"() : () -> ()
    %cst_67 = arith.constant dense<0xFF800000> : vector<4x16xf32>
    %233 = vector.multi_reduction <maximumf>, %232, %cst_67 [2] : vector<4x16x16xf32> to vector<4x16xf32>
    %234 = vector.shape_cast %233 : vector<4x16xf32> to vector<4x16x1xf32>
    %235 = vector.broadcast %234 : vector<4x16x1xf32> to vector<4x16x16xf32>
    %236 = arith.subf %232, %235 : vector<4x16x16xf32>
    %237 = math.exp %236 : vector<4x16x16xf32>
    %cst_68 = arith.constant dense<0.000000e+00> : vector<4x16xf32>
    %238 = vector.multi_reduction <add>, %237, %cst_68 [2] : vector<4x16x16xf32> to vector<4x16xf32>
    %239 = vector.shape_cast %238 : vector<4x16xf32> to vector<4x16x1xf32>
    %240 = tpu.reciprocal %239 {approx = true} : vector<4x16x1xf32> -> vector<4x16x1xf32>
    %241 = vector.broadcast %240 : vector<4x16x1xf32> to vector<4x16x16xf32>
    %242 = arith.mulf %237, %241 : vector<4x16x16xf32>
    "tpu.trace_start"() <{level = 10 : i32, message = "bqk,bkd->bqd"}> : () -> ()
    %cst_69 = arith.constant dense<0.000000e+00> : vector<4x16x8xf32>
    %243 = tpu.matmul %242, %231, %cst_69 {dimension_numbers = #tpu.dot_dimension_numbers<[2], [1], [1], [2], [0, 0, 0, 1, 1, 2], [0], [0]>} : vector<4x16x16xf32>, vector<4x16x8xf32>, vector<4x16x8xf32> -> vector<4x16x8xf32>
    "tpu.trace_stop"() : () -> ()
    %244 = vector.shape_cast %243 : vector<4x16x8xf32> to vector<64x8xf32>
    %245 = vector.extract_strided_slice %192 {offsets = [8, 0], sizes = [8, 32], strides = [1, 1]} : vector<32x32xf32> to vector<8x32xf32>
    %cst_70 = arith.constant dense<0.000000e+00> : vector<64x32xf32>
    %246 = tpu.matmul %244, %245, %cst_70 {dimension_numbers = #tpu.dot_dimension_numbers<[1], [0], [0], [1], [0, 0, 1, 1], [], []>} : vector<64x8xf32>, vector<8x32xf32>, vector<64x32xf32> -> vector<64x32xf32>
    %247 = arith.addf %228, %246 : vector<64x32xf32>
    %248 = vector.extract_strided_slice %206 {offsets = [0, 0, 16], sizes = [4, 16, 8], strides = [1, 1, 1]} : vector<4x16x32xf32> to vector<4x16x8xf32>
    %249 = vector.extract_strided_slice %208 {offsets = [0, 0, 16], sizes = [4, 16, 8], strides = [1, 1, 1]} : vector<4x16x32xf32> to vector<4x16x8xf32>
    %250 = vector.extract_strided_slice %210 {offsets = [0, 0, 16], sizes = [4, 16, 8], strides = [1, 1, 1]} : vector<4x16x32xf32> to vector<4x16x8xf32>
    "tpu.trace_start"() <{level = 10 : i32, message = "bqd,bkd->bqk"}> : () -> ()
    %cst_71 = arith.constant dense<0.000000e+00> : vector<4x16x16xf32>
    %251 = tpu.matmul %248, %249, %cst_71 {dimension_numbers = #tpu.dot_dimension_numbers<[2], [2], [1], [1], [0, 0, 0, 1, 1, 1], [0], [0]>} : vector<4x16x8xf32>, vector<4x16x8xf32>, vector<4x16x16xf32> -> vector<4x16x16xf32>
    "tpu.trace_stop"() : () -> ()
    %cst_72 = arith.constant dense<0xFF800000> : vector<4x16xf32>
    %252 = vector.multi_reduction <maximumf>, %251, %cst_72 [2] : vector<4x16x16xf32> to vector<4x16xf32>
    %253 = vector.shape_cast %252 : vector<4x16xf32> to vector<4x16x1xf32>
    %254 = vector.broadcast %253 : vector<4x16x1xf32> to vector<4x16x16xf32>
    %255 = arith.subf %251, %254 : vector<4x16x16xf32>
    %256 = math.exp %255 : vector<4x16x16xf32>
    %cst_73 = arith.constant dense<0.000000e+00> : vector<4x16xf32>
    %257 = vector.multi_reduction <add>, %256, %cst_73 [2] : vector<4x16x16xf32> to vector<4x16xf32>
    %258 = vector.shape_cast %257 : vector<4x16xf32> to vector<4x16x1xf32>
    %259 = tpu.reciprocal %258 {approx = true} : vector<4x16x1xf32> -> vector<4x16x1xf32>
    %260 = vector.broadcast %259 : vector<4x16x1xf32> to vector<4x16x16xf32>
    %261 = arith.mulf %256, %260 : vector<4x16x16xf32>
    "tpu.trace_start"() <{level = 10 : i32, message = "bqk,bkd->bqd"}> : () -> ()
    %cst_74 = arith.constant dense<0.000000e+00> : vector<4x16x8xf32>
    %262 = tpu.matmul %261, %250, %cst_74 {dimension_numbers = #tpu.dot_dimension_numbers<[2], [1], [1], [2], [0, 0, 0, 1, 1, 2], [0], [0]>} : vector<4x16x16xf32>, vector<4x16x8xf32>, vector<4x16x8xf32> -> vector<4x16x8xf32>
    "tpu.trace_stop"() : () -> ()
    %263 = vector.shape_cast %262 : vector<4x16x8xf32> to vector<64x8xf32>
    %264 = vector.extract_strided_slice %192 {offsets = [16, 0], sizes = [8, 32], strides = [1, 1]} : vector<32x32xf32> to vector<8x32xf32>
    %cst_75 = arith.constant dense<0.000000e+00> : vector<64x32xf32>
    %265 = tpu.matmul %263, %264, %cst_75 {dimension_numbers = #tpu.dot_dimension_numbers<[1], [0], [0], [1], [0, 0, 1, 1], [], []>} : vector<64x8xf32>, vector<8x32xf32>, vector<64x32xf32> -> vector<64x32xf32>
    %266 = arith.addf %247, %265 : vector<64x32xf32>
    %267 = vector.extract_strided_slice %206 {offsets = [0, 0, 24], sizes = [4, 16, 8], strides = [1, 1, 1]} : vector<4x16x32xf32> to vector<4x16x8xf32>
    %268 = vector.extract_strided_slice %208 {offsets = [0, 0, 24], sizes = [4, 16, 8], strides = [1, 1, 1]} : vector<4x16x32xf32> to vector<4x16x8xf32>
    %269 = vector.extract_strided_slice %210 {offsets = [0, 0, 24], sizes = [4, 16, 8], strides = [1, 1, 1]} : vector<4x16x32xf32> to vector<4x16x8xf32>
    "tpu.trace_start"() <{level = 10 : i32, message = "bqd,bkd->bqk"}> : () -> ()
    %cst_76 = arith.constant dense<0.000000e+00> : vector<4x16x16xf32>
    %270 = tpu.matmul %267, %268, %cst_76 {dimension_numbers = #tpu.dot_dimension_numbers<[2], [2], [1], [1], [0, 0, 0, 1, 1, 1], [0], [0]>} : vector<4x16x8xf32>, vector<4x16x8xf32>, vector<4x16x16xf32> -> vector<4x16x16xf32>
    "tpu.trace_stop"() : () -> ()
    %cst_77 = arith.constant dense<0xFF800000> : vector<4x16xf32>
    %271 = vector.multi_reduction <maximumf>, %270, %cst_77 [2] : vector<4x16x16xf32> to vector<4x16xf32>
    %272 = vector.shape_cast %271 : vector<4x16xf32> to vector<4x16x1xf32>
    %273 = vector.broadcast %272 : vector<4x16x1xf32> to vector<4x16x16xf32>
    %274 = arith.subf %270, %273 : vector<4x16x16xf32>
    %275 = math.exp %274 : vector<4x16x16xf32>
    %cst_78 = arith.constant dense<0.000000e+00> : vector<4x16xf32>
    %276 = vector.multi_reduction <add>, %275, %cst_78 [2] : vector<4x16x16xf32> to vector<4x16xf32>
    %277 = vector.shape_cast %276 : vector<4x16xf32> to vector<4x16x1xf32>
    %278 = tpu.reciprocal %277 {approx = true} : vector<4x16x1xf32> -> vector<4x16x1xf32>
    %279 = vector.broadcast %278 : vector<4x16x1xf32> to vector<4x16x16xf32>
    %280 = arith.mulf %275, %279 : vector<4x16x16xf32>
    "tpu.trace_start"() <{level = 10 : i32, message = "bqk,bkd->bqd"}> : () -> ()
    %cst_79 = arith.constant dense<0.000000e+00> : vector<4x16x8xf32>
    %281 = tpu.matmul %280, %269, %cst_79 {dimension_numbers = #tpu.dot_dimension_numbers<[2], [1], [1], [2], [0, 0, 0, 1, 1, 2], [0], [0]>} : vector<4x16x16xf32>, vector<4x16x8xf32>, vector<4x16x8xf32> -> vector<4x16x8xf32>
    "tpu.trace_stop"() : () -> ()
    %282 = vector.shape_cast %281 : vector<4x16x8xf32> to vector<64x8xf32>
    %283 = vector.extract_strided_slice %192 {offsets = [24, 0], sizes = [8, 32], strides = [1, 1]} : vector<32x32xf32> to vector<8x32xf32>
    %cst_80 = arith.constant dense<0.000000e+00> : vector<64x32xf32>
    %284 = tpu.matmul %282, %283, %cst_80 {dimension_numbers = #tpu.dot_dimension_numbers<[1], [0], [0], [1], [0, 0, 1, 1], [], []>} : vector<64x8xf32>, vector<8x32xf32>, vector<64x32xf32> -> vector<64x32xf32>
    %285 = arith.addf %266, %284 : vector<64x32xf32>
    %286 = vector.broadcast %195 : vector<1x32xf32> to vector<64x32xf32>
    %287 = arith.addf %285, %286 : vector<64x32xf32>
    %288 = arith.addf %182, %287 : vector<64x32xf32>
    %cst_81 = arith.constant dense<0.000000e+00> : vector<64xf32>
    %289 = vector.multi_reduction <add>, %288, %cst_81 [1] : vector<64x32xf32> to vector<64xf32>
    %290 = vector.shape_cast %289 : vector<64xf32> to vector<64x1xf32>
    %cst_82 = arith.constant 3.200000e+01 : f32
    %291 = vector.broadcast %cst_82 : f32 to vector<64x1xf32>
    %292 = arith.divf %290, %291 : vector<64x1xf32>
    %293 = vector.broadcast %292 : vector<64x1xf32> to vector<64x32xf32>
    %294 = arith.subf %288, %293 : vector<64x32xf32>
    %295 = vector.broadcast %292 : vector<64x1xf32> to vector<64x32xf32>
    %296 = arith.subf %288, %295 : vector<64x32xf32>
    %297 = arith.mulf %294, %296 : vector<64x32xf32>
    %cst_83 = arith.constant dense<0.000000e+00> : vector<64xf32>
    %298 = vector.multi_reduction <add>, %297, %cst_83 [1] : vector<64x32xf32> to vector<64xf32>
    %299 = vector.shape_cast %298 : vector<64xf32> to vector<64x1xf32>
    %cst_84 = arith.constant 3.200000e+01 : f32
    %300 = vector.broadcast %cst_84 : f32 to vector<64x1xf32>
    %301 = arith.divf %299, %300 : vector<64x1xf32>
    %302 = vector.broadcast %292 : vector<64x1xf32> to vector<64x32xf32>
    %303 = arith.subf %288, %302 : vector<64x32xf32>
    %cst_85 = arith.constant 9.99999974E-6 : f32
    %304 = vector.broadcast %cst_85 : f32 to vector<64x1xf32>
    %305 = arith.addf %301, %304 : vector<64x1xf32>
    %306 = math.rsqrt %305 : vector<64x1xf32>
    %307 = vector.broadcast %306 : vector<64x1xf32> to vector<64x32xf32>
    %308 = arith.mulf %303, %307 : vector<64x32xf32>
    %309 = vector.broadcast %198 : vector<1x32xf32> to vector<64x32xf32>
    %310 = arith.mulf %308, %309 : vector<64x32xf32>
    %311 = vector.broadcast %199 : vector<1x32xf32> to vector<64x32xf32>
    %312 = arith.addf %310, %311 : vector<64x32xf32>
    %cst_86 = arith.constant dense<0.000000e+00> : vector<64x128xf32>
    %313 = tpu.matmul %312, %193, %cst_86 {dimension_numbers = #tpu.dot_dimension_numbers<[1], [0], [0], [1], [0, 0, 1, 1], [], []>} : vector<64x32xf32>, vector<32x128xf32>, vector<64x128xf32> -> vector<64x128xf32>
    %314 = vector.broadcast %196 : vector<1x128xf32> to vector<64x128xf32>
    %315 = arith.addf %313, %314 : vector<64x128xf32>
    %cst_87 = arith.constant 5.000000e-01 : f32
    %316 = vector.broadcast %cst_87 : f32 to vector<64x128xf32>
    %317 = arith.mulf %316, %315 : vector<64x128xf32>
    %cst_88 = arith.constant 4.471500e-02 : f32
    %318 = vector.broadcast %cst_88 : f32 to vector<64x128xf32>
    %319 = arith.mulf %318, %315 : vector<64x128xf32>
    %320 = arith.mulf %319, %315 : vector<64x128xf32>
    %321 = arith.mulf %320, %315 : vector<64x128xf32>
    %322 = arith.addf %315, %321 : vector<64x128xf32>
    %cst_89 = arith.constant 0.797884583 : f32
    %323 = vector.broadcast %cst_89 : f32 to vector<64x128xf32>
    %324 = arith.mulf %323, %322 : vector<64x128xf32>
    %325 = math.tanh %324 : vector<64x128xf32>
    %cst_90 = arith.constant 1.000000e+00 : f32
    %326 = vector.broadcast %cst_90 : f32 to vector<64x128xf32>
    %327 = arith.addf %326, %325 : vector<64x128xf32>
    %328 = arith.mulf %317, %327 : vector<64x128xf32>
    %cst_91 = arith.constant dense<0.000000e+00> : vector<64x32xf32>
    %329 = tpu.matmul %328, %188, %cst_91 {dimension_numbers = #tpu.dot_dimension_numbers<[1], [0], [0], [1], [0, 0, 1, 1], [], []>} : vector<64x128xf32>, vector<128x32xf32>, vector<64x32xf32> -> vector<64x32xf32>
    %330 = vector.broadcast %197 : vector<1x32xf32> to vector<64x32xf32>
    %331 = arith.addf %329, %330 : vector<64x32xf32>
    %332 = arith.addf %312, %331 : vector<64x32xf32>
    %cst_92 = arith.constant dense<0.000000e+00> : vector<64xf32>
    %333 = vector.multi_reduction <add>, %332, %cst_92 [1] : vector<64x32xf32> to vector<64xf32>
    %334 = vector.shape_cast %333 : vector<64xf32> to vector<64x1xf32>
    %cst_93 = arith.constant 3.200000e+01 : f32
    %335 = vector.broadcast %cst_93 : f32 to vector<64x1xf32>
    %336 = arith.divf %334, %335 : vector<64x1xf32>
    %337 = vector.broadcast %336 : vector<64x1xf32> to vector<64x32xf32>
    %338 = arith.subf %332, %337 : vector<64x32xf32>
    %339 = vector.broadcast %336 : vector<64x1xf32> to vector<64x32xf32>
    %340 = arith.subf %332, %339 : vector<64x32xf32>
    %341 = arith.mulf %338, %340 : vector<64x32xf32>
    %cst_94 = arith.constant dense<0.000000e+00> : vector<64xf32>
    %342 = vector.multi_reduction <add>, %341, %cst_94 [1] : vector<64x32xf32> to vector<64xf32>
    %343 = vector.shape_cast %342 : vector<64xf32> to vector<64x1xf32>
    %cst_95 = arith.constant 3.200000e+01 : f32
    %344 = vector.broadcast %cst_95 : f32 to vector<64x1xf32>
    %345 = arith.divf %343, %344 : vector<64x1xf32>
    %346 = vector.broadcast %336 : vector<64x1xf32> to vector<64x32xf32>
    %347 = arith.subf %332, %346 : vector<64x32xf32>
    %cst_96 = arith.constant 9.99999974E-6 : f32
    %348 = vector.broadcast %cst_96 : f32 to vector<64x1xf32>
    %349 = arith.addf %345, %348 : vector<64x1xf32>
    %350 = math.rsqrt %349 : vector<64x1xf32>
    %351 = vector.broadcast %350 : vector<64x1xf32> to vector<64x32xf32>
    %352 = arith.mulf %347, %351 : vector<64x32xf32>
    %353 = vector.broadcast %200 : vector<1x32xf32> to vector<64x32xf32>
    %354 = arith.mulf %352, %353 : vector<64x32xf32>
    %355 = vector.broadcast %201 : vector<1x32xf32> to vector<64x32xf32>
    %356 = arith.addf %354, %355 : vector<64x32xf32>
    %c0_97 = arith.constant 0 : index
    %c0_98 = arith.constant 0 : index
    %357 = vector.load %arg7[%c0_97, %c0_98] : memref<64x32xf32, #tpu.memory_space<vmem>>, vector<64x32xf32>
    tpu.vector_store %arg7[%c0_97, %c0_98], %356 {strides = array<i32>} : memref<64x32xf32, #tpu.memory_space<vmem>>, vector<64x32xf32>,
    return
  }
  func.func @transform_0(%arg0: i32) -> (i32, i32) {
    %c0_i32 = arith.constant 0 : i32
    %c0_i32_0 = arith.constant 0 : i32
    return %arg0, %c0_i32 : i32, i32
  }
  func.func @transform_1(%arg0: i32) -> (i32, i32) {
    %c0_i32 = arith.constant 0 : i32
    %c0_i32_0 = arith.constant 0 : i32
    %c0_i32_1 = arith.constant 0 : i32
    return %c0_i32, %c0_i32_0 : i32, i32
  }
  func.func @transform_2(%arg0: i32) -> (i32, i32) {
    %c0_i32 = arith.constant 0 : i32
    %c0_i32_0 = arith.constant 0 : i32
    %c0_i32_1 = arith.constant 0 : i32
    return %c0_i32, %c0_i32_0 : i32, i32
  }
  func.func @transform_3(%arg0: i32) -> (i32, i32, i32) {
    %c0_i32 = arith.constant 0 : i32
    %c0_i32_0 = arith.constant 0 : i32
    %c0_i32_1 = arith.constant 0 : i32
    %c0_i32_2 = arith.constant 0 : i32
    return %c0_i32, %c0_i32_0, %c0_i32_1 : i32, i32, i32
  }
  func.func @transform_4(%arg0: i32) -> (i32, i32, i32) {
    %c0_i32 = arith.constant 0 : i32
    %c0_i32_0 = arith.constant 0 : i32
    %c0_i32_1 = arith.constant 0 : i32
    %c0_i32_2 = arith.constant 0 : i32
    return %c0_i32, %c0_i32_0, %c0_i32_1 : i32, i32, i32
  }
  func.func @transform_5(%arg0: i32) -> (i32, i32, i32) {
    %c0_i32 = arith.constant 0 : i32
    %c0_i32_0 = arith.constant 0 : i32
    %c0_i32_1 = arith.constant 0 : i32
    %c0_i32_2 = arith.constant 0 : i32
    return %c0_i32, %c0_i32_0, %c0_i32_1 : i32, i32, i32
  }
  func.func @transform_6(%arg0: i32) -> (i32, i32) {
    %c0_i32 = arith.constant 0 : i32
    %c0_i32_0 = arith.constant 0 : i32
    return %arg0, %c0_i32 : i32, i32
  }
}

</mosaic_0001>

<bundles_post_ra>
// kernel: semg_bert_forward.1
= control target key start
LH: loop header
LB: loop body
LE: loop exit
PB: predicated region body
PF: predicated region fallthrough
CT: control target
= control target key end

     0   :  { %s11548_s21 = smov 0   ;;  %s13591_s0 = inlined_call_operand.vmem [shape: f32[128,8], index: 0, kind: input, shape index: {}]   ;;  %s13592_s1 = inlined_call_operand.vmem [shape: f32[72,32], index: 1, kind: input, shape index: {}]   ;;  %s13593_s2 = inlined_call_operand.vmem [shape: bf16[8,32], index: 2, kind: input, shape index: {}]   ;;  %s13594_s3 = inlined_call_operand.vmem [shape: bf16[2,32,256], index: 3, kind: input, shape index: {}]   ;;  %s13595_s4 = inlined_call_operand.vmem [shape: bf16[2,128,32], index: 4, kind: input, shape index: {}]   ;;  %s13596_s5 = inlined_call_operand.vmem [shape: f32[2,8,128], index: 5, kind: input, shape index: {}]   ;;  %s13597_s6 = inlined_call_operand.vmem [shape: f32[128,32], index: 6, kind: output, shape index: {}]  }
   0x1 LB: > { %s9518_s22 = sadd.s32 4294967295, %s11499_s21   ;;  %p9522_p0 = scmp.ge.s32.totalorder %s11499_s21, 1  ;;  %s11499_s21 = sphi %s11548_s21, %s16_s21  }
   0x2   : > { %p213_p1 = scmp.lt.s32.totalorder %s11499_s21, 3 }
   0x4   : > { %p214_p2 = pnand %p9522_p0, %p213_p1 }
   0x5   : > { %s9523_s25 = sshll.u32 (!%p214_p2), %s9518_s22, 3  ;;  %s11501_s13 = smov (!%p214_p2), 96  }
   0x6   : > { %217 = sbr.rel (%p214_p2) target bundleno = 9205 (0x23f5), region = 44  ;;  %p244_p3 = scmp.lt.s32.totalorder (!%p214_p2), %s9523_s25, 15 }
   0x7   : > { %s11502_s14 = smov (!%p214_p2), 64   ;;  %s11503_s15 = smov (!%p214_p2), 88  }
   0x8   : > { %s11504_s16 = smov (!%p214_p2), 120   ;;  %s11505_s17 = smov (!%p214_p2), 56  }
   0x9   : > { %s11506_s18 = smov (!%p214_p2), 80   ;;  %s11507_s19 = smov (!%p214_p2), 112  }
   0xa   : > { %s11508_s20 = smov (!%p214_p2), 32   ;;  %s11509_s22 = smov (!%p214_p2), 48  }
   0xb   : > { %v255_v0 = vld [vmem:[%s13593_s2] sm:$0xf]  ;;  %s13601_s25 = smov (!%p244_p3, %s9523_s25), 15  ;;  %vm278_vm0 = vcmask 64512   ;;  %v419_v10 = vld [vmem:[%s13594_s3 + $0x18] sm:$0xff]  ;;  %v418_v12 = vld [vmem:[%s13594_s3 + $0x10] sm:$0xff]  ;;  %v461_v51 = vlaneseq }
   0xc   : > { %v256_v1 = vunpack.c.l.bf16 %v255_v0  ;;  %s9524_s26 = sshll.u32 %s13601_s25, 3  ;;  %v11578_v11 = vunpack.c.l.bf16 %v419_v10  ;;  %v11584_v13 = vunpack.c.l.bf16 %v418_v12  ;;  %v417_v14 = vld [vmem:[%s13594_s3 + $0x8] sm:$0xff]  ;;  %v416_v16 = vld [vmem:[%s13594_s3] sm:$0xff]  ;;  %v259_v23 = vld [vmem:[%s13592_s1 + $0x10] sm:$0xff]  ;;  %vm465_vm1 = vcmask 261120   ;;  %s11510_s23 = smov 72  }
   0xd   : > { %s247_s29 = scalar_lea.vmem %s13591_s0, %s9524_s26  ;;  %v11591_v15 = vunpack.c.l.bf16 %v417_v14  ;;  %v11598_v17 = vunpack.c.l.bf16 %v416_v16  ;;  %v9527_v18 = vld [vmem:[%s13592_s1] ss:$0 sm:$0xff]  ;;  %v258_v21 = vld [vmem:[%s13592_s1 + $0x8] sm:$0xff]  ;;  %v260_v29 = vld [vmem:[%s13592_s1 + $0x18] sm:$0xff]  ;;  %v11662_v52 = vshrl.u32 %v461_v51, 7  ;;  %vm951_vm2 = vcmask 130048  }
   0xe   : > { %10359 = vmatprep.subr.mxu1 %v256_v1  ;;  %v266_v2 = vld [vmem:[%s247_s29] sm:$0xff]  ;;  %v267_v3 = vld [vmem:[%s247_s29 + $0x8] sm:$0xff]  ;;  %v268_v4 = vld [vmem:[%s247_s29 + $0x10] sm:$0xff]  ;;  %s11511_s24 = smov 104   ;;  %s11512_s27 = smov 40  }
   0xf   : > { %10360 = vmatpush3.msra.mxu1 %v256_v1  ;;  %10361 = vmatprep.mubr.msk.f32.mxu1 %vm278_vm0, %v266_v2  ;;  %v269_v5 = vld [vmem:[%s247_s29 + $0x18] sm:$0xff]  ;;  %v270_v6 = vld [vmem:[%s247_s29 + $0x20] sm:$0xff]  ;;  %v271_v7 = vld [vmem:[%s247_s29 + $0x28] sm:$0xff]  ;;  %v463_v53 = vsub.s32 0, %v11662_v52 }
  0x10   : > { %10362 = vmatmul.mubr.msk.f32.vlgmr.msra.gmra.mxu1 %vm278_vm0, %v267_v3  ;;  %v272_v8 = vld [vmem:[%s247_s29 + $0x30] sm:$0xff]  ;;  %v273_v9 = vld [vmem:[%s247_s29 + $0x38] sm:$0xff]  ;;  %10373 = vmatprep.subr.mxu1 %v11578_v11  ;;  %v261_v31 = vld [vmem:[%s13592_s1 + $0x20] sm:$0xff] }
  0x11   : > { %10364 = vmatprep.mubr.msk.f32.mxu1 %vm278_vm0, %v268_v4  ;;  %10374 = vmatpush3.msra.mxu1 %v11578_v11  ;;  %v263_v35 = vld [vmem:[%s13592_s1 + $0x30] sm:$0xff]  ;;  %v262_v38 = vld [vmem:[%s13592_s1 + $0x28] sm:$0xff]  ;;  %v265_v44 = vld [vmem:[%s13592_s1 + $0x40] sm:$0xff] }
  0x12   : > { %10375 = vmatprep.subr.mxu1 %v11584_v13  ;;  %v264_v46 = vld [vmem:[%s13592_s1 + $0x38] sm:$0xff]  ;;  %v460_v54 = vld [vmem:[%s13596_s5] sm:$0xff] }
  0x13   : > { %10376 = vmatpush3.msra.mxu1 %v11584_v13  ;;  %v464_v55 = vrot.slane %v460_v54, %v463_v53 }
  0x14   : > { %10365 = vmatmul.mubr.msk.f32.gmra.mxu1 %vm278_vm0, %v269_v5  ;;  %10377 = vmatprep.subr.mxu1 %v11591_v15 }
  0x15   : > { %10367 = vmatprep.mubr.msk.f32.mxu1 %vm278_vm0, %v270_v6  ;;  %10378 = vmatpush3.msra.mxu1 %v11591_v15 }
  0x16   : > { %10379 = vmatprep.subr.mxu1 %v11598_v17 }
  0x17   : > { %10380 = vmatpush3.msra.mxu1 %v11598_v17 }
  0x18   : > { %10368 = vmatmul.mubr.msk.f32.gmra.mxu1 %vm278_vm0, %v271_v7 }
  0x19   : > { %10370 = vmatprep.mubr.msk.f32.mxu1 %vm278_vm0, %v272_v8 }
  0x1c   : > { %10371 = vmatmul.mubr.msk.f32.gmra.mxu1 %vm278_vm0, %v273_v9 }
  0xd0   : > { %v10363_v19 = vpop.f32.mrf.mxu1 }
  0xd1   : > { %v375_v20 = vadd.f32 %v10363_v19, %v9527_v18 }
  0xd2   : > { %v369_v22 = vpop.f32.mrf.mxu1 }
  0xd3   : > { %v370_v24 = vadd.f32 %v9527_v18, %v369_v22  ;;  %v11614_v27 = vadd.f32 %v375_v20, %v259_v23 }
  0xd4   : > { %v10366_v25 = vpop.f32.mrf.mxu1 }
  0xd5   : > { %v11612_v26 = vadd.f32 %v370_v24, %v258_v21  ;;  %v385_v28 = vadd.f32 %v10366_v25, %v9527_v18 }
  0xd6   : > { %v379_v30 = vpop.f32.mrf.mxu1 }
  0xd7   : > { %v380_v32 = vadd.f32 %v9527_v18, %v379_v30  ;;  %10381 = vmatprep.mubr.msk.f32.mxu1 %vm465_vm1, %v11612_v26  ;;  %v11631_v37 = vadd.f32 %v385_v28, %v261_v31 }
  0xd8   : > { %v10369_v33 = vpop.f32.mrf.mxu1  ;;  %10382 = vmatmul.mubr.msk.f32.vlgmr.msra.gmra.mxu1 %vm465_vm1, %v11614_v27 }
  0xd9   : > { %v11626_v34 = vadd.f32 %v380_v32, %v260_v29  ;;  %v395_v36 = vadd.f32 %v10369_v33, %v9527_v18 }
  0xda   : > { %v389_v39 = vpop.f32.mrf.mxu1 }
  0xdb   : > { %v390_v40 = vadd.f32 %v9527_v18, %v389_v39  ;;  %10384 = vmatprep.mubr.msk.f32.mxu1 %vm465_vm1, %v11626_v34  ;;  %v11638_v41 = vadd.f32 %v395_v36, %v263_v35 }
  0xdc   : > { %v10372_v42 = vpop.f32.mrf.mxu1  ;;  %10385 = vmatmul.mubr.msk.f32.gmra.mxu1 %vm465_vm1, %v11631_v37 }
  0xdd   : > { %v11642_v43 = vadd.f32 %v390_v40, %v262_v38  ;;  %v405_v45 = vadd.f32 %v10372_v42, %v9527_v18 }
  0xde   : > { %v399_v47 = vpop.f32.mrf.mxu1 }
  0xdf   : > { %v400_v48 = vadd.f32 %v9527_v18, %v399_v47  ;;  %10387 = vmatprep.mubr.msk.f32.mxu1 %vm465_vm1, %v11642_v43  ;;  %v11652_v49 = vadd.f32 %v405_v45, %v265_v44 }
  0xe0   : > { %10388 = vmatmul.mubr.msk.f32.gmra.mxu1 %vm465_vm1, %v11638_v41 }
  0xe1   : > { %v11656_v50 = vadd.f32 %v400_v48, %v264_v46 }
  0xe3   : > { %10390 = vmatprep.mubr.msk.f32.mxu1 %vm465_vm1, %v11656_v50 }
  0xe4   : > { %10391 = vmatmul.mubr.msk.f32.gmra.mxu1 %vm465_vm1, %v11652_v49 }
 0x198   : > { %v10383_v56 = vpop.f32.mrf.mxu1 }
 0x199   : > { %v11670_v57 = vadd.f32 %v10383_v56, %v464_v55 }
 0x19a   : > { %v556_v58 = vpop.f32.mrf.mxu1 }
 0x19b   : > { %v11672_v59 = vadd.f32 %v556_v58, %v464_v55  ;;  %599 = vrot.lane.b32.xlu0 %v11670_v57, %s11501_s13 }
 0x19c   : > { %v10386_v60 = vpop.f32.mrf.mxu1 }
 0x19d   : > { %v11676_v61 = vadd.f32 %v10386_v60, %v464_v55  ;;  %10397 = vmatprep.mubr.msk.f32.mxu0 %vm278_vm0, %v11672_v59 }
 0x19e   : > { %v566_v62 = vpop.f32.mrf.mxu1 }
 0x19f   : > { %v11680_v63 = vadd.f32 %v566_v62, %v464_v55  ;;  %688 = vrot.lane.b32.xlu1 %v11676_v61, %s11501_s13  ;;  %597 = vrot.lane.b32.xlu0 %v11672_v59, %s11501_s13 }
 0x1a0   : > { %v10389_v0 = vpop.f32.mrf.mxu1 }
 0x1a1   : > { %v11686_v1 = vadd.f32 %v10389_v0, %v464_v55  ;;  %10404 = vmatprep.mubr.msk.f32.mxu1 %vm278_vm0, %v11680_v63 }
 0x1a2   : > { %v576_v2 = vpop.f32.mrf.mxu1 }
 0x1a3   : > { %v11690_v3 = vadd.f32 %v576_v2, %v464_v55  ;;  %686 = vrot.lane.b32.xlu1 %v11680_v63, %s11501_s13  ;;  %777 = vrot.lane.b32.xlu0 %v11686_v1, %s11501_s13 }
 0x1a4   : > { %v10392_v4 = vpop.f32.mrf.mxu1 }
 0x1a5   : > { %v11696_v5 = vadd.f32 %v10392_v4, %v464_v55 }
 0x1a6   : > { %v586_v6 = vpop.f32.mrf.mxu1 }
 0x1a7   : > { %775 = vrot.lane.b32.xlu1 %v11690_v3, %s11501_s13  ;;  %866 = vrot.lane.b32.xlu0 %v11696_v5, %s11501_s13  ;;  %v11702_v7 = vadd.f32 %v586_v6, %v464_v55 }
 0x1ab   : > { %864 = vrot.lane.b32.xlu1 %v11702_v7, %s11501_s13 }
 0x1af   : > { %1042 = vrot.lane.b32.xlu1 %v11670_v57, %s11502_s14 }
 0x20d   : > { %v600_v8 = vpop.permute.xlu0 %599 }
 0x20e   : > { %10393 = vmatprep.subr.msk.mxu0 %vm278_vm0, %v600_v8 }
 0x20f   : > { %10394 = vmatpush3.xpose.msk.msra.mxu0 %vm278_vm0, %v600_v8 }
 0x211   : > { %v689_v9 = vpop.permute.xlu1 %688  ;;  %v598_v10 = vpop.permute.xlu0 %597 }
 0x212   : > { %10395 = vmatprep.subr.msk.mxu0 %vm278_vm0, %v598_v10  ;;  %10400 = vmatprep.subr.msk.mxu1 %vm278_vm0, %v689_v9 }
 0x213   : > { %10396 = vmatpush3.xpose.msk.msra.mxu0 %vm278_vm0, %v598_v10  ;;  %10401 = vmatpush3.xpose.msk.msra.mxu1 %vm278_vm0, %v689_v9 }
 0x215   : > { %v687_v12 = vpop.permute.xlu1 %686  ;;  %v778_v14 = vpop.permute.xlu0 %777 }
 0x216   : > { %10398 = vmatmul.mubr.msk.f32.vlgmr.msra.gmra.mxu0 %vm278_vm0, %v11670_v57  ;;  %10402 = vmatprep.subr.msk.mxu1 %vm278_vm0, %v687_v12 }
 0x217   : > { %10407 = vmatprep.subr.msk.mxu0 %vm278_vm0, %v778_v14  ;;  %10403 = vmatpush3.xpose.msk.msra.mxu1 %vm278_vm0, %v687_v12 }
 0x218   : > { %10408 = vmatpush3.xpose.msk.msra.mxu0 %vm278_vm0, %v778_v14  ;;  %10411 = vmatprep.mubr.msk.f32.mxu0 %vm278_vm0, %v11690_v3 }
 0x219   : > { %v776_v16 = vpop.permute.xlu1 %775  ;;  %v867_v18 = vpop.permute.xlu0 %866 }
 0x21a   : > { %10405 = vmatmul.mubr.msk.f32.vlgmr.msra.gmra.mxu1 %vm278_vm0, %v11676_v61  ;;  %10409 = vmatprep.subr.msk.mxu0 %vm278_vm0, %v776_v16 }
 0x21b   : > { %10414 = vmatprep.subr.msk.mxu1 %vm278_vm0, %v867_v18  ;;  %10418 = vmatprep.mubr.msk.f32.mxu1 %vm278_vm0, %v11702_v7 }
 0x21c   : > { %10410 = vmatpush3.xpose.msk.msra.mxu0 %vm278_vm0, %v776_v16  ;;  %10415 = vmatpush3.xpose.msk.msra.mxu1 %vm278_vm0, %v867_v18 }
 0x21d   : > { %v865_v19 = vpop.permute.xlu1 %864 }
 0x21e   : > { %10416 = vmatprep.subr.msk.mxu1 %vm278_vm0, %v865_v19 }
 0x21f   : > { %10412 = vmatmul.mubr.msk.f32.vlgmr.msra.gmra.mxu0 %vm278_vm0, %v11686_v1 }
 0x220   : > { %10417 = vmatpush3.xpose.msk.msra.mxu1 %vm278_vm0, %v865_v19 }
 0x221   : > { %v1043_v20 = vpop.permute.xlu1 %1042 }
 0x222   : > { %10421 = vmatprep.subr.mxu1 %v1043_v20 }
 0x223   : > { %10419 = vmatmul.mubr.msk.f32.vlgmr.msra.gmra.mxu1 %vm278_vm0, %v11696_v5 }
 0x224   : > { %10422 = vmatpush3.msra.mxu1 %v1043_v20 }
 0x2d6   : > { %v10399_v21 = vpop.f32.mrf.mxu0 }
 0x2d7   : > { %v955_v22 = vsel %vm951_vm2, %v10399_v21, -inf }
 0x2d8   : > { %956 = vmax.xlane.f32.xlu1 %v955_v22  ;;  %v675_v23 = vpop.f32.mrf.mxu0 }
 0x2d9   : > { %v952_v24 = vsel %vm951_vm2, %v675_v23, -inf }
 0x2da   : > { %v10406_v25 = vpop.f32.mrf.mxu1  ;;  %953 = vmax.xlane.f32.xlu0 %v952_v24 }
 0x2db   : > { %v961_v28 = vsel %vm951_vm2, %v10406_v25, -inf }
 0x2dc   : > { %v764_v29 = vpop.f32.mrf.mxu1  ;;  %962 = vmax.xlane.f32.xlu1 %v961_v28 }
 0x2dd   : > { %v958_v30 = vsel %vm951_vm2, %v764_v29, -inf }
 0x2de   : > { %959 = vmax.xlane.f32.xlu0 %v958_v30 }
 0x2df   : > { %v10413_v31 = vpop.f32.mrf.mxu0 }
 0x2e0   : > { %v967_v32 = vsel %vm951_vm2, %v10413_v31, -inf }
 0x2e1   : > { %v853_v33 = vpop.f32.mrf.mxu0 }
 0x2e2   : > { %968 = vmax.xlane.f32.xlu0 %v967_v32  ;;  %v964_v35 = vsel %vm951_vm2, %v853_v33, -inf }
 0x2e3   : > { %v10420_v36 = vpop.f32.mrf.mxu1 }
 0x2e4   : > { %v973_v38 = vsel %vm951_vm2, %v10420_v36, -inf }
 0x2e5   : > { %v11771_v39 = vpop.f32.mrf.mxu1 }
 0x2e6   : > { %965 = vmax.xlane.f32.xlu0 %v964_v35  ;;  %v970_v40 = vsel %vm951_vm2, %v11771_v39, -inf }
 0x2ea   : > { %974 = vmax.xlane.f32.xlu0 %v973_v38 }
 0x2ed   : > { %1129 = vrot.lane.b32.xlu1 %v11676_v61, %s11502_s14 }
 0x2f1   : > { %1216 = vrot.lane.b32.xlu1 %v11686_v1, %s11502_s14 }
 0x2f5   : > { %1214 = vrot.lane.b32.xlu1 %v11690_v3, %s11502_s14 }
 0x2f9   : > { %1394 = vrot.lane.b32.xlu1 %v11670_v57, %s11503_s15 }
 0x2fd   : > { %1392 = vrot.lane.b32.xlu1 %v11672_v59, %s11503_s15 }
 0x300   : > { %1040 = vrot.lane.b32.xlu0 %v11672_v59, %s11502_s14 }
 0x301   : > { %1388 = vrot.lane.b32.xlu1 %v11672_v59, %s11504_s16 }
 0x304   : > { %1127 = vrot.lane.b32.xlu0 %v11680_v63, %s11502_s14 }
 0x305   : > { %1483 = vrot.lane.b32.xlu1 %v11680_v63, %s11503_s15 }
 0x308   : > { %1303 = vrot.lane.b32.xlu0 %v11696_v5, %s11502_s14 }
 0x30c   : > { %1301 = vrot.lane.b32.xlu0 %v11702_v7, %s11502_s14 }
 0x310   : > { %1485 = vrot.lane.b32.xlu0 %v11676_v61, %s11503_s15 }
 0x314   : > { %1390 = vrot.lane.b32.xlu0 %v11670_v57, %s11504_s16 }
 0x318   : > { %1576 = vrot.lane.b32.xlu0 %v11686_v1, %s11503_s15 }
 0x329   : > { %971 = vmax.xlane.f32.xlu1 %v970_v40 }
 0x33a   : > { %1479 = vrot.lane.b32.xlu1 %v11680_v63, %s11504_s16 }
 0x361   : > { %v957_v42 = vpop.xlane.xlu1 %956 }
 0x362   : > { %v977_v44 = vsub.f32 %v10399_v21, %v957_v42 }
 0x363   : > { %v954_v45 = vpop.xlane.xlu0 %953 }
 0x364   : > { %v986_v46 = vmul.f32 1.442695, %v977_v44  ;;  %v976_v47 = vsub.f32 %v675_v23, %v954_v45 }
 0x365   : > { %v963_v48 = vpop.xlane.xlu1 %962 }
 0x366   : > { %11131 = vpow2.f32 %v986_v46  ;;  %v984_v51 = vmul.f32 1.442695, %v976_v47  ;;  %v979_v54 = vsub.f32 %v10406_v25, %v963_v48 }
 0x367   : > { %v960_v55 = vpop.xlane.xlu0 %959 }
 0x368   : > { %11133 = vpow2.f32 %v984_v51  ;;  %v990_v56 = vmul.f32 1.442695, %v979_v54  ;;  %v978_v58 = vsub.f32 %v764_v29, %v960_v55 }
 0x369   : > { %v1130_v60 = vpop.permute.xlu1 %1129 }
 0x36a   : > { %11135 = vpow2.f32 %v990_v56  ;;  %v988_v62 = vmul.f32 1.442695, %v978_v58  ;;  %10428 = vmatprep.subr.mxu0 %v1130_v60 }
 0x36b   : > { %10429 = vmatpush3.msra.mxu0 %v1130_v60  ;;  %v969_v0 = vpop.xlane.xlu0 %968 }
 0x36c   : > { %v981_v2 = vsub.f32 %v10413_v31, %v969_v0  ;;  %11137 = vpow2.f32 %v988_v62 }
 0x36d   : > { %v11787_v23 = vpop.permute.xlu1 %1216 }
 0x36e   : > { %v994_v4 = vmul.f32 1.442695, %v981_v2 }
 0x36f   : > { %v966_v6 = vpop.xlane.xlu0 %965 }
 0x370   : > { %11139 = vpow2.f32 %v994_v4  ;;  %v980_v8 = vsub.f32 %v853_v33, %v966_v6 }
 0x371   : > { %v1215_v40 = vpop.permute.xlu1 %1214 }
 0x372   : > { %v992_v9 = vmul.f32 1.442695, %v980_v8 }
 0x373   : > { %v11777_v10 = vpop.eup %11131  ;;  %v975_v12 = vpop.xlane.xlu0 %974 }
 0x374   : > { %11141 = vpow2.f32 %v992_v9  ;;  %v983_v14 = vsub.f32 %v10420_v36, %v975_v12  ;;  %v1003_v16 = vsel %vm951_vm2, %v11777_v10, 0.0 }
 0x375   : > { %v11781_v18 = vpop.eup %11133  ;;  %1004 = vadd.xlane.f32.xlu0 %v1003_v16  ;;  %v1395_v42 = vpop.permute.xlu1 %1394 }
 0x376   : > { %v998_v19 = vmul.f32 1.442695, %v983_v14  ;;  %v1000_v20 = vsel %vm951_vm2, %v11781_v18, 0.0 }
 0x377   : > { %v11785_v21 = vpop.eup %11135  ;;  %1001 = vadd.xlane.f32.xlu1 %v1000_v20  ;;  %v1041_v22 = vpop.permute.xlu0 %1040 }
 0x378   : > { %11143 = vpow2.f32 %v998_v19  ;;  %10423 = vmatprep.subr.mxu1 %v1041_v22  ;;  %v1009_v24 = vsel %vm951_vm2, %v11785_v21, 0.0 }
 0x379   : > { %10424 = vmatpush3.msra.mxu1 %v1041_v22  ;;  %v11792_v25 = vpop.eup %11137  ;;  %v1393_v44 = vpop.permute.xlu1 %1392 }
 0x37a   : > { %10435 = vmatprep.subr.mxu1 %v11787_v23  ;;  %v1006_v30 = vsel %vm951_vm2, %v11792_v25, 0.0 }
 0x37b   : > { %1010 = vadd.xlane.f32.xlu1 %v1009_v24  ;;  %v1128_v28 = vpop.permute.xlu0 %1127 }
 0x37c   : > { %10430 = vmatprep.subr.mxu0 %v1128_v28 }
 0x37d   : > { %v11794_v29 = vpop.eup %11139  ;;  %10431 = vmatpush3.msra.mxu0 %v1128_v28  ;;  %v1389_v45 = vpop.permute.xlu1 %1388 }
 0x37e   : > { %v1015_v31 = vsel %vm951_vm2, %v11794_v29, 0.0 }
 0x37f   : > { %1007 = vadd.xlane.f32.xlu1 %v1006_v30  ;;  %1016 = vadd.xlane.f32.xlu0 %v1015_v31  ;;  %v11800_v32 = vpop.permute.xlu0 %1303 }
 0x380   : > { %10442 = vmatprep.subr.mxu0 %v11800_v32 }
 0x381   : > { %v11142_v33 = vpop.eup %11141  ;;  %v11818_v46 = vpop.permute.xlu1 %1483 }
 0x382   : > { %v1012_v35 = vsel %vm951_vm2, %v11142_v33, 0.0 }
 0x383   : > { %1013 = vadd.xlane.f32.xlu0 %v1012_v35  ;;  %v1302_v56 = vpop.permute.xlu0 %1301 }
 0x385   : > { %v11804_v36 = vpop.eup %11143 }
 0x386   : > { %v1021_v38 = vsel %vm951_vm2, %v11804_v36, 0.0 }
 0x387   : > { %1022 = vadd.xlane.f32.xlu0 %v1021_v38  ;;  %v11831_v58 = vpop.permute.xlu0 %1485 }
 0x390   : > { %1574 = vrot.lane.b32.xlu1 %v11690_v3, %s11503_s15 }
 0x39d   : > { %1481 = vrot.lane.b32.xlu0 %v11676_v61, %s11504_s16 }
 0x3a1   : > { %1667 = vrot.lane.b32.xlu0 %v11696_v5, %s11503_s15 }
 0x3a5   : > { %1572 = vrot.lane.b32.xlu0 %v11686_v1, %s11504_s16 }
 0x3a9   : > { %1661 = vrot.lane.b32.xlu0 %v11702_v7, %s11504_s16 }
 0x3b2   : > { %v972_v47 = vpop.xlane.xlu1 %971 }
 0x3b3   : > { %v982_v48 = vsub.f32 %v11771_v39, %v972_v47  ;;  %v1391_v39 = vpop.permute.xlu0 %1390 }
 0x3b5   : > { %v996_v51 = vmul.f32 1.442695, %v982_v48 }
 0x3b6   : > { %v11833_v62 = vpop.permute.xlu1 %1479 }
 0x3b7   : > { %11145 = vpow2.f32 %v996_v51  ;;  %v1577_v60 = vpop.permute.xlu0 %1576 }
 0x3c4   : > { %v11821_v54 = vpop.eup %11145 }
 0x3c5   : > { %v1018_v55 = vsel %vm951_vm2, %v11821_v54, 0.0 }
 0x3c6   : > { %1019 = vadd.xlane.f32.xlu1 %v1018_v55 }
 0x3d7   : > { %1570 = vrot.lane.b32.xlu1 %v11690_v3, %s11504_s16 }
 0x3db   : > { %1665 = vrot.lane.b32.xlu1 %v11702_v7, %s11503_s15 }
 0x3df   : > { %1663 = vrot.lane.b32.xlu1 %v11696_v5, %s11504_s16 }
 0x3fe   : > { %v1005_v0 = vpop.xlane.xlu0 %1004 }
 0x3ff   : > { %11147 = vrcp.f32 %v1005_v0 }
 0x400   : > { %v1002_v2 = vpop.xlane.xlu1 %1001 }
 0x401   : > { %11149 = vrcp.f32 %v1002_v2 }
 0x404   : > { %v1011_v4 = vpop.xlane.xlu1 %1010 }
 0x405   : > { %11151 = vrcp.f32 %v1011_v4 }
 0x408   : > { %v1008_v6 = vpop.xlane.xlu1 %1007  ;;  %v1017_v8 = vpop.xlane.xlu0 %1016 }
 0x409   : > { %11153 = vrcp.f32 %v1008_v6 }
 0x40a   : > { %11155 = vrcp.f32 %v1017_v8 }
 0x40c   : > { %v1014_v9 = vpop.xlane.xlu0 %1013  ;;  %v11148_v12 = vpop.eup %11147 }
 0x40d   : > { %11157 = vrcp.f32 %v1014_v9  ;;  %v1033_v19 = vmul.f32 %v11148_v12, %v11777_v10 }
 0x40e   : > { %v11150_v14 = vpop.eup %11149 }
 0x40f   : > { %v1032_v16 = vmul.f32 %v11150_v14, %v11781_v18 }
 0x411   : > { %10425 = vmatprep.mubr.msk.f32.mxu1 %vm951_vm2, %v1032_v16 }
 0x412   : > { %10426 = vmatmul.mubr.msk.f32.vlgmr.msra.gmra.mxu1 %vm951_vm2, %v1033_v19  ;;  %v11152_v20 = vpop.eup %11151 }
 0x413   : > { %10436 = vmatpush3.msra.mxu1 %v11787_v23  ;;  %v1035_v28 = vmul.f32 %v11152_v20, %v11785_v21  ;;  %v1575_v21 = vpop.permute.xlu1 %1574 }
 0x414   : > { %10437 = vmatprep.subr.mxu1 %v1215_v40 }
 0x415   : > { %10438 = vmatpush3.msra.mxu1 %v1215_v40 }
 0x416   : > { %v11154_v22 = vpop.eup %11153  ;;  %10449 = vmatprep.subr.msk.mxu1 %vm278_vm0, %v1395_v42 }
 0x417   : > { %v1034_v24 = vmul.f32 %v11154_v22, %v11792_v25  ;;  %v11156_v30 = vpop.eup %11155  ;;  %v1023_v25 = vpop.xlane.xlu0 %1022 }
 0x418   : > { %v1037_v23 = vmul.f32 %v11156_v30, %v11794_v29  ;;  %11159 = vrcp.f32 %v1023_v25 }
 0x419   : > { %10432 = vmatprep.mubr.msk.f32.mxu0 %vm951_vm2, %v1034_v24 }
 0x41a   : > { %v11158_v10 = vpop.eup %11157  ;;  %10433 = vmatmul.mubr.msk.f32.vlgmr.msra.gmra.mxu0 %vm951_vm2, %v1035_v28 }
 0x41b   : > { %10443 = vmatpush3.msra.mxu0 %v11800_v32  ;;  %v1036_v18 = vmul.f32 %v11158_v10, %v11142_v33  ;;  %v1482_v29 = vpop.permute.xlu0 %1481 }
 0x41c   : > { %10444 = vmatprep.subr.mxu0 %v1302_v56 }
 0x41d   : > { %10445 = vmatpush3.msra.mxu0 %v1302_v56  ;;  %10439 = vmatprep.mubr.msk.f32.mxu1 %vm951_vm2, %v1036_v18 }
 0x41e   : > { %10456 = vmatprep.subr.msk.mxu0 %vm278_vm0, %v11831_v58  ;;  %10440 = vmatmul.mubr.msk.f32.vlgmr.msra.gmra.mxu1 %vm951_vm2, %v1037_v23 }
 0x41f   : > { %10450 = vmatpush3.xpose.msk.msra.mxu1 %vm278_vm0, %v1395_v42  ;;  %10453 = vmatprep.mubr.msk.f32.mxu1 %vm278_vm0, %v1389_v45  ;;  %v1668_v31 = vpop.permute.xlu0 %1667 }
 0x420   : > { %10451 = vmatprep.subr.msk.mxu1 %vm278_vm0, %v1393_v44 }
 0x423   : > { %10452 = vmatpush3.xpose.msk.msra.mxu1 %vm278_vm0, %v1393_v44  ;;  %v1573_v35 = vpop.permute.xlu0 %1572 }
 0x424   : > { %10463 = vmatprep.subr.msk.mxu1 %vm278_vm0, %v1577_v60 }
 0x425   : > { %v11160_v38 = vpop.eup %11159 }
 0x426   : > { %10454 = vmatmul.mubr.msk.f32.vlgmr.msra.gmra.mxu1 %vm278_vm0, %v1391_v39  ;;  %v1039_v44 = vmul.f32 %v11160_v38, %v11804_v36 }
 0x427   : > { %10464 = vmatpush3.xpose.msk.msra.mxu1 %vm278_vm0, %v1577_v60  ;;  %v1662_v45 = vpop.permute.xlu0 %1661 }
 0x428   : > { %10465 = vmatprep.subr.msk.mxu1 %vm278_vm0, %v1575_v21 }
 0x42b   : > { %10466 = vmatpush3.xpose.msk.msra.mxu1 %vm278_vm0, %v1575_v21 }
 0x44f   : > { %v1020_v32 = vpop.xlane.xlu1 %1019 }
 0x450   : > { %11161 = vrcp.f32 %v1020_v32 }
 0x453   : > { %v1571_v33 = vpop.permute.xlu1 %1570 }
 0x454   : > { %10467 = vmatprep.mubr.msk.f32.mxu1 %vm278_vm0, %v1571_v33 }
 0x455   : > { %10468 = vmatmul.mubr.msk.f32.vlgmr.msra.gmra.mxu1 %vm278_vm0, %v1573_v35 }
 0x457   : > { %v1666_v36 = vpop.permute.xlu1 %1665 }
 0x45b   : > { %v1664_v47 = vpop.permute.xlu1 %1663 }
 0x45d   : > { %v11162_v40 = vpop.eup %11161 }
 0x45e   : > { %v1038_v42 = vmul.f32 %v11162_v40, %v11821_v54 }
 0x460   : > { %10446 = vmatprep.mubr.msk.f32.mxu0 %vm951_vm2, %v1038_v42 }
 0x461   : > { %10447 = vmatmul.mubr.msk.f32.vlgmr.msra.gmra.mxu0 %vm951_vm2, %v1039_v44 }
 0x462   : > { %10457 = vmatpush3.xpose.msk.msra.mxu0 %vm278_vm0, %v11831_v58  ;;  %10460 = vmatprep.mubr.msk.f32.mxu0 %vm278_vm0, %v11833_v62 }
 0x463   : > { %10458 = vmatprep.subr.msk.mxu0 %vm278_vm0, %v11818_v46 }
 0x466   : > { %10459 = vmatpush3.xpose.msk.msra.mxu0 %vm278_vm0, %v11818_v46 }
 0x467   : > { %10470 = vmatprep.subr.msk.mxu0 %vm278_vm0, %v1668_v31 }
 0x469   : > { %10461 = vmatmul.mubr.msk.f32.vlgmr.msra.gmra.mxu0 %vm278_vm0, %v1482_v29 }
 0x46a   : > { %10471 = vmatpush3.xpose.msk.msra.mxu0 %vm278_vm0, %v1668_v31  ;;  %10474 = vmatprep.mubr.msk.f32.mxu0 %vm278_vm0, %v1662_v45 }
 0x46b   : > { %10472 = vmatprep.subr.msk.mxu0 %vm278_vm0, %v1666_v36 }
 0x46e   : > { %10473 = vmatpush3.xpose.msk.msra.mxu0 %vm278_vm0, %v1666_v36 }
 0x471   : > { %10475 = vmatmul.mubr.msk.f32.vlgmr.msra.gmra.mxu0 %vm278_vm0, %v1664_v47 }
 0x4d2   : > { %v11881_v48 = vpop.f32.mrf.mxu1 }
 0x4d4   : > { %v11883_v46 = vpop.f32.mrf.mxu1 }
 0x4da   : > { %v11892_v2 = vpop.f32.mrf.mxu0 }
 0x4dc   : > { %v11894_v4 = vpop.f32.mrf.mxu0 }
 0x4de   : > { %v11885_v51 = vpop.f32.mrf.mxu1 }
 0x4e0   : > { %v11887_v54 = vpop.f32.mrf.mxu1 }
 0x4e6   : > { %v10455_v55 = vpop.f32.mrf.mxu1 }
 0x4e7   : > { %v1755_v56 = vsel %vm951_vm2, %v10455_v55, -inf }
 0x4e8   : > { %1756 = vmax.xlane.f32.xlu1 %v1755_v56  ;;  %v1470_v58 = vpop.f32.mrf.mxu1 }
 0x4e9   : > { %v1752_v39 = vsel %vm951_vm2, %v1470_v58, -inf }
 0x4ea   : > { %1753 = vmax.xlane.f32.xlu0 %v1752_v39 }
 0x515   : > { %v10469_v60 = vpop.f32.mrf.mxu1 }
 0x516   : > { %v1767_v22 = vsel %vm951_vm2, %v10469_v60, -inf }
 0x517   : > { %v1652_v62 = vpop.f32.mrf.mxu1 }
 0x518   : > { %v1764_v0 = vsel %vm951_vm2, %v1652_v62, -inf }
 0x519   : > { %1765 = vmax.xlane.f32.xlu1 %v1764_v0 }
 0x521   : > { %v11896_v6 = vpop.f32.mrf.mxu0 }
 0x523   : > { %v11898_v8 = vpop.f32.mrf.mxu0 }
 0x529   : > { %v10462_v9 = vpop.f32.mrf.mxu0 }
 0x52a   : > { %v1761_v16 = vsel %vm951_vm2, %v10462_v9, -inf }
 0x52b   : > { %v1561_v12 = vpop.f32.mrf.mxu0 }
 0x52c   : > { %v1758_v14 = vsel %vm951_vm2, %v1561_v12, -inf }
 0x52d   : > { %1759 = vmax.xlane.f32.xlu0 %v1758_v14 }
 0x531   : > { %1762 = vmax.xlane.f32.xlu0 %v1761_v16  ;;  %v10476_v19 = vpop.f32.mrf.mxu0 }
 0x532   : > { %v1773_v28 = vsel %vm951_vm2, %v10476_v19, -inf }
 0x533   : > { %v1743_v20 = vpop.f32.mrf.mxu0 }
 0x534   : > { %v1770_v24 = vsel %vm951_vm2, %v1743_v20, -inf }
 0x535   : > { %1768 = vmax.xlane.f32.xlu0 %v1767_v22  ;;  %1771 = vmax.xlane.f32.xlu1 %v1770_v24 }
 0x539   : > { %1774 = vmax.xlane.f32.xlu0 %v1773_v28 }
 0x546   : > { %1842 = vrot.lane.b32.xlu1 %v11670_v57, %s11505_s17 }
 0x54a   : > { %1929 = vrot.lane.b32.xlu1 %v11676_v61, %s11505_s17 }
 0x54e   : > { %1927 = vrot.lane.b32.xlu1 %v11680_v63, %s11505_s17 }
 0x54f   : > { %1840 = vrot.lane.b32.xlu0 %v11672_v59, %s11505_s17 }
 0x552   : > { %2014 = vrot.lane.b32.xlu1 %v11690_v3, %s11505_s17 }
 0x553   : > { %2016 = vrot.lane.b32.xlu0 %v11686_v1, %s11505_s17 }
 0x571   : > { %v1757_v30 = vpop.xlane.xlu1 %1756 }
 0x572   : > { %v1777_v10 = vsub.f32 %v10455_v55, %v1757_v30 }
 0x573   : > { %v1754_v18 = vpop.xlane.xlu0 %1753 }
 0x574   : > { %v1786_v23 = vmul.f32 1.442695, %v1777_v10  ;;  %v1776_v21 = vsub.f32 %v1470_v58, %v1754_v18 }
 0x576   : > { %11163 = vpow2.f32 %v1786_v23  ;;  %v1784_v25 = vmul.f32 1.442695, %v1776_v21 }
 0x578   : > { %11165 = vpow2.f32 %v1784_v25 }
 0x583   : > { %v11917_v29 = vpop.eup %11163 }
 0x584   : > { %v1803_v31 = vsel %vm951_vm2, %v11917_v29, 0.0 }
 0x585   : > { %v11921_v32 = vpop.eup %11165  ;;  %1804 = vadd.xlane.f32.xlu0 %v1803_v31 }
 0x586   : > { %v1800_v33 = vsel %vm951_vm2, %v11921_v32, 0.0 }
 0x587   : > { %1801 = vadd.xlane.f32.xlu1 %v1800_v33 }
 0x5a2   : > { %v1766_v35 = vpop.xlane.xlu1 %1765 }
 0x5a3   : > { %v1780_v38 = vsub.f32 %v1652_v62, %v1766_v35 }
 0x5a5   : > { %v1792_v44 = vmul.f32 1.442695, %v1780_v38 }
 0x5b6   : > { %v1760_v40 = vpop.xlane.xlu0 %1759 }
 0x5b7   : > { %v1778_v42 = vsub.f32 %v1561_v12, %v1760_v40 }
 0x5b9   : > { %v1788_v45 = vmul.f32 1.442695, %v1778_v42  ;;  %v11121_v42 = vpack.i.bf16 %v11598_v17, %v11591_v15 }
 0x5ba   : > { %v1763_v36 = vpop.xlane.xlu0 %1762 }
 0x5bb   : > { %11167 = vpow2.f32 %v1788_v45  ;;  %v1779_v47 = vsub.f32 %v10462_v9, %v1763_v36 }
 0x5bc   : > { %11169 = vpow2.f32 %v1792_v44 }
 0x5bd   : > { %v1790_v55 = vmul.f32 1.442695, %v1779_v47 }
 0x5be   : > { %v1772_v56 = vpop.xlane.xlu1 %1771  ;;  %v1769_v58 = vpop.xlane.xlu0 %1768 }
 0x5bf   : > { %11171 = vpow2.f32 %v1790_v55  ;;  %v1782_v39 = vsub.f32 %v1743_v20, %v1772_v56  ;;  %v1781_v0 = vsub.f32 %v10469_v60, %v1769_v58 }
 0x5c1   : > { %v1796_v14 = vmul.f32 1.442695, %v1782_v39  ;;  %v1794_v16 = vmul.f32 1.442695, %v1781_v0 }
 0x5c2   : > { %v1843_v22 = vpop.permute.xlu1 %1842  ;;  %v1775_v24 = vpop.xlane.xlu0 %1774 }
 0x5c3   : > { %11173 = vpow2.f32 %v1796_v14  ;;  %v1783_v62 = vsub.f32 %v10476_v19, %v1775_v24  ;;  %10477 = vmatprep.subr.mxu1 %v1843_v22 }
 0x5c4   : > { %11175 = vpow2.f32 %v1794_v16  ;;  %10478 = vmatpush3.msra.mxu1 %v1843_v22 }
 0x5c5   : > { %v1798_v12 = vmul.f32 1.442695, %v1783_v62 }
 0x5c6   : > { %v1930_v28 = vpop.permute.xlu1 %1929  ;;  %v1841_v30 = vpop.permute.xlu0 %1840 }
 0x5c7   : > { %11177 = vpow2.f32 %v1798_v12  ;;  %10479 = vmatprep.subr.mxu1 %v1841_v30  ;;  %10484 = vmatprep.subr.mxu0 %v1930_v28 }
 0x5c8   : > { %v11925_v9 = vpop.eup %11167  ;;  %10480 = vmatpush3.msra.mxu1 %v1841_v30  ;;  %10485 = vmatpush3.msra.mxu0 %v1930_v28 }
 0x5c9   : > { %v1806_v60 = vsel %vm951_vm2, %v11925_v9, 0.0  ;;  %v11929_v20 = vpop.eup %11169 }
 0x5ca   : > { %v1928_v10 = vpop.permute.xlu1 %1927  ;;  %1807 = vadd.xlane.f32.xlu1 %v1806_v60  ;;  %v2017_v19 = vpop.permute.xlu0 %2016  ;;  %v1812_v23 = vsel %vm951_vm2, %v11929_v20, 0.0 }
 0x5cb   : > { %10486 = vmatprep.subr.mxu0 %v1928_v10  ;;  %10491 = vmatprep.subr.mxu1 %v2017_v19 }
 0x5cc   : > { %v11931_v18 = vpop.eup %11171  ;;  %10487 = vmatpush3.msra.mxu0 %v1928_v10 }
 0x5cd   : > { %v1809_v21 = vsel %vm951_vm2, %v11931_v18, 0.0 }
 0x5ce   : > { %1813 = vadd.xlane.f32.xlu1 %v1812_v23  ;;  %1810 = vadd.xlane.f32.xlu0 %v1809_v21  ;;  %v2015_v15 = vpop.permute.xlu1 %2014 }
 0x5d0   : > { %v11937_v25 = vpop.eup %11173 }
 0x5d1   : > { %v11939_v31 = vpop.eup %11175  ;;  %v1818_v33 = vsel %vm951_vm2, %v11937_v25, 0.0 }
 0x5d2   : > { %1819 = vadd.xlane.f32.xlu1 %v1818_v33  ;;  %v1815_v35 = vsel %vm951_vm2, %v11939_v31, 0.0 }
 0x5d3   : > { %1816 = vadd.xlane.f32.xlu0 %v1815_v35 }
 0x5d4   : > { %v11945_v38 = vpop.eup %11177 }
 0x5d5   : > { %v1821_v40 = vsel %vm951_vm2, %v11945_v38, 0.0 }
 0x5d7   : > { %1822 = vadd.xlane.f32.xlu0 %v1821_v40 }
 0x5e3   : > { %2101 = vrot.lane.b32.xlu1 %v11702_v7, %s11505_s17 }
 0x5e7   : > { %2460 = vrot.lane.b32.xlu1 %v11670_v57, %s11506_s18 }
 0x5eb   : > { %2551 = vrot.lane.b32.xlu1 %v11676_v61, %s11506_s18 }
 0x5ed   : > { %2103 = vrot.lane.b32.xlu0 %v11696_v5, %s11505_s17 }
 0x5ef   : > { %2456 = vrot.lane.b32.xlu1 %v11670_v57, %s11507_s19 }
 0x5f1   : > { %11122 = vrot.lane.b32.xlu0 %v11121_v42, %s11508_s20 }
 0x5f3   : > { %2642 = vrot.lane.b32.xlu1 %v11686_v1, %s11506_s18 }
 0x5f5   : > { %2458 = vrot.lane.b32.xlu0 %v11672_v59, %s11506_s18 }
 0x5f7   : > { %2547 = vrot.lane.b32.xlu1 %v11676_v61, %s11507_s19 }
 0x5f9   : > { %2454 = vrot.lane.b32.xlu0 %v11672_v59, %s11507_s19 }
 0x5fb   : > { %2733 = vrot.lane.b32.xlu1 %v11696_v5, %s11506_s18 }
 0x5fd   : > { %2549 = vrot.lane.b32.xlu0 %v11680_v63, %s11506_s18 }
 0x5ff   : > { %2638 = vrot.lane.b32.xlu1 %v11686_v1, %s11507_s19 }
 0x601   : > { %2545 = vrot.lane.b32.xlu0 %v11680_v63, %s11507_s19 }
 0x603   : > { %2727 = vrot.lane.b32.xlu1 %v11702_v7, %s11507_s19 }
 0x605   : > { %2640 = vrot.lane.b32.xlu0 %v11690_v3, %s11506_s18 }
 0x609   : > { %2636 = vrot.lane.b32.xlu0 %v11690_v3, %s11507_s19 }
 0x60d   : > { %2731 = vrot.lane.b32.xlu0 %v11702_v7, %s11506_s18 }
 0x60e   : > { %v1805_v17 = vpop.xlane.xlu0 %1804 }
 0x60f   : > { %11179 = vrcp.f32 %v1805_v17 }
 0x610   : > { %v1802_v44 = vpop.xlane.xlu1 %1801 }
 0x611   : > { %11181 = vrcp.f32 %v1802_v44  ;;  %2729 = vrot.lane.b32.xlu0 %v11696_v5, %s11507_s19 }
 0x61c   : > { %v11180_v45 = vpop.eup %11179 }
 0x61d   : > { %v1833_v55 = vmul.f32 %v11180_v45, %v11917_v29 }
 0x61e   : > { %v11182_v36 = vpop.eup %11181 }
 0x61f   : > { %v1832_v47 = vmul.f32 %v11182_v36, %v11921_v32 }
 0x621   : > { %10481 = vmatprep.mubr.msk.f32.mxu1 %vm951_vm2, %v1832_v47 }
 0x622   : > { %10482 = vmatmul.mubr.msk.f32.vlgmr.msra.gmra.mxu1 %vm951_vm2, %v1833_v55 }
 0x623   : > { %10492 = vmatpush3.msra.mxu1 %v2017_v19 }
 0x624   : > { %10493 = vmatprep.subr.mxu1 %v2015_v15 }
 0x625   : > { %10494 = vmatpush3.msra.mxu1 %v2015_v15 }
 0x653   : > { %v1808_v56 = vpop.xlane.xlu1 %1807 }
 0x654   : > { %11183 = vrcp.f32 %v1808_v56 }
 0x657   : > { %v1814_v58 = vpop.xlane.xlu1 %1813  ;;  %v1811_v39 = vpop.xlane.xlu0 %1810 }
 0x658   : > { %11185 = vrcp.f32 %v1814_v58 }
 0x659   : > { %11187 = vrcp.f32 %v1811_v39 }
 0x65b   : > { %v1820_v0 = vpop.xlane.xlu1 %1819 }
 0x65c   : > { %11189 = vrcp.f32 %v1820_v0  ;;  %v1817_v14 = vpop.xlane.xlu0 %1816 }
 0x65d   : > { %11191 = vrcp.f32 %v1817_v14 }
 0x65f   : > { %v2102_v32 = vpop.permute.xlu1 %2101 }
 0x660   : > { %v1823_v16 = vpop.xlane.xlu0 %1822 }
 0x661   : > { %v11184_v29 = vpop.eup %11183  ;;  %11193 = vrcp.f32 %v1823_v16 }
 0x662   : > { %v1834_v22 = vmul.f32 %v11184_v29, %v11925_v9 }
 0x663   : > { %v11993_v24 = vpop.permute.xlu1 %2460 }
 0x664   : > { %v2104_v62 = vpop.permute.xlu0 %2103  ;;  %10488 = vmatprep.mubr.msk.f32.mxu0 %vm951_vm2, %v1834_v22 }
 0x665   : > { %v11186_v12 = vpop.eup %11185  ;;  %10498 = vmatprep.subr.mxu0 %v2104_v62 }
 0x666   : > { %v11188_v28 = vpop.eup %11187  ;;  %v1836_v30 = vmul.f32 %v11186_v12, %v11929_v20 }
 0x667   : > { %v2552_v60 = vpop.permute.xlu1 %2551  ;;  %v1835_v10 = vmul.f32 %v11188_v28, %v11931_v18 }
 0x668   : > { %v11123_v19 = vpop.permute.xlu0 %11122  ;;  %10495 = vmatprep.mubr.msk.f32.mxu1 %vm951_vm2, %v1836_v30 }
 0x669   : > { %v11190_v23 = vpop.eup %11189  ;;  %v11125_v21 = vunpack.i.h.bf16 %v11123_v19  ;;  %v11124_v33 = vunpack.i.l.bf16 %v11123_v19  ;;  %10489 = vmatmul.mubr.msk.f32.vlgmr.msra.gmra.mxu0 %vm951_vm2, %v1835_v10 }
 0x66a   : > { %v11192_v9 = vpop.eup %11191  ;;  %10499 = vmatpush3.msra.mxu0 %v2104_v62  ;;  %v1838_v35 = vmul.f32 %v11190_v23, %v11937_v25 }
 0x66b   : > { %10500 = vmatprep.subr.mxu0 %v2102_v32  ;;  %v12001_v40 = vpop.permute.xlu1 %2456  ;;  %10505 = vmatprep.subr.mxu1 %v11124_v33  ;;  %v1837_v20 = vmul.f32 %v11192_v9, %v11939_v31 }
 0x66c   : > { %10501 = vmatpush3.msra.mxu0 %v2102_v32  ;;  %v2459_v18 = vpop.permute.xlu0 %2458  ;;  %10502 = vmatprep.mubr.msk.f32.mxu0 %vm951_vm2, %v1838_v35 }
 0x66d   : > { %10496 = vmatmul.mubr.msk.f32.vlgmr.msra.gmra.mxu1 %vm951_vm2, %v1837_v20  ;;  %10519 = vmatprep.subr.mxu0 %v11125_v21 }
 0x66e   : > { %v11194_v42 = vpop.eup %11193  ;;  %10506 = vmatpush3.msra.mxu1 %v11124_v33 }
 0x66f   : > { %10533 = vmatprep.subr.msk.mxu1 %vm278_vm0, %v11993_v24  ;;  %v2643_v15 = vpop.permute.xlu1 %2642  ;;  %v1839_v25 = vmul.f32 %v11194_v42, %v11945_v38 }
 0x670   : > { %v2455_v17 = vpop.permute.xlu0 %2454 }
 0x671   : > { %10503 = vmatmul.mubr.msk.f32.vlgmr.msra.gmra.mxu0 %vm951_vm2, %v1839_v25 }
 0x672   : > { %10520 = vmatpush3.msra.mxu0 %v11125_v21  ;;  %10521 = vmatprep.mubr.msk.f32.mxu0 %vm278_vm0, %v11883_v46 }
 0x673   : > { %10540 = vmatprep.subr.msk.mxu0 %vm278_vm0, %v2552_v60  ;;  %v2548_v31 = vpop.permute.xlu1 %2547 }
 0x674   : > { %v2550_v44 = vpop.permute.xlu0 %2549 }
 0x675   : > { %10522 = vmatmul.mubr.msk.f32.vlgmr.msra.gmra.mxu0 %vm278_vm0, %v11881_v48 }
 0x676   : > { %10541 = vmatpush3.xpose.msk.msra.mxu0 %vm278_vm0, %v2552_v60  ;;  %10524 = vmatprep.mubr.msk.f32.mxu0 %vm278_vm0, %v11894_v4 }
 0x677   : > { %10542 = vmatprep.subr.msk.mxu0 %vm278_vm0, %v2550_v44  ;;  %v2734_v38 = vpop.permute.xlu1 %2733 }
 0x678   : > { %v2546_v45 = vpop.permute.xlu0 %2545 }
 0x679   : > { %10525 = vmatmul.mubr.msk.f32.gmra.mxu0 %vm278_vm0, %v11892_v2 }
 0x67a   : > { %10543 = vmatpush3.xpose.msk.msra.mxu0 %vm278_vm0, %v2550_v44  ;;  %10527 = vmatprep.mubr.msk.f32.mxu0 %vm278_vm0, %v11887_v54 }
 0x67b   : > { %10554 = vmatprep.subr.msk.mxu0 %vm278_vm0, %v2734_v38  ;;  %v2639_v46 = vpop.permute.xlu1 %2638 }
 0x67c   : > { %v2641_v48 = vpop.permute.xlu0 %2640 }
 0x67d   : > { %10528 = vmatmul.mubr.msk.f32.gmra.mxu0 %vm278_vm0, %v11885_v51 }
 0x67e   : > { %10530 = vmatprep.mubr.msk.f32.mxu0 %vm278_vm0, %v11898_v8 }
 0x67f   : > { %v2728_v36 = vpop.permute.xlu1 %2727 }
 0x680   : > { %v2637_v4 = vpop.permute.xlu0 %2636 }
 0x681   : > { %10531 = vmatmul.mubr.msk.f32.gmra.mxu0 %vm278_vm0, %v11896_v6 }
 0x682   : > { %10544 = vmatprep.mubr.msk.f32.mxu0 %vm278_vm0, %v2546_v45 }
 0x684   : > { %v2732_v2 = vpop.permute.xlu0 %2731 }
 0x685   : > { %10545 = vmatmul.mubr.msk.f32.vlgmr.msra.gmra.mxu0 %vm278_vm0, %v2548_v31 }
 0x686   : > { %10555 = vmatpush3.xpose.msk.msra.mxu0 %vm278_vm0, %v2734_v38  ;;  %10558 = vmatprep.mubr.msk.f32.mxu0 %vm278_vm0, %v2728_v36 }
 0x687   : > { %10556 = vmatprep.subr.msk.mxu0 %vm278_vm0, %v2732_v2 }
 0x688   : > { %v2730_v51 = vpop.permute.xlu0 %2729 }
 0x68a   : > { %10557 = vmatpush3.xpose.msk.msra.mxu0 %vm278_vm0, %v2732_v2 }
 0x68d   : > { %10559 = vmatmul.mubr.msk.f32.vlgmr.msra.gmra.mxu0 %vm278_vm0, %v2730_v51 }
 0x6e2   : > { %v10483_v54 = vpop.f32.mrf.mxu1 }
 0x6e4   : > { %v1918_v8 = vpop.f32.mrf.mxu1 }
 0x6e5   : > { %10507 = vmatprep.mubr.msk.f32.mxu1 %vm278_vm0, %v1918_v8 }
 0x6e6   : > { %10508 = vmatmul.mubr.msk.f32.vlgmr.msra.gmra.mxu1 %vm278_vm0, %v10483_v54 }
 0x6e7   : > { %10534 = vmatpush3.xpose.msk.msra.mxu1 %vm278_vm0, %v11993_v24 }
 0x6e8   : > { %10535 = vmatprep.subr.msk.mxu1 %vm278_vm0, %v2459_v18 }
 0x6eb   : > { %10536 = vmatpush3.xpose.msk.msra.mxu1 %vm278_vm0, %v2459_v18 }
 0x6ec   : > { %10547 = vmatprep.subr.msk.mxu1 %vm278_vm0, %v2643_v15 }
 0x729   : > { %v10490_v6 = vpop.f32.mrf.mxu0 }
 0x72b   : > { %v2005_v47 = vpop.f32.mrf.mxu0 }
 0x72c   : > { %10510 = vmatprep.mubr.msk.f32.mxu1 %vm278_vm0, %v2005_v47 }
 0x72d   : > { %v10497_v55 = vpop.f32.mrf.mxu1  ;;  %10511 = vmatmul.mubr.msk.f32.gmra.mxu1 %vm278_vm0, %v10490_v6 }
 0x72f   : > { %v2092_v56 = vpop.f32.mrf.mxu1 }
 0x730   : > { %10513 = vmatprep.mubr.msk.f32.mxu1 %vm278_vm0, %v2092_v56 }
 0x731   : > { %v10504_v58 = vpop.f32.mrf.mxu0  ;;  %10514 = vmatmul.mubr.msk.f32.gmra.mxu1 %vm278_vm0, %v10497_v55 }
 0x733   : > { %v2179_v39 = vpop.f32.mrf.mxu0 }
 0x734   : > { %10516 = vmatprep.mubr.msk.f32.mxu1 %vm278_vm0, %v2179_v39 }
 0x735   : > { %10517 = vmatmul.mubr.msk.f32.gmra.mxu1 %vm278_vm0, %v10504_v58  ;;  %v12059_v0 = vpop.f32.mrf.mxu0 }
 0x736   : > { %10537 = vmatprep.mubr.msk.f32.mxu1 %vm278_vm0, %v2455_v17 }
 0x737   : > { %v12061_v14 = vpop.f32.mrf.mxu0 }
 0x739   : > { %10538 = vmatmul.mubr.msk.f32.vlgmr.msra.gmra.mxu1 %vm278_vm0, %v12001_v40  ;;  %v12063_v32 = vpop.f32.mrf.mxu0 }
 0x73a   : > { %10548 = vmatpush3.xpose.msk.msra.mxu1 %vm278_vm0, %v2643_v15  ;;  %10551 = vmatprep.mubr.msk.f32.mxu1 %vm278_vm0, %v2637_v4 }
 0x73b   : > { %10549 = vmatprep.subr.msk.mxu1 %vm278_vm0, %v2641_v48  ;;  %v12065_v16 = vpop.f32.mrf.mxu0 }
 0x73d   : > { %v12067_v29 = vpop.f32.mrf.mxu0 }
 0x73e   : > { %10550 = vmatpush3.xpose.msk.msra.mxu1 %vm278_vm0, %v2641_v48 }
 0x73f   : > { %v12071_v24 = vpop.f32.mrf.mxu0 }
 0x741   : > { %10552 = vmatmul.mubr.msk.f32.vlgmr.msra.gmra.mxu1 %vm278_vm0, %v2639_v46  ;;  %v12075_v12 = vpop.f32.mrf.mxu0 }
 0x743   : > { %v12081_v60 = vpop.f32.mrf.mxu0 }
 0x745   : > { %v10546_v23 = vpop.f32.mrf.mxu0 }
 0x746   : > { %v2827_v17 = vsel %vm951_vm2, %v10546_v23, -inf }
 0x747   : > { %v2627_v9 = vpop.f32.mrf.mxu0 }
 0x748   : > { %v2824_v15 = vsel %vm951_vm2, %v2627_v9, -inf }
 0x74d   : > { %v10560_v20 = vpop.f32.mrf.mxu0 }
 0x74e   : > { %v2839_v45 = vsel %vm951_vm2, %v10560_v20, -inf }
 0x74f   : > { %v2809_v25 = vpop.f32.mrf.mxu0 }
 0x750   : > { %v2836_v44 = vsel %vm951_vm2, %v2809_v25, -inf }
 0x7a6   : > { %v12069_v22 = vpop.f32.mrf.mxu1 }
 0x7a8   : > { %v12073_v62 = vpop.f32.mrf.mxu1 }
 0x7ed   : > { %v12077_v28 = vpop.f32.mrf.mxu1 }
 0x7ef   : > { %v12079_v30 = vpop.f32.mrf.mxu1 }
 0x7f1   : > { %v12083_v10 = vpop.f32.mrf.mxu1 }
 0x7f3   : > { %v12085_v19 = vpop.f32.mrf.mxu1 }
 0x7f5   : > { %v12087_v21 = vpop.f32.mrf.mxu1 }
 0x7f7   : > { %v12089_v33 = vpop.f32.mrf.mxu1 }
 0x7f9   : > { %v10539_v35 = vpop.f32.mrf.mxu1 }
 0x7fa   : > { %v2821_v40 = vsel %vm951_vm2, %v10539_v35, -inf }
 0x7fb   : > { %2822 = vmax.xlane.f32.xlu0 %v2821_v40  ;;  %v12092_v18 = vpop.f32.mrf.mxu1 }
 0x7fc   : > { %v2818_v42 = vsel %vm951_vm2, %v12092_v18, -inf }
 0x7fd   : > { %2819 = vmax.xlane.f32.xlu1 %v2818_v42 }
 0x7ff   : > { %2825 = vmax.xlane.f32.xlu0 %v2824_v15 }
 0x801   : > { %v10553_v31 = vpop.f32.mrf.mxu1  ;;  %2828 = vmax.xlane.f32.xlu1 %v2827_v17 }
 0x802   : > { %v2833_v38 = vsel %vm951_vm2, %v10553_v31, -inf }
 0x803   : > { %2837 = vmax.xlane.f32.xlu0 %v2836_v44 }
 0x805   : > { %2834 = vmax.xlane.f32.xlu1 %v2833_v38 }
 0x809   : > { %2840 = vmax.xlane.f32.xlu1 %v2839_v45 }
 0x884   : > { %v2823_v48 = vpop.xlane.xlu0 %2822 }
 0x885   : > { %v2843_v38 = vsub.f32 %v10539_v35, %v2823_v48 }
 0x886   : > { %v2820_v46 = vpop.xlane.xlu1 %2819 }
 0x887   : > { %v2852_v45 = vmul.f32 1.442695, %v2843_v38 }
 0x888   : > { %v2826_v4 = vpop.xlane.xlu0 %2825 }
 0x889   : > { %v2844_v2 = vsub.f32 %v2627_v9, %v2826_v4 }
 0x88a   : > { %v2829_v36 = vpop.xlane.xlu1 %2828 }
 0x88b   : > { %v2854_v51 = vmul.f32 1.442695, %v2844_v2  ;;  %v2845_v54 = vsub.f32 %v10546_v23, %v2829_v36  ;;  %v2718_v2 = vpop.f32.mrf.mxu1 }
 0x88c   : > { %v2838_v8 = vpop.xlane.xlu0 %2837 }
 0x88d   : > { %11195 = vpow2.f32 %v2854_v51  ;;  %v2856_v6 = vmul.f32 1.442695, %v2845_v54  ;;  %v2848_v47 = vsub.f32 %v2809_v25, %v2838_v8  ;;  %v2830_v51 = vsel %vm951_vm2, %v2718_v2, -inf }
 0x88e   : > { %v2835_v55 = vpop.xlane.xlu1 %2834 }
 0x88f   : > { %11197 = vpow2.f32 %v2856_v6  ;;  %v2862_v56 = vmul.f32 1.442695, %v2848_v47  ;;  %v2847_v4 = vsub.f32 %v10553_v31, %v2835_v55  ;;  %v2842_v31 = vsub.f32 %v12092_v18, %v2820_v46 }
 0x891   : > { %11199 = vpow2.f32 %v2862_v56  ;;  %v2860_v36 = vmul.f32 1.442695, %v2847_v4  ;;  %v2850_v48 = vmul.f32 1.442695, %v2842_v31 }
 0x892   : > { %v2841_v58 = vpop.xlane.xlu1 %2840 }
 0x893   : > { %v2849_v39 = vsub.f32 %v10560_v20, %v2841_v58 }
 0x895   : > { %v2864_v40 = vmul.f32 1.442695, %v2849_v39 }
 0x897   : > { %11201 = vpow2.f32 %v2864_v40 }
 0x898   : > { %11203 = vpow2.f32 %v2852_v45 }
 0x899   : > { %11205 = vpow2.f32 %v2860_v36 }
 0x89a   : > { %v12101_v42 = vpop.eup %11195  ;;  %11207 = vpow2.f32 %v2850_v48 }
 0x89b   : > { %v2872_v9 = vsel %vm951_vm2, %v12101_v42, 0.0 }
 0x89c   : > { %v12105_v15 = vpop.eup %11197  ;;  %2873 = vadd.xlane.f32.xlu0 %v2872_v9 }
 0x89d   : > { %v2875_v23 = vsel %vm951_vm2, %v12105_v15, 0.0 }
 0x89e   : > { %v12109_v25 = vpop.eup %11199  ;;  %2876 = vadd.xlane.f32.xlu1 %v2875_v23 }
 0x89f   : > { %v2884_v17 = vsel %vm951_vm2, %v12109_v25, 0.0 }
 0x8a0   : > { %2885 = vadd.xlane.f32.xlu0 %v2884_v17 }
 0x8a4   : > { %v12113_v20 = vpop.eup %11201 }
 0x8a5   : > { %v2887_v44 = vsel %vm951_vm2, %v12113_v20, 0.0  ;;  %v12126_v54 = vpop.eup %11203 }
 0x8a6   : > { %2888 = vadd.xlane.f32.xlu1 %v2887_v44  ;;  %v2869_v8 = vsel %vm951_vm2, %v12126_v54, 0.0  ;;  %v12130_v6 = vpop.eup %11205 }
 0x8a7   : > { %v2881_v35 = vsel %vm951_vm2, %v12130_v6, 0.0  ;;  %v12145_v47 = vpop.eup %11207 }
 0x8a8   : > { %v2866_v18 = vsel %vm951_vm2, %v12145_v47, 0.0 }
 0x8b6   : > { %2908 = vrot.lane.b32.xlu0 %v11670_v57, %s11509_s22 }
 0x8b7   : > { %2906 = vrot.lane.b32.xlu1 %v11672_v59, %s11509_s22 }
 0x8bb   : > { %2995 = vrot.lane.b32.xlu1 %v11676_v61, %s11509_s22 }
 0x8bf   : > { %3082 = vrot.lane.b32.xlu1 %v11686_v1, %s11509_s22 }
 0x8d5   : > { %2831 = vmax.xlane.f32.xlu0 %v2830_v51 }
 0x8e3   : > { %2870 = vadd.xlane.f32.xlu1 %v2869_v8 }
 0x8e7   : > { %2882 = vadd.xlane.f32.xlu1 %v2881_v35 }
 0x8eb   : > { %2993 = vrot.lane.b32.xlu0 %v11680_v63, %s11509_s22 }
 0x8f8   : > { %3169 = vrot.lane.b32.xlu1 %v11696_v5, %s11509_s22 }
 0x8fc   : > { %3401 = vrot.lane.b32.xlu1 %v11670_v57, %s11510_s23 }
 0x900   : > { %3399 = vrot.lane.b32.xlu1 %v11672_v59, %s11510_s23 }
 0x904   : > { %3397 = vrot.lane.b32.xlu1 %v11670_v57, %s11511_s24 }
 0x908   : > { %3490 = vrot.lane.b32.xlu1 %v11680_v63, %s11510_s23 }
 0x90a   : > { %2867 = vadd.xlane.f32.xlu0 %v2866_v18 }
 0x90c   : > { %3486 = vrot.lane.b32.xlu1 %v11680_v63, %s11511_s24 }
 0x910   : > { %3581 = vrot.lane.b32.xlu1 %v11690_v3, %s11510_s23 }
 0x914   : > { %3577 = vrot.lane.b32.xlu1 %v11690_v3, %s11511_s24 }
 0x918   : > { %3672 = vrot.lane.b32.xlu1 %v11702_v7, %s11510_s23 }
 0x91c   : > { %3670 = vrot.lane.b32.xlu1 %v11696_v5, %s11511_s24 }
 0x920   : > { %3080 = vrot.lane.b32.xlu0 %v11690_v3, %s11509_s22 }
 0x925   : > { %v2874_v46 = vpop.xlane.xlu0 %2873 }
 0x926   : > { %11209 = vrcp.f32 %v2874_v46 }
 0x927   : > { %v2877_v56 = vpop.xlane.xlu1 %2876 }
 0x928   : > { %11211 = vrcp.f32 %v2877_v56 }
 0x929   : > { %v2886_v55 = vpop.xlane.xlu0 %2885 }
 0x92a   : > { %11213 = vrcp.f32 %v2886_v55 }
 0x92d   : > { %v2909_v58 = vpop.permute.xlu0 %2908 }
 0x92e   : > { %10561 = vmatprep.subr.mxu1 %v2909_v58 }
 0x92f   : > { %10562 = vmatpush3.msra.mxu1 %v2909_v58  ;;  %v2889_v39 = vpop.xlane.xlu1 %2888 }
 0x933   : > { %v11210_v40 = vpop.eup %11209  ;;  %v2907_v9 = vpop.permute.xlu1 %2906 }
 0x934   : > { %10563 = vmatprep.subr.mxu1 %v2907_v9  ;;  %v2900_v23 = vmul.f32 %v11210_v40, %v12101_v42 }
 0x935   : > { %10564 = vmatpush3.msra.mxu1 %v2907_v9  ;;  %v11212_v4 = vpop.eup %11211 }
 0x936   : > { %10572 = vmatprep.mubr.msk.f32.mxu0 %vm951_vm2, %v2900_v23  ;;  %v2901_v42 = vmul.f32 %v11212_v4, %v12105_v15 }
 0x937   : > { %v2996_v17 = vpop.permute.xlu1 %2995  ;;  %v11214_v36 = vpop.eup %11213 }
 0x938   : > { %10568 = vmatprep.subr.mxu0 %v2996_v17  ;;  %v2904_v35 = vmul.f32 %v11214_v36, %v12109_v25 }
 0x939   : > { %10569 = vmatpush3.msra.mxu0 %v2996_v17 }
 0x93b   : > { %v3083_v44 = vpop.permute.xlu1 %3082 }
 0x93c   : > { %10575 = vmatprep.subr.mxu1 %v3083_v44 }
 0x95e   : > { %v2832_v38 = vpop.xlane.xlu0 %2831 }
 0x95f   : > { %v2846_v45 = vsub.f32 %v2718_v2, %v2832_v38 }
 0x961   : > { %v2858_v51 = vmul.f32 1.442695, %v2846_v45 }
 0x962   : > { %v2994_v8 = vpop.permute.xlu0 %2993 }
 0x963   : > { %11215 = vpow2.f32 %v2858_v51  ;;  %10570 = vmatprep.subr.mxu0 %v2994_v8 }
 0x964   : > { %10571 = vmatpush3.msra.mxu0 %v2994_v8 }
 0x965   : > { %10573 = vmatmul.mubr.msk.f32.vlgmr.msra.gmra.mxu0 %vm951_vm2, %v2901_v42 }
 0x966   : > { %10586 = vmatprep.mubr.msk.f32.mxu0 %vm951_vm2, %v2904_v35 }
 0x96c   : > { %v2871_v31 = vpop.xlane.xlu1 %2870 }
 0x96d   : > { %11217 = vrcp.f32 %v2871_v31 }
 0x970   : > { %v11216_v48 = vpop.eup %11215  ;;  %v2883_v18 = vpop.xlane.xlu1 %2882 }
 0x971   : > { %v2878_v2 = vsel %vm951_vm2, %v11216_v48, 0.0 }
 0x972   : > { %2879 = vadd.xlane.f32.xlu0 %v2878_v2 }
 0x974   : > { %v3170_v46 = vpop.permute.xlu1 %3169 }
 0x975   : > { %10582 = vmatprep.subr.mxu0 %v3170_v46 }
 0x976   : > { %10583 = vmatpush3.msra.mxu0 %v3170_v46 }
 0x978   : > { %v3402_v40 = vpop.permute.xlu1 %3401 }
 0x97a   : > { %v11218_v25 = vpop.eup %11217 }
 0x97b   : > { %v2899_v56 = vmul.f32 %v11218_v25, %v12126_v54 }
 0x97c   : > { %v3400_v9 = vpop.permute.xlu1 %3399 }
 0x988   : > { %3167 = vrot.lane.b32.xlu0 %v11702_v7, %s11509_s22 }
 0x98c   : > { %3255 = vrot.lane.b32.xlu0 %v11584_v13, %s11508_s20 }
 0x990   : > { %3395 = vrot.lane.b32.xlu0 %v11672_v59, %s11511_s24 }
 0x993   : > { %v2868_v15 = vpop.xlane.xlu0 %2867 }
 0x994   : > { %11219 = vrcp.f32 %v2868_v15  ;;  %3492 = vrot.lane.b32.xlu0 %v11676_v61, %s11510_s23 }
 0x995   : > { %11221 = vrcp.f32 %v2889_v39 }
 0x996   : > { %11223 = vrcp.f32 %v2883_v18 }
 0x997   : > { %v3081_v58 = vpop.permute.xlu0 %3080 }
 0x998   : > { %3583 = vrot.lane.b32.xlu0 %v11686_v1, %s11510_s23 }
 0x99c   : > { %3488 = vrot.lane.b32.xlu0 %v11676_v61, %s11511_s24 }
 0x9a0   : > { %3674 = vrot.lane.b32.xlu0 %v11696_v5, %s11510_s23 }
 0x9a1   : > { %v11220_v13 = vpop.eup %11219 }
 0x9a2   : > { %v2898_v55 = vmul.f32 %v11220_v13, %v12145_v47  ;;  %v3398_v47 = vpop.permute.xlu1 %3397  ;;  %v11222_v23 = vpop.eup %11221 }
 0x9a3   : > { %v2905_v38 = vmul.f32 %v11222_v23, %v12113_v20  ;;  %v11224_v36 = vpop.eup %11223 }
 0x9a4   : > { %3579 = vrot.lane.b32.xlu0 %v11686_v1, %s11511_s24  ;;  %10565 = vmatprep.mubr.msk.f32.mxu1 %vm951_vm2, %v2898_v55  ;;  %v2903_v42 = vmul.f32 %v11224_v36, %v12130_v6 }
 0x9a5   : > { %10566 = vmatmul.mubr.msk.f32.vlgmr.msra.gmra.mxu1 %vm951_vm2, %v2899_v56 }
 0x9a6   : > { %10576 = vmatpush3.msra.mxu1 %v3083_v44  ;;  %v3491_v45 = vpop.permute.xlu1 %3490 }
 0x9a7   : > { %10577 = vmatprep.subr.mxu1 %v3081_v58 }
 0x9a8   : > { %10578 = vmatpush3.msra.mxu1 %v3081_v58  ;;  %3668 = vrot.lane.b32.xlu0 %v11702_v7, %s11511_s24 }
 0x9aa   : > { %v3487_v39 = vpop.permute.xlu1 %3486 }
 0x9ae   : > { %v3582_v35 = vpop.permute.xlu1 %3581 }
 0x9fb   : > { %v2880_v54 = vpop.xlane.xlu0 %2879 }
 0x9fc   : > { %11225 = vrcp.f32 %v2880_v54 }
 0x9ff   : > { %v3168_v17 = vpop.permute.xlu0 %3167 }
 0xa00   : > { %10584 = vmatprep.subr.mxu0 %v3168_v17 }
 0xa01   : > { %10585 = vmatpush3.msra.mxu0 %v3168_v17 }
 0xa02   : > { %10587 = vmatmul.mubr.msk.f32.vlgmr.msra.gmra.mxu0 %vm951_vm2, %v2905_v38  ;;  %10603 = vmatprep.subr.msk.mxu0 %vm278_vm0, %v3402_v40 }
 0xa03   : > { %10604 = vmatpush3.xpose.msk.msra.mxu0 %vm278_vm0, %v3402_v40  ;;  %v3256_v44 = vpop.permute.xlu0 %3255 }
 0xa04   : > { %10605 = vmatprep.subr.msk.mxu0 %vm278_vm0, %v3400_v9  ;;  %10589 = vmatprep.subr.mxu1 %v3256_v44 }
 0xa07   : > { %10606 = vmatpush3.xpose.msk.msra.mxu0 %vm278_vm0, %v3400_v9  ;;  %v3396_v4 = vpop.permute.xlu0 %3395 }
 0xa08   : > { %10607 = vmatprep.mubr.msk.f32.mxu0 %vm278_vm0, %v3396_v4 }
 0xa09   : > { %v11226_v20 = vpop.eup %11225 }
 0xa0a   : > { %10608 = vmatmul.mubr.msk.f32.vlgmr.msra.gmra.mxu0 %vm278_vm0, %v3398_v47  ;;  %v2902_v51 = vmul.f32 %v11226_v20, %v11216_v48  ;;  %v3578_v48 = vpop.permute.xlu1 %3577  ;;  %v2421_v20 = vadd.f32 %v12059_v0, %v12069_v22  ;;  %v2441_v22 = vadd.f32 %v12067_v29, %v12083_v10  ;;  %v2446_v29 = vadd.f32 %v12081_v60, %v12089_v33 }
 0xa0b   : > { %10614 = vmatprep.mubr.msk.f32.mxu0 %vm278_vm0, %v3487_v39  ;;  %v3493_v8 = vpop.permute.xlu0 %3492 }
 0xa0c   : > { %10579 = vmatprep.mubr.msk.f32.mxu1 %vm951_vm2, %v2902_v51  ;;  %10610 = vmatprep.subr.msk.mxu0 %vm278_vm0, %v3493_v8 }
 0xa0d   : > { %10580 = vmatmul.mubr.msk.f32.vlgmr.msra.gmra.mxu1 %vm951_vm2, %v2903_v42  ;;  %10611 = vmatpush3.xpose.msk.msra.mxu0 %vm278_vm0, %v3493_v8 }
 0xa0e   : > { %10612 = vmatprep.subr.msk.mxu0 %vm278_vm0, %v3491_v45  ;;  %10590 = vmatpush3.msra.mxu1 %v3256_v44  ;;  %v3673_v2 = vpop.permute.xlu1 %3672 }
 0xa0f   : > { %v3584_v31 = vpop.permute.xlu0 %3583 }
 0xa10   : > { %10617 = vmatprep.subr.msk.mxu1 %vm278_vm0, %v3584_v31 }
 0xa11   : > { %10613 = vmatpush3.xpose.msk.msra.mxu0 %vm278_vm0, %v3491_v45 }
 0xa12   : > { %v3671_v25 = vpop.permute.xlu1 %3670 }
 0xa13   : > { %v3489_v18 = vpop.permute.xlu0 %3488 }
 0xa14   : > { %10615 = vmatmul.mubr.msk.f32.vlgmr.msra.gmra.mxu0 %vm278_vm0, %v3489_v18 }
 0xa17   : > { %v3675_v6 = vpop.permute.xlu0 %3674 }
 0xa18   : > { %10624 = vmatprep.subr.msk.mxu0 %vm278_vm0, %v3675_v6 }
 0xa19   : > { %10625 = vmatpush3.xpose.msk.msra.mxu0 %vm278_vm0, %v3675_v6 }
 0xa1a   : > { %10626 = vmatprep.subr.msk.mxu0 %vm278_vm0, %v3673_v2 }
 0xa1b   : > { %v3580_v46 = vpop.permute.xlu0 %3579 }
 0xa1d   : > { %10627 = vmatpush3.xpose.msk.msra.mxu0 %vm278_vm0, %v3673_v2 }
 0xa1f   : > { %v3669_v15 = vpop.permute.xlu0 %3668 }
 0xa20   : > { %10628 = vmatprep.mubr.msk.f32.mxu0 %vm278_vm0, %v3669_v15 }
 0xa21   : > { %10629 = vmatmul.mubr.msk.f32.vlgmr.msra.gmra.mxu0 %vm278_vm0, %v3671_v25 }
 0xa25   : > { %v10574_v13 = vpop.f32.mrf.mxu0 }
 0xa27   : > { %v3071_v58 = vpop.f32.mrf.mxu0 }
 0xa65   : > { %v10567_v55 = vpop.f32.mrf.mxu1 }
 0xa67   : > { %v2984_v56 = vpop.f32.mrf.mxu1 }
 0xa68   : > { %10591 = vmatprep.mubr.msk.f32.mxu1 %vm278_vm0, %v2984_v56 }
 0xa69   : > { %10592 = vmatmul.mubr.msk.f32.vlgmr.msra.gmra.mxu1 %vm278_vm0, %v10567_v55 }
 0xa6a   : > { %10618 = vmatpush3.xpose.msk.msra.mxu1 %vm278_vm0, %v3584_v31  ;;  %10594 = vmatprep.mubr.msk.f32.mxu1 %vm278_vm0, %v3071_v58 }
 0xa6b   : > { %10619 = vmatprep.subr.msk.mxu1 %vm278_vm0, %v3582_v35 }
 0xa6d   : > { %10595 = vmatmul.mubr.msk.f32.gmra.mxu1 %vm278_vm0, %v10574_v13 }
 0xa6e   : > { %10620 = vmatpush3.xpose.msk.msra.mxu1 %vm278_vm0, %v3582_v35  ;;  %v2431_v35 = vadd.f32 %v12063_v32, %v12077_v28  ;;  %v2436_v32 = vadd.f32 %v12071_v24, %v12085_v19 }
 0xac2   : > { %v10588_v40 = vpop.f32.mrf.mxu0 }
 0xac4   : > { %v3245_v9 = vpop.f32.mrf.mxu0 }
 0xaca   : > { %v10609_v47 = vpop.f32.mrf.mxu0 }
 0xacb   : > { %v3762_v54 = vsel %vm951_vm2, %v10609_v47, -inf }
 0xacc   : > { %3763 = vmax.xlane.f32.xlu1 %v3762_v54  ;;  %v3477_v23 = vpop.f32.mrf.mxu0  ;;  %v2451_v54 = vadd.f32 %v12075_v12, %v12087_v21 }
 0xacd   : > { %v10581_v17 = vpop.f32.mrf.mxu1  ;;  %v3759_v38 = vsel %vm951_vm2, %v3477_v23, -inf }
 0xace   : > { %3760 = vmax.xlane.f32.xlu0 %v3759_v38 }
 0xacf   : > { %v3158_v45 = vpop.f32.mrf.mxu1 }
 0xad0   : > { %10597 = vmatprep.mubr.msk.f32.mxu1 %vm278_vm0, %v3158_v45 }
 0xad1   : > { %10598 = vmatmul.mubr.msk.f32.gmra.mxu1 %vm278_vm0, %v10581_v17 }
 0xad2   : > { %10600 = vmatprep.mubr.msk.f32.mxu1 %vm278_vm0, %v3245_v9 }
 0xad4   : > { %v10616_v44 = vpop.f32.mrf.mxu0 }
 0xad5   : > { %10601 = vmatmul.mubr.msk.f32.gmra.mxu1 %vm278_vm0, %v10588_v40  ;;  %v3768_v36 = vsel %vm951_vm2, %v10616_v44, -inf }
 0xad6   : > { %v3568_v39 = vpop.f32.mrf.mxu0  ;;  %10621 = vmatprep.mubr.msk.f32.mxu1 %vm278_vm0, %v3578_v48 }
 0xad7   : > { %v3765_v4 = vsel %vm951_vm2, %v3568_v39, -inf }
 0xad8   : > { %3766 = vmax.xlane.f32.xlu0 %v3765_v4 }
 0xad9   : > { %10622 = vmatmul.mubr.msk.f32.vlgmr.msra.gmra.mxu1 %vm278_vm0, %v3580_v46 }
 0xadc   : > { %3769 = vmax.xlane.f32.xlu0 %v3768_v36 }
 0xae1   : > { %v10630_v45 = vpop.f32.mrf.mxu0 }
 0xae2   : > { %v3780_v36 = vsel %vm951_vm2, %v10630_v45, -inf }
 0xae3   : > { %v3750_v4 = vpop.f32.mrf.mxu0 }
 0xae4   : > { %v3777_v33 = vsel %vm951_vm2, %v3750_v4, -inf }
 0xb29   : > { %v10593_v51 = vpop.f32.mrf.mxu1 }
 0xb2a   : > { %v12235_v8 = vadd.f32 %v10593_v51, %v2421_v20 }
 0xb2b   : > { %v12237_v42 = vpop.f32.mrf.mxu1 }
 0xb2d   : > { %v10596_v31 = vpop.f32.mrf.mxu1 }
 0xb2e   : > { %v12241_v48 = vadd.f32 %v10596_v31, %v2431_v35 }
 0xb2f   : > { %v12243_v0 = vpop.f32.mrf.mxu1 }
 0xb55   : > { %v3764_v2 = vpop.xlane.xlu1 %3763 }
 0xb56   : > { %v3784_v46 = vsub.f32 %v10609_v47, %v3764_v2 }
 0xb57   : > { %v3761_v18 = vpop.xlane.xlu0 %3760 }
 0xb58   : > { %v3783_v25 = vsub.f32 %v3477_v23, %v3761_v18  ;;  %v3793_v13 = vmul.f32 1.442695, %v3784_v46 }
 0xb5a   : > { %v3791_v56 = vmul.f32 1.442695, %v3783_v25  ;;  %11227 = vpow2.f32 %v3793_v13 }
 0xb5c   : > { %11229 = vpow2.f32 %v3791_v56 }
 0xb61   : > { %v3767_v6 = vpop.xlane.xlu0 %3766 }
 0xb62   : > { %v3785_v58 = vsub.f32 %v3568_v39, %v3767_v6 }
 0xb64   : > { %v3795_v23 = vmul.f32 1.442695, %v3785_v58 }
 0xb65   : > { %v3770_v15 = vpop.xlane.xlu0 %3769 }
 0xb66   : > { %v3786_v55 = vsub.f32 %v10616_v44, %v3770_v15 }
 0xb67   : > { %v12264_v60 = vpop.eup %11227 }
 0xb68   : > { %v3797_v28 = vmul.f32 1.442695, %v3786_v55  ;;  %v3810_v51 = vsel %vm951_vm2, %v12264_v60, 0.0 }
 0xb69   : > { %v11230_v20 = vpop.eup %11229 }
 0xb6a   : > { %11231 = vpow2.f32 %v3797_v28  ;;  %v3807_v31 = vsel %vm951_vm2, %v11230_v20, 0.0 }
 0xb6b   : > { %11233 = vpow2.f32 %v3795_v23 }
 0xb77   : > { %v12269_v35 = vpop.eup %11231 }
 0xb78   : > { %v12272_v18 = vpop.eup %11233  ;;  %v3816_v6 = vsel %vm951_vm2, %v12269_v35, 0.0 }
 0xb79   : > { %v3813_v2 = vsel %vm951_vm2, %v12272_v18, 0.0 }
 0xb91   : > { %v10599_v40 = vpop.f32.mrf.mxu1 }
 0xb92   : > { %v12249_v9 = vadd.f32 %v10599_v40, %v2441_v22 }
 0xb93   : > { %v3368_v47 = vpop.f32.mrf.mxu1 }
 0xb94   : > { %v12253_v17 = vadd.f32 %v3368_v47, %v2436_v32 }
 0xb95   : > { %v10602_v38 = vpop.f32.mrf.mxu1 }
 0xb96   : > { %v12257_v10 = vadd.f32 %v10602_v38, %v2451_v54 }
 0xb97   : > { %v3378_v24 = vpop.f32.mrf.mxu1 }
 0xb98   : > { %v12259_v19 = vadd.f32 %v3378_v24, %v2446_v29 }
 0xb99   : > { %v10623_v44 = vpop.f32.mrf.mxu1 }
 0xb9a   : > { %v3774_v39 = vsel %vm951_vm2, %v10623_v44, -inf }
 0xb9b   : > { %3775 = vmax.xlane.f32.xlu0 %v3774_v39  ;;  %v3659_v12 = vpop.f32.mrf.mxu1 }
 0xb9c   : > { %v3771_v21 = vsel %vm951_vm2, %v3659_v12, -inf }
 0xb9d   : > { %3772 = vmax.xlane.f32.xlu1 %v3771_v21 }
 0xb9f   : > { %3781 = vmax.xlane.f32.xlu0 %v3780_v36 }
 0xba1   : > { %3778 = vmax.xlane.f32.xlu1 %v3777_v33 }
 0xba3   : > { %3811 = vadd.xlane.f32.xlu0 %v3810_v51 }
 0xba5   : > { %3808 = vadd.xlane.f32.xlu1 %v3807_v31 }
 0xba7   : > { %3817 = vadd.xlane.f32.xlu0 %v3816_v6 }
 0xba9   : > { %3814 = vadd.xlane.f32.xlu1 %v3813_v2 }
 0xc24   : > { %v3776_v46 = vpop.xlane.xlu0 %3775 }
 0xc25   : > { %v3788_v29 = vsub.f32 %v10623_v44, %v3776_v46 }
 0xc26   : > { %v3773_v15 = vpop.xlane.xlu1 %3772 }
 0xc27   : > { %v3801_v24 = vmul.f32 1.442695, %v3788_v29 }
 0xc28   : > { %v3782_v25 = vpop.xlane.xlu0 %3781 }
 0xc29   : > { %v3790_v13 = vsub.f32 %v10630_v45, %v3782_v25  ;;  %v3787_v45 = vsub.f32 %v3659_v12, %v3773_v15 }
 0xc2a   : > { %v3779_v55 = vpop.xlane.xlu1 %3778 }
 0xc2b   : > { %v3805_v22 = vmul.f32 1.442695, %v3790_v13  ;;  %v3789_v56 = vsub.f32 %v3750_v4, %v3779_v55 }
 0xc2d   : > { %11235 = vpow2.f32 %v3805_v22  ;;  %v3803_v58 = vmul.f32 1.442695, %v3789_v56 }
 0xc2e   : > { %v3809_v40 = vpop.xlane.xlu1 %3808 }
 0xc2f   : > { %11237 = vpow2.f32 %v3803_v58 }
 0xc30   : > { %11239 = vrcp.f32 %v3809_v40 }
 0xc31   : > { %11241 = vpow2.f32 %v3801_v24 }
 0xc3a   : > { %v12278_v32 = vpop.eup %11235 }
 0xc3b   : > { %v3828_v28 = vsel %vm951_vm2, %v12278_v32, 0.0 }
 0xc3c   : > { %v12282_v47 = vpop.eup %11237  ;;  %3829 = vadd.xlane.f32.xlu0 %v3828_v28 }
 0xc3d   : > { %v11240_v54 = vpop.eup %11239  ;;  %v3825_v23 = vsel %vm951_vm2, %v12282_v47, 0.0 }
 0xc3e   : > { %3826 = vadd.xlane.f32.xlu1 %v3825_v23  ;;  %v3839_v38 = vmul.f32 %v11240_v54, %v11230_v20  ;;  %v12299_v39 = vpop.eup %11241 }
 0xc40   : > { %10635 = vmatprep.mubr.msk.f32.mxu1 %vm951_vm2, %v3839_v38 }
 0xc4f   : > { %3849 = vrot.lane.b32.xlu1 %v11670_v57, %s11512_s27  ;;  %v3799_v57 = vmul.f32 1.442695, %v3787_v45 }
 0xc51   : > { %11243 = vpow2.f32 %v3799_v57 }
 0xc52   : > { %3847 = vrot.lane.b32.xlu0 %v11672_v59, %s11512_s27  ;;  %v3822_v59 = vsel %vm951_vm2, %v12299_v39, 0.0 }
 0xc53   : > { %3936 = vrot.lane.b32.xlu1 %v11676_v61, %s11512_s27 }
 0xc56   : > { %4023 = vrot.lane.b32.xlu0 %v11686_v1, %s11512_s27  ;;  %v3812_v1 = vpop.xlane.xlu0 %3811 }
 0xc57   : > { %3934 = vrot.lane.b32.xlu1 %v11680_v63, %s11512_s27  ;;  %11245 = vrcp.f32 %v3812_v1 }
 0xc5a   : > { %v3818_v44 = vpop.xlane.xlu0 %3817 }
 0xc5b   : > { %4021 = vrot.lane.b32.xlu1 %v11690_v3, %s11512_s27  ;;  %v3815_v3 = vpop.xlane.xlu1 %3814 }
 0xc5c   : > { %11247 = vrcp.f32 %v3815_v3 }
 0xc5d   : > { %11249 = vrcp.f32 %v3818_v44 }
 0xc5e   : > { %v12303_v61 = vpop.eup %11243 }
 0xc5f   : > { %v3819_v63 = vsel %vm951_vm2, %v12303_v61, 0.0 }
 0xc64   : > { %v11246_v36 = vpop.eup %11245 }
 0xc69   : > { %v11248_v20 = vpop.eup %11247 }
 0xc6a   : > { %v3841_v51 = vmul.f32 %v11248_v20, %v12272_v18  ;;  %v11250_v31 = vpop.eup %11249 }
 0xc6b   : > { %v3842_v2 = vmul.f32 %v11250_v31, %v12269_v35 }
 0xc75   : > { %3823 = vadd.xlane.f32.xlu0 %v3822_v59  ;;  %v2416_v59 = vadd.f32 %v12061_v14, %v12073_v62  ;;  %v2426_v14 = vadd.f32 %v12065_v16, %v12079_v30 }
 0xc77   : > { %v3387_v3 = vadd.f32 %v12237_v42, %v2416_v59  ;;  %v3389_v20 = vadd.f32 %v12243_v0, %v2426_v14 }
 0xc7f   : > { %3820 = vadd.xlane.f32.xlu1 %v3819_v63 }
 0xc8b   : > { %4110 = vrot.lane.b32.xlu0 %v11696_v5, %s11512_s27 }
 0xc8f   : > { %4196 = vrot.lane.b32.xlu0 %v11578_v11, %s11508_s20  ;;  %v3840_v11 = vmul.f32 %v11246_v36, %v12264_v60 }
 0xc90   : > { %4108 = vrot.lane.b32.xlu1 %v11702_v7, %s11512_s27 }
 0xcc5   : > { %v3830_v12 = vpop.xlane.xlu0 %3829 }
 0xcc7   : > { %v3827_v21 = vpop.xlane.xlu1 %3826 }
 0xcc8   : > { %11251 = vrcp.f32 %v3827_v21 }
 0xcc9   : > { %v3848_v4 = vpop.permute.xlu0 %3847  ;;  %11253 = vrcp.f32 %v3830_v12 }
 0xccb   : > { %v3850_v33 = vpop.permute.xlu1 %3849 }
 0xccc   : > { %10631 = vmatprep.subr.mxu1 %v3850_v33 }
 0xccd   : > { %10632 = vmatpush3.msra.mxu1 %v3850_v33  ;;  %v4024_v5 = vpop.permute.xlu0 %4023 }
 0xcce   : > { %10633 = vmatprep.subr.mxu1 %v3848_v4  ;;  %10645 = vmatprep.subr.mxu0 %v4024_v5 }
 0xccf   : > { %v3937_v7 = vpop.permute.xlu1 %3936  ;;  %10634 = vmatpush3.msra.mxu1 %v3848_v4  ;;  %10646 = vmatpush3.msra.mxu0 %v4024_v5 }
 0xcd0   : > { %10636 = vmatmul.mubr.msk.f32.vlgmr.msra.gmra.mxu1 %vm951_vm2, %v3840_v11  ;;  %10638 = vmatprep.subr.mxu1 %v3937_v7 }
 0xcd1   : > { %10639 = vmatpush3.msra.mxu1 %v3937_v7  ;;  %10642 = vmatprep.mubr.msk.f32.mxu1 %vm951_vm2, %v3841_v51 }
 0xcd3   : > { %v3935_v6 = vpop.permute.xlu1 %3934 }
 0xcd4   : > { %10640 = vmatprep.subr.mxu1 %v3935_v6 }
 0xcd5   : > { %v11252_v46 = vpop.eup %11251  ;;  %10641 = vmatpush3.msra.mxu1 %v3935_v6 }
 0xcd6   : > { %10643 = vmatmul.mubr.msk.f32.vlgmr.msra.gmra.mxu1 %vm951_vm2, %v3842_v2  ;;  %v3845_v60 = vmul.f32 %v11252_v46, %v12282_v47  ;;  %v11254_v35 = vpop.eup %11253 }
 0xcd7   : > { %v4022_v15 = vpop.permute.xlu1 %4021  ;;  %v3846_v22 = vmul.f32 %v11254_v35, %v12278_v32 }
 0xcd8   : > { %10647 = vmatprep.subr.mxu0 %v4022_v15  ;;  %10656 = vmatprep.mubr.msk.f32.mxu1 %vm951_vm2, %v3845_v60 }
 0xcd9   : > { %10648 = vmatpush3.msra.mxu0 %v4022_v15 }
 0xcfe   : > { %v3824_v18 = vpop.xlane.xlu0 %3823 }
 0xcff   : > { %11255 = vrcp.f32 %v3824_v18 }
 0xd02   : > { %v4111_v25 = vpop.permute.xlu0 %4110 }
 0xd03   : > { %10652 = vmatprep.subr.mxu1 %v4111_v25 }
 0xd04   : > { %10653 = vmatpush3.msra.mxu1 %v4111_v25 }
 0xd06   : > { %v4197_v56 = vpop.permute.xlu0 %4196 }
 0xd07   : > { %10659 = vmatprep.subr.mxu0 %v4197_v56 }
 0xd08   : > { %v3821_v13 = vpop.xlane.xlu1 %3820 }
 0xd09   : > { %11257 = vrcp.f32 %v3821_v13 }
 0xd0c   : > { %v4109_v55 = vpop.permute.xlu1 %4108  ;;  %v11256_v58 = vpop.eup %11255 }
 0xd0d   : > { %10654 = vmatprep.subr.mxu1 %v4109_v55  ;;  %v3844_v47 = vmul.f32 %v11256_v58, %v12299_v39  ;;  %v4338_v39 = vsub.s32 1, %v11662_v52 }
 0xd0e   : > { %10655 = vmatpush3.msra.mxu1 %v4109_v55 }
 0xd0f   : > { %10657 = vmatmul.mubr.msk.f32.vlgmr.msra.gmra.mxu1 %vm951_vm2, %v3846_v22 }
 0xd16   : > { %v11258_v40 = vpop.eup %11257 }
 0xd17   : > { %v3843_v28 = vmul.f32 %v11258_v40, %v12303_v61  ;;  %v12341_v61 = vld [vmem:[%s13596_s5] sm:$0xff] }
 0xd18   : > { %v4339_v63 = vrot.slane %v12341_v61, %v4338_v39 }
 0xd19   : > { %10649 = vmatprep.mubr.msk.f32.mxu0 %vm951_vm2, %v3843_v28 }
 0xd1a   : > { %10650 = vmatmul.mubr.msk.f32.vlgmr.msra.gmra.mxu0 %vm951_vm2, %v3844_v47 }
 0xd1b   : > { %10660 = vmatpush3.msra.mxu0 %v4197_v56 }
 0xd90   : > { %v10637_v54 = vpop.f32.mrf.mxu1 }
 0xd92   : > { %v3925_v23 = vpop.f32.mrf.mxu1 }
 0xd93   : > { %10661 = vmatprep.mubr.msk.f32.mxu0 %vm278_vm0, %v3925_v23 }
 0xd94   : > { %10662 = vmatmul.mubr.msk.f32.vlgmr.msra.gmra.mxu0 %vm278_vm0, %v10637_v54 }
 0xd96   : > { %v10644_v32 = vpop.f32.mrf.mxu1 }
 0xd98   : > { %v4012_v38 = vpop.f32.mrf.mxu1 }
 0xd99   : > { %10664 = vmatprep.mubr.msk.f32.mxu0 %vm278_vm0, %v4012_v38 }
 0xd9a   : > { %10665 = vmatmul.mubr.msk.f32.gmra.mxu0 %vm278_vm0, %v10644_v32 }
 0xdcf   : > { %v10658_v29 = vpop.f32.mrf.mxu1 }
 0xdd1   : > { %v4186_v57 = vpop.f32.mrf.mxu1 }
 0xdda   : > { %v10651_v24 = vpop.f32.mrf.mxu0 }
 0xddc   : > { %v4099_v45 = vpop.f32.mrf.mxu0 }
 0xddd   : > { %10667 = vmatprep.mubr.msk.f32.mxu0 %vm278_vm0, %v4099_v45 }
 0xdde   : > { %10668 = vmatmul.mubr.msk.f32.gmra.mxu0 %vm278_vm0, %v10651_v24 }
 0xddf   : > { %10670 = vmatprep.mubr.msk.f32.mxu0 %vm278_vm0, %v4186_v57 }
 0xde2   : > { %10671 = vmatmul.mubr.msk.f32.gmra.mxu0 %vm278_vm0, %v10658_v29 }
 0xe54   : > { %v10663_v1 = vpop.f32.mrf.mxu0 }
 0xe55   : > { %v4329_v44 = vadd.f32 %v10663_v1, %v12235_v8 }
 0xe56   : > { %v4289_v12 = vpop.f32.mrf.mxu0 }
 0xe57   : > { %v4341_v21 = vadd.f32 %v4339_v63, %v4329_v44  ;;  %v4328_v4 = vadd.f32 %v4289_v12, %v3387_v3  ;;  %v11484_v12 = vld [vmem:[%s13594_s3 + $0x18] sm:$0xff] }
 0xe59   : > { %v4340_v62 = vadd.f32 %v4339_v63, %v4328_v4  ;;  %v4349_v36 = vadd.f32 %v4341_v21, %v11614_v27  ;;  %v427_v21 = vunpack.c.h.bf16 %v11484_v12  ;;  %v11485_v4 = vld [vmem:[%s13594_s3 + $0x10] sm:$0xff] }
 0xe5a   : > { %v10666_v33 = vpop.f32.mrf.mxu0  ;;  %v425_v14 = vunpack.c.h.bf16 %v11485_v4 }
 0xe5b   : > { %v4331_v5 = vadd.f32 %v10666_v33, %v12241_v48  ;;  %v4359_v11 = vsel %vm465_vm1, %v4349_v36, 0.0  ;;  %v4348_v42 = vadd.f32 %v4340_v62, %v11612_v26  ;;  %10673 = vmatprep.subr.mxu1 %v427_v21  ;;  %v11486_v62 = vld [vmem:[%s13594_s3 + $0x8] sm:$0xff]  ;;  %v11487_v33 = vld [vmem:[%s13594_s3] sm:$0xff] }
 0xe5c   : > { %4360 = vadd.xlane.f32.xlu0 %v4359_v11  ;;  %v4299_v8 = vpop.f32.mrf.mxu0  ;;  %10674 = vmatpush3.msra.mxu1 %v427_v21 }
 0xe5d   : > { %v4343_v7 = vadd.f32 %v4339_v63, %v4331_v5  ;;  %v4330_v51 = vadd.f32 %v4299_v8, %v3389_v20  ;;  %v4356_v31 = vsel %vm465_vm1, %v4348_v42, 0.0  ;;  %10675 = vmatprep.subr.mxu1 %v425_v14  ;;  %v421_v20 = vunpack.c.h.bf16 %v11487_v33 }
 0xe5e   : > { %4357 = vadd.xlane.f32.xlu1 %v4356_v31  ;;  %10676 = vmatpush3.msra.mxu1 %v425_v14 }
 0xe5f   : > { %v4342_v16 = vadd.f32 %v4339_v63, %v4330_v51  ;;  %v4351_v30 = vadd.f32 %v4343_v7, %v11631_v37 }
 0xe61   : > { %v4365_v27 = vsel %vm465_vm1, %v4351_v30, 0.0  ;;  %v4350_v0 = vadd.f32 %v4342_v16, %v11626_v34 }
 0xe62   : > { %4366 = vadd.xlane.f32.xlu1 %v4365_v27 }
 0xe63   : > { %v4362_v48 = vsel %vm465_vm1, %v4350_v0, 0.0 }
 0xe64   : > { %4363 = vadd.xlane.f32.xlu0 %v4362_v48 }
 0xe9e   : > { %v10669_v6 = vpop.f32.mrf.mxu0 }
 0xe9f   : > { %v4333_v26 = vadd.f32 %v10669_v6, %v12249_v9 }
 0xea0   : > { %v4309_v2 = vpop.f32.mrf.mxu0 }
 0xea1   : > { %v4345_v46 = vadd.f32 %v4339_v63, %v4333_v26  ;;  %v4332_v60 = vadd.f32 %v4309_v2, %v12253_v17 }
 0xea2   : > { %v10672_v15 = vpop.f32.mrf.mxu0 }
 0xea3   : > { %v4344_v18 = vadd.f32 %v4339_v63, %v4332_v60  ;;  %v4335_v25 = vadd.f32 %v10672_v15, %v12257_v10  ;;  %v4353_v37 = vadd.f32 %v4345_v46, %v11638_v41 }
 0xea4   : > { %v4319_v13 = vpop.f32.mrf.mxu0 }
 0xea5   : > { %v4347_v35 = vadd.f32 %v4339_v63, %v4335_v25  ;;  %v4334_v34 = vadd.f32 %v4319_v13, %v12259_v19  ;;  %v4371_v55 = vsel %vm465_vm1, %v4353_v37, 0.0  ;;  %v4352_v22 = vadd.f32 %v4344_v18, %v11642_v43 }
 0xea6   : > { %4372 = vadd.xlane.f32.xlu1 %v4371_v55 }
 0xea7   : > { %v4346_v9 = vadd.f32 %v4339_v63, %v4334_v34  ;;  %v4368_v56 = vsel %vm465_vm1, %v4352_v22, 0.0  ;;  %v4355_v17 = vadd.f32 %v4347_v35, %v11652_v49 }
 0xea8   : > { %4369 = vadd.xlane.f32.xlu0 %v4368_v56 }
 0xea9   : > { %v4377_v58 = vsel %vm465_vm1, %v4355_v17, 0.0  ;;  %v4354_v10 = vadd.f32 %v4346_v9, %v11656_v50 }
 0xeaa   : > { %4378 = vadd.xlane.f32.xlu1 %v4377_v58 }
 0xeab   : > { %v4374_v41 = vsel %vm465_vm1, %v4354_v10, 0.0 }
 0xeac   : > { %4375 = vadd.xlane.f32.xlu0 %v4374_v41 }
 0xee5   : > { %v4361_v19 = vpop.xlane.xlu0 %4360 }
 0xee6   : > { %v4382_v40 = vmul.f32 0.03125, %v4361_v19  ;;  %v4463_v19 = vsub.s32 4, %v11662_v52 }
 0xee7   : > { %v4358_v28 = vpop.xlane.xlu1 %4357 }
 0xee8   : > { %v12372_v47 = vsub.f32 %v4349_v36, %v4382_v40  ;;  %v4381_v43 = vmul.f32 0.03125, %v4358_v28  ;;  %v423_v36 = vunpack.c.h.bf16 %v11486_v62  ;;  %v12428_v28 = vrot.slane %v12341_v61, %v4463_v19 }
 0xeea   : > { %v12374_v54 = vsub.f32 %v4348_v42, %v4381_v43  ;;  %v4398_v49 = vmul.f32 %v12372_v47, %v12372_v47  ;;  %10677 = vmatprep.subr.mxu1 %v423_v36  ;;  %v4475_v43 = vsub.s32 5, %v11662_v52 }
 0xeeb   : > { %v4367_v23 = vpop.xlane.xlu1 %4366  ;;  %10678 = vmatpush3.msra.mxu1 %v423_v36 }
 0xeec   : > { %v4384_v32 = vmul.f32 0.03125, %v4367_v23  ;;  %v4408_v38 = vsel %vm465_vm1, %v4398_v49, 0.0  ;;  %v4397_v50 = vmul.f32 %v12374_v54, %v12374_v54  ;;  %10679 = vmatprep.subr.mxu1 %v421_v20 }
 0xeed   : > { %v4364_v29 = vpop.xlane.xlu0 %4363  ;;  %4409 = vadd.xlane.f32.xlu1 %v4408_v38  ;;  %10680 = vmatpush3.msra.mxu1 %v421_v20  ;;  %v12436_v38 = vrot.slane %v12341_v61, %v4475_v43 }
 0xeee   : > { %v12381_v24 = vsub.f32 %v4351_v30, %v4384_v32  ;;  %v4383_v45 = vmul.f32 0.03125, %v4364_v29  ;;  %v4405_v57 = vsel %vm465_vm1, %v4397_v50, 0.0 }
 0xeef   : > { %4406 = vadd.xlane.f32.xlu0 %v4405_v57 }
 0xef0   : > { %v12384_v59 = vsub.f32 %v4350_v0, %v4383_v45  ;;  %v4400_v63 = vmul.f32 %v12381_v24, %v12381_v24 }
 0xef2   : > { %v4414_v1 = vsel %vm465_vm1, %v4400_v63, 0.0  ;;  %v4399_v3 = vmul.f32 %v12384_v59, %v12384_v59 }
 0xef3   : > { %4415 = vadd.xlane.f32.xlu1 %v4414_v1 }
 0xef4   : > { %v4411_v44 = vsel %vm465_vm1, %v4399_v3, 0.0 }
 0xef5   : > { %4412 = vadd.xlane.f32.xlu0 %v4411_v44 }
 0xf2f   : > { %v4373_v5 = vpop.xlane.xlu1 %4372 }
 0xf30   : > { %v4386_v11 = vmul.f32 0.03125, %v4373_v5 }
 0xf31   : > { %v4370_v42 = vpop.xlane.xlu0 %4369 }
 0xf32   : > { %v12404_v8 = vsub.f32 %v4353_v37, %v4386_v11  ;;  %v4385_v7 = vmul.f32 0.03125, %v4370_v42 }
 0xf33   : > { %v4379_v51 = vpop.xlane.xlu1 %4378 }
 0xf34   : > { %v12406_v31 = vsub.f32 %v4352_v22, %v4385_v7  ;;  %v4388_v16 = vmul.f32 0.03125, %v4379_v51  ;;  %v4402_v30 = vmul.f32 %v12404_v8, %v12404_v8 }
 0xf35   : > { %v4376_v27 = vpop.xlane.xlu0 %4375 }
 0xf36   : > { %v12410_v0 = vsub.f32 %v4355_v17, %v4388_v16  ;;  %v4387_v48 = vmul.f32 0.03125, %v4376_v27  ;;  %v4420_v6 = vsel %vm465_vm1, %v4402_v30, 0.0  ;;  %v4401_v26 = vmul.f32 %v12406_v31, %v12406_v31  ;;  %v9917_v16 = vld [vmem:[%s13595_s4 + $0x38] sm:$0xff]  }
 0xf37   : > { %4421 = vadd.xlane.f32.xlu1 %v4420_v6  ;;  %v9878_v27 = vunpack.c.h.bf16 %v9917_v16 }
 0xf38   : > { %v12415_v2 = vsub.f32 %v4354_v10, %v4387_v48  ;;  %v4417_v46 = vsel %vm465_vm1, %v4401_v26, 0.0  ;;  %v4404_v60 = vmul.f32 %v12410_v0, %v12410_v0  ;;  %v9877_v26 = vunpack.c.l.bf16 %v9917_v16 }
 0xf39   : > { %4418 = vadd.xlane.f32.xlu0 %v4417_v46  ;;  %10693 = vmatprep.subr.mxu0 %v9878_v27 }
 0xf3a   : > { %v4426_v15 = vsel %vm465_vm1, %v4404_v60, 0.0  ;;  %v4403_v18 = vmul.f32 %v12415_v2, %v12415_v2  ;;  %10694 = vmatpush3.msra.mxu0 %v9878_v27 }
 0xf3b   : > { %4427 = vadd.xlane.f32.xlu1 %v4426_v15  ;;  %v9916_v15 = vld [vmem:[%s13595_s4 + $0x30] sm:$0xff]   ;;  %10695 = vmatprep.subr.mxu0 %v9877_v26 }
 0xf3c   : > { %v4423_v25 = vsel %vm465_vm1, %v4403_v18, 0.0  ;;  %10696 = vmatpush3.msra.mxu0 %v9877_v26 }
 0xf3d   : > { %4424 = vadd.xlane.f32.xlu0 %v4423_v25 }
 0xf76   : > { %v4410_v37 = vpop.xlane.xlu1 %4409 }
 0xf77   : > { %v4430_v13 = vmul.f32 0.03125, %v4410_v37 }
 0xf78   : > { %v4407_v35 = vpop.xlane.xlu0 %4406 }
 0xf79   : > { %v4438_v34 = vadd.f32 1e-05, %v4430_v13  ;;  %v4429_v55 = vmul.f32 0.03125, %v4407_v35  ;;  %v9873_v35 = vunpack.c.l.bf16 %v9916_v15 }
 0xf7b   : > { %11259 = vrsqrt.f32 %v4438_v34  ;;  %v4437_v22 = vadd.f32 1e-05, %v4429_v55 }
 0xf7c   : > { %v4416_v9 = vpop.xlane.xlu1 %4415 }
 0xf7d   : > { %11261 = vrsqrt.f32 %v4437_v22  ;;  %v4432_v56 = vmul.f32 0.03125, %v4416_v9 }
 0xf7e   : > { %v4413_v17 = vpop.xlane.xlu0 %4412 }
 0xf7f   : > { %v4440_v58 = vadd.f32 1e-05, %v4432_v56  ;;  %v4431_v10 = vmul.f32 0.03125, %v4413_v17 }
 0xf81   : > { %11263 = vrsqrt.f32 %v4440_v58  ;;  %v4439_v41 = vadd.f32 1e-05, %v4431_v10  ;;  %v9914_v58 = vld [vmem:[%s13595_s4 + $0x20] sm:$0xff]  }
 0xf82   : > { %v9866_v10 = vunpack.c.h.bf16 %v9914_v58 }
 0xf83   : > { %11265 = vrsqrt.f32 %v4439_v41  ;;  %v9865_v41 = vunpack.c.l.bf16 %v9914_v58 }
 0xf88   : > { %v11260_v40 = vpop.eup %11259 }
 0xf89   : > { %v4454_v49 = vmul.f32 %v11260_v40, %v12372_v47  ;;  %v9913_v40 = vld [vmem:[%s13595_s4 + $0x18] sm:$0xff]  }
 0xf8a   : > { %v11262_v23 = vpop.eup %11261 }
 0xf8b   : > { %v4453_v32 = vmul.f32 %v11262_v23, %v12374_v54  ;;  %v4466_v50 = vmul.f32 %v12428_v28, %v4454_v49  ;;  %v9912_v49 = vld [vmem:[%s13595_s4 + $0x10] sm:$0xff]   ;;  %v9861_v23 = vunpack.c.l.bf16 %v9913_v40 }
 0xf8d   : > { %v4465_v29 = vmul.f32 %v12428_v28, %v4453_v32  ;;  %v12445_v47 = vadd.f32 %v12436_v38, %v4466_v50  ;;  %v9858_v32 = vunpack.c.h.bf16 %v9912_v49  ;;  %v9857_v50 = vunpack.c.l.bf16 %v9912_v49 }
 0xf8e   : > { %v11264_v45 = vpop.eup %11263 }
 0xf8f   : > { %v12441_v57 = vadd.f32 %v12436_v38, %v4465_v29  ;;  %v4456_v63 = vmul.f32 %v11264_v45, %v12381_v24  ;;  %v9848_v45 = vld [vmem:[%s13595_s4] sm:$0xff]  }
 0xf90   : > { %v11266_v1 = vpop.eup %11265 }
 0xf91   : > { %10681 = vmatprep.mubr.msk.f32.mxu1 %vm465_vm1, %v12441_v57  ;;  %v4455_v54 = vmul.f32 %v11266_v1, %v12384_v59  ;;  %v4468_v3 = vmul.f32 %v12428_v28, %v4456_v63  ;;  %v9850_v1 = vunpack.c.h.bf16 %v9848_v45 }
 0xf92   : > { %10682 = vmatmul.mubr.msk.f32.vlgmr.msra.gmra.mxu1 %vm465_vm1, %v12445_v47 }
 0xf93   : > { %v4467_v44 = vmul.f32 %v12428_v28, %v4455_v54  ;;  %v12458_v24 = vadd.f32 %v12436_v38, %v4468_v3  ;;  %v9849_v54 = vunpack.c.l.bf16 %v9848_v45  ;;  %v4487_v3 = vsub.s32 2, %v11662_v52 }
 0xf95   : > { %v12455_v12 = vadd.f32 %v12436_v38, %v4467_v44  ;;  %v12520_v44 = vrot.slane %v12341_v61, %v4487_v3 }
 0xf97   : > { %10684 = vmatprep.mubr.msk.f32.mxu1 %vm465_vm1, %v12455_v12 }
 0xf98   : > { %10685 = vmatmul.mubr.msk.f32.gmra.mxu1 %vm465_vm1, %v12458_v24 }
 0xfc0   : > { %v4422_v59 = vpop.xlane.xlu1 %4421 }
 0xfc1   : > { %v4434_v21 = vmul.f32 0.03125, %v4422_v59 }
 0xfc2   : > { %v4419_v4 = vpop.xlane.xlu0 %4418 }
 0xfc3   : > { %v4442_v14 = vadd.f32 1e-05, %v4434_v21  ;;  %v4433_v62 = vmul.f32 0.03125, %v4419_v4 }
 0xfc4   : > { %v4428_v36 = vpop.xlane.xlu1 %4427 }
 0xfc5   : > { %11267 = vrsqrt.f32 %v4442_v14  ;;  %v4441_v33 = vadd.f32 1e-05, %v4433_v62  ;;  %v4436_v20 = vmul.f32 0.03125, %v4428_v36 }
 0xfc6   : > { %v4425_v5 = vpop.xlane.xlu0 %4424 }
 0xfc7   : > { %11269 = vrsqrt.f32 %v4441_v33  ;;  %v4444_v11 = vadd.f32 1e-05, %v4436_v20  ;;  %v4435_v42 = vmul.f32 0.03125, %v4425_v5 }
 0xfc9   : > { %11271 = vrsqrt.f32 %v4444_v11  ;;  %v4443_v7 = vadd.f32 1e-05, %v4435_v42 }
 0xfcb   : > { %11273 = vrsqrt.f32 %v4443_v7 }
 0xfd2   : > { %v11268_v51 = vpop.eup %11267 }
 0xfd3   : > { %v4458_v30 = vmul.f32 %v11268_v51, %v12404_v8  ;;  %v9874_v8 = vunpack.c.h.bf16 %v9916_v15 }
 0xfd4   : > { %v11270_v48 = vpop.eup %11269 }
 0xfd5   : > { %v4457_v6 = vmul.f32 %v11270_v48, %v12406_v31  ;;  %v4470_v60 = vmul.f32 %v12428_v28, %v4458_v30  ;;  %10697 = vmatprep.subr.mxu0 %v9874_v8 }
 0xfd6   : > { %v11272_v46 = vpop.eup %11271  ;;  %10698 = vmatpush3.msra.mxu0 %v9874_v8 }
 0xfd7   : > { %v4469_v18 = vmul.f32 %v12428_v28, %v4457_v6  ;;  %v4460_v25 = vmul.f32 %v11272_v46, %v12410_v0  ;;  %v12480_v34 = vadd.f32 %v12436_v38, %v4470_v60  ;;  %v9915_v0 = vld [vmem:[%s13595_s4 + $0x28] sm:$0xff]   ;;  %10699 = vmatprep.subr.mxu0 %v9873_v35 }
 0xfd8   : > { %v11274_v37 = vpop.eup %11273  ;;  %v9870_v9 = vunpack.c.h.bf16 %v9915_v0  ;;  %10700 = vmatpush3.msra.mxu0 %v9873_v35  ;;  %v9869_v56 = vunpack.c.l.bf16 %v9915_v0 }
 0xfd9   : > { %v12476_v31 = vadd.f32 %v12436_v38, %v4469_v18  ;;  %v4459_v13 = vmul.f32 %v11274_v37, %v12415_v2  ;;  %v4472_v55 = vmul.f32 %v12428_v28, %v4460_v25 }
 0xfda   : > { %10701 = vmatprep.subr.mxu0 %v9870_v9 }
 0xfdb   : > { %10687 = vmatprep.mubr.msk.f32.mxu1 %vm465_vm1, %v12476_v31  ;;  %v4471_v22 = vmul.f32 %v12428_v28, %v4459_v13  ;;  %v12495_v17 = vadd.f32 %v12436_v38, %v4472_v55  ;;  %10702 = vmatpush3.msra.mxu0 %v9870_v9  ;;  %v9862_v28 = vunpack.c.h.bf16 %v9913_v40 }
 0xfdc   : > { %10688 = vmatmul.mubr.msk.f32.gmra.mxu1 %vm465_vm1, %v12480_v34  ;;  %10703 = vmatprep.subr.mxu0 %v9869_v56 }
 0xfdd   : > { %v12492_v2 = vadd.f32 %v12436_v38, %v4471_v22  ;;  %10704 = vmatpush3.msra.mxu0 %v9869_v56  ;;  %v9911_v38 = vld [vmem:[%s13595_s4 + $0x8] sm:$0xff]  }
 0xfde   : > { %10705 = vmatprep.subr.mxu0 %v9866_v10  ;;  %v9854_v29 = vunpack.c.h.bf16 %v9911_v38  ;;  %v9853_v63 = vunpack.c.l.bf16 %v9911_v38 }
 0xfdf   : > { %10690 = vmatprep.mubr.msk.f32.mxu1 %vm465_vm1, %v12492_v2  ;;  %10706 = vmatpush3.msra.mxu0 %v9866_v10 }
 0xfe0   : > { %10691 = vmatmul.mubr.msk.f32.gmra.mxu1 %vm465_vm1, %v12495_v17  ;;  %10707 = vmatprep.subr.mxu0 %v9865_v41 }
 0xfe1   : > { %10708 = vmatpush3.msra.mxu0 %v9865_v41 }
 0xfe2   : > { %10709 = vmatprep.subr.mxu0 %v9862_v28 }
 0xfe3   : > { %10710 = vmatpush3.msra.mxu0 %v9862_v28 }
 0xfe4   : > { %10711 = vmatprep.subr.mxu0 %v9861_v23 }
 0xfe5   : > { %10712 = vmatpush3.msra.mxu0 %v9861_v23 }
 0xfe6   : > { %10713 = vmatprep.subr.mxu0 %v9858_v32 }
 0xfe7   : > { %10714 = vmatpush3.msra.mxu0 %v9858_v32 }
 0xfe8   : > { %10715 = vmatprep.subr.mxu0 %v9857_v50 }
 0xfe9   : > { %10716 = vmatpush3.msra.mxu0 %v9857_v50 }
 0xfea   : > { %10717 = vmatprep.subr.mxu0 %v9854_v29 }
 0xfeb   : > { %10718 = vmatpush3.msra.mxu0 %v9854_v29 }
 0xfec   : > { %10719 = vmatprep.subr.mxu0 %v9853_v63 }
 0xfed   : > { %10720 = vmatpush3.msra.mxu0 %v9853_v63 }
 0xfee   : > { %10721 = vmatprep.subr.mxu0 %v9850_v1 }
 0xfef   : > { %10722 = vmatpush3.msra.mxu0 %v9850_v1 }
 0xff0   : > { %10723 = vmatprep.subr.mxu0 %v9849_v54 }
 0xff1   : > { %10724 = vmatpush3.msra.mxu0 %v9849_v54 }
0x1052   : > { %v10683_v59 = vpop.f32.mrf.mxu1 }
0x1053   : > { %v4585_v21 = vadd.f32 %v10683_v59, %v12520_v44 }
0x1054   : > { %v4579_v4 = vpop.f32.mrf.mxu1 }
0x1055   : > { %v4627_v14 = vmul.f32 0.044715, %v4585_v21  ;;  %v4580_v62 = vadd.f32 %v4579_v4, %v12520_v44  ;;  %v4619_v58 = vmul.f32 0.5, %v4585_v21 }
0x1057   : > { %v4635_v36 = vmul.f32 %v4627_v14, %v4585_v21  ;;  %v4626_v33 = vmul.f32 0.044715, %v4580_v62  ;;  %v4618_v9 = vmul.f32 0.5, %v4580_v62 }
0x1058   : > { %v10686_v20 = vpop.f32.mrf.mxu1 }
0x1059   : > { %v4643_v5 = vmul.f32 %v4635_v36, %v4585_v21  ;;  %v4634_v11 = vmul.f32 %v4626_v33, %v4580_v62  ;;  %v4595_v42 = vadd.f32 %v10686_v20, %v12520_v44 }
0x105a   : > { %v4589_v7 = vpop.f32.mrf.mxu1 }
0x105b   : > { %v4651_v51 = vadd.f32 %v4643_v5, %v4585_v21  ;;  %v4629_v16 = vmul.f32 0.044715, %v4595_v42  ;;  %v4590_v30 = vadd.f32 %v4589_v7, %v12520_v44  ;;  %v4642_v27 = vmul.f32 %v4634_v11, %v4580_v62 }
0x105c   : > { %v4621_v38 = vmul.f32 0.5, %v4595_v42 }
0x105d   : > { %v4659_v48 = vmul.f32 0.7978846, %v4651_v51  ;;  %v4637_v6 = vmul.f32 %v4629_v16, %v4595_v42  ;;  %v4628_v26 = vmul.f32 0.044715, %v4590_v30  ;;  %v4650_v46 = vadd.f32 %v4642_v27, %v4580_v62 }
0x105e   : > { %v4620_v23 = vmul.f32 0.5, %v4590_v30 }
0x105f   : > { %11275 = vtanh.f32 %v4659_v48  ;;  %v4636_v60 = vmul.f32 %v4628_v26, %v4590_v30  ;;  %v4658_v15 = vmul.f32 0.7978846, %v4650_v46  ;;  %v4645_v18 = vmul.f32 %v4637_v6, %v4595_v42 }
0x1061   : > { %11277 = vtanh.f32 %v4658_v15  ;;  %v4644_v25 = vmul.f32 %v4636_v60, %v4590_v30  ;;  %v4653_v8 = vadd.f32 %v4645_v18, %v4595_v42 }
0x1063   : > { %v4652_v37 = vadd.f32 %v4644_v25, %v4590_v30  ;;  %v4661_v13 = vmul.f32 0.7978846, %v4653_v8 }
0x1065   : > { %v4660_v35 = vmul.f32 0.7978846, %v4652_v37  ;;  %11279 = vtanh.f32 %v4661_v13 }
0x1067   : > { %11281 = vtanh.f32 %v4660_v35 }
0x106c   : > { %v11276_v55 = vpop.eup %11275 }
0x106d   : > { %v4675_v22 = vadd.f32 1.0, %v11276_v55 }
0x106e   : > { %v11278_v0 = vpop.eup %11277 }
0x106f   : > { %v4674_v56 = vadd.f32 1.0, %v11278_v0  ;;  %v4683_v40 = vmul.f32 %v4675_v22, %v4619_v58 }
0x1071   : > { %v4682_v10 = vmul.f32 %v4674_v56, %v4618_v9 }
0x1072   : > { %v11280_v41 = vpop.eup %11279 }
0x1073   : > { %10725 = vmatprep.mubr.f32.mxu0 %v4682_v10  ;;  %v4677_v49 = vadd.f32 1.0, %v11280_v41 }
0x1074   : > { %v11282_v28 = vpop.eup %11281  ;;  %10726 = vmatmul.mubr.f32.vlgmr.msra.gmra.mxu0 %v4683_v40 }
0x1075   : > { %v4676_v32 = vadd.f32 1.0, %v11282_v28  ;;  %v4685_v29 = vmul.f32 %v4677_v49, %v4621_v38 }
0x1077   : > { %v4684_v50 = vmul.f32 %v4676_v32, %v4620_v23  ;;  %v4692_v23 = vsub.s32 3, %v11662_v52 }
0x1079   : > { %10728 = vmatprep.mubr.f32.mxu0 %v4684_v50  ;;  %v4693_v32 = vrot.slane %v12341_v61, %v4692_v23 }
0x107a   : > { %10729 = vmatmul.mubr.f32.gmra.mxu0 %v4685_v29 }
0x109c   : > { %v10689_v45 = vpop.f32.mrf.mxu1 }
0x109d   : > { %v4605_v63 = vadd.f32 %v10689_v45, %v12520_v44 }
0x109e   : > { %v4599_v1 = vpop.f32.mrf.mxu1 }
0x109f   : > { %v4631_v54 = vmul.f32 0.044715, %v4605_v63  ;;  %v4600_v59 = vadd.f32 %v4599_v1, %v12520_v44  ;;  %v4623_v0 = vmul.f32 0.5, %v4605_v63 }
0x10a0   : > { %v10692_v21 = vpop.f32.mrf.mxu1 }
0x10a1   : > { %v4639_v4 = vmul.f32 %v4631_v54, %v4605_v63  ;;  %v4630_v14 = vmul.f32 0.044715, %v4600_v59  ;;  %v4615_v62 = vadd.f32 %v10692_v21, %v12520_v44  ;;  %v4622_v13 = vmul.f32 0.5, %v4600_v59 }
0x10a2   : > { %v4609_v36 = vpop.f32.mrf.mxu1 }
0x10a3   : > { %v4638_v33 = vmul.f32 %v4630_v14, %v4600_v59  ;;  %v4633_v20 = vmul.f32 0.044715, %v4615_v62  ;;  %v4610_v5 = vadd.f32 %v4609_v36, %v12520_v44  ;;  %v4647_v11 = vmul.f32 %v4639_v4, %v4605_v63 }
0x10a4   : > { %v4625_v40 = vmul.f32 0.5, %v4615_v62 }
0x10a5   : > { %v4641_v42 = vmul.f32 %v4633_v20, %v4615_v62  ;;  %v4632_v7 = vmul.f32 0.044715, %v4610_v5  ;;  %v4646_v51 = vmul.f32 %v4638_v33, %v4600_v59  ;;  %v4655_v16 = vadd.f32 %v4647_v11, %v4605_v63 }
0x10a6   : > { %v4624_v10 = vmul.f32 0.5, %v4610_v5 }
0x10a7   : > { %v4640_v30 = vmul.f32 %v4632_v7, %v4610_v5  ;;  %v4654_v27 = vadd.f32 %v4646_v51, %v4600_v59  ;;  %v4663_v48 = vmul.f32 0.7978846, %v4655_v16  ;;  %v4649_v6 = vmul.f32 %v4641_v42, %v4615_v62 }
0x10a9   : > { %v4662_v26 = vmul.f32 0.7978846, %v4654_v27  ;;  %11283 = vtanh.f32 %v4663_v48  ;;  %v4648_v46 = vmul.f32 %v4640_v30, %v4610_v5  ;;  %v4657_v60 = vadd.f32 %v4649_v6, %v4615_v62 }
0x10ab   : > { %11285 = vtanh.f32 %v4662_v26  ;;  %v4656_v15 = vadd.f32 %v4648_v46, %v4610_v5  ;;  %v4665_v18 = vmul.f32 0.7978846, %v4657_v60 }
0x10ad   : > { %v4664_v25 = vmul.f32 0.7978846, %v4656_v15  ;;  %11287 = vtanh.f32 %v4665_v18 }
0x10af   : > { %11289 = vtanh.f32 %v4664_v25 }
0x10b6   : > { %v11284_v44 = vpop.eup %11283 }
0x10b7   : > { %v4679_v37 = vadd.f32 1.0, %v11284_v44 }
0x10b8   : > { %v11286_v8 = vpop.eup %11285 }
0x10b9   : > { %v4678_v35 = vadd.f32 1.0, %v11286_v8  ;;  %v4687_v56 = vmul.f32 %v4679_v37, %v4623_v0 }
0x10ba   : > { %v11288_v55 = vpop.eup %11287 }
0x10bb   : > { %v4686_v22 = vmul.f32 %v4678_v35, %v4622_v13  ;;  %v4681_v58 = vadd.f32 1.0, %v11288_v55 }
0x10bc   : > { %v11290_v9 = vpop.eup %11289 }
0x10bd   : > { %10731 = vmatprep.mubr.f32.mxu0 %v4686_v22  ;;  %v4680_v41 = vadd.f32 1.0, %v11290_v9  ;;  %v4689_v49 = vmul.f32 %v4681_v58, %v4625_v40  ;;  %v9683_v40 = vld [vmem:[%s13594_s3 + $0x38] sm:$0xff] }
0x10be   : > { %10732 = vmatmul.mubr.f32.gmra.mxu0 %v4687_v56 }
0x10bf   : > { %v4688_v28 = vmul.f32 %v4680_v41, %v4624_v10 }
0x10c1   : > { %10734 = vmatprep.mubr.f32.mxu0 %v4688_v28  ;;  %v12573_v28 = vunpack.c.l.bf16 %v9683_v40 }
0x10c2   : > { %10735 = vmatmul.mubr.f32.gmra.mxu0 %v4689_v49  ;;  %v9682_v49 = vld [vmem:[%s13594_s3 + $0x30] sm:$0xff] }
0x10c3   : > { %10737 = vmatprep.subr.mxu1 %v12573_v28 }
0x10c4   : > { %10738 = vmatpush3.msra.mxu1 %v12573_v28 }
0x1134   : > { %v10727_v38 = vpop.f32.mrf.mxu0 }
0x1135   : > { %v4766_v50 = vadd.f32 %v10727_v38, %v4693_v32  ;;  %v9681_v38 = vld [vmem:[%s13594_s3 + $0x28] sm:$0xff] }
0x1136   : > { %v4760_v29 = vpop.f32.mrf.mxu0 }
0x1137   : > { %v4800_v45 = vadd.f32 %v4766_v50, %v12445_v47  ;;  %v4761_v63 = vadd.f32 %v4760_v29, %v4693_v32  ;;  %v9680_v50 = vld [vmem:[%s13594_s3 + $0x20] sm:$0xff]  ;;  %v12588_v29 = vunpack.c.l.bf16 %v9681_v38 }
0x1139   : > { %v4799_v1 = vadd.f32 %v4761_v63, %v12441_v57  ;;  %v4810_v54 = vsel %vm465_vm1, %v4800_v45, 0.0 }
0x113a   : > { %4811 = vadd.xlane.f32.xlu1 %v4810_v54  ;;  %v10730_v59 = vpop.f32.mrf.mxu0 }
0x113b   : > { %v4776_v21 = vadd.f32 %v10730_v59, %v4693_v32  ;;  %v4807_v4 = vsel %vm465_vm1, %v4799_v1, 0.0 }
0x113c   : > { %4808 = vadd.xlane.f32.xlu0 %v4807_v4  ;;  %v4770_v14 = vpop.f32.mrf.mxu0 }
0x113d   : > { %v4802_v62 = vadd.f32 %v4776_v21, %v12458_v24  ;;  %v4771_v36 = vadd.f32 %v4770_v14, %v4693_v32 }
0x113f   : > { %v4801_v33 = vadd.f32 %v4771_v36, %v12455_v12  ;;  %v4816_v20 = vsel %vm465_vm1, %v4802_v62, 0.0 }
0x1140   : > { %4817 = vadd.xlane.f32.xlu1 %v4816_v20 }
0x1141   : > { %v4813_v47 = vsel %vm465_vm1, %v4801_v33, 0.0 }
0x1142   : > { %4814 = vadd.xlane.f32.xlu0 %v4813_v47 }
0x117e   : > { %v10733_v57 = vpop.f32.mrf.mxu0 }
0x117f   : > { %v4786_v5 = vadd.f32 %v10733_v57, %v4693_v32 }
0x1180   : > { %v4780_v11 = vpop.f32.mrf.mxu0 }
0x1181   : > { %v4804_v42 = vadd.f32 %v4786_v5, %v12480_v34  ;;  %v4781_v7 = vadd.f32 %v4780_v11, %v4693_v32 }
0x1182   : > { %v10736_v51 = vpop.f32.mrf.mxu0 }
0x1183   : > { %v4803_v16 = vadd.f32 %v4781_v7, %v12476_v31  ;;  %v4796_v30 = vadd.f32 %v10736_v51, %v4693_v32  ;;  %v4822_v24 = vsel %vm465_vm1, %v4804_v42, 0.0 }
0x1184   : > { %4823 = vadd.xlane.f32.xlu1 %v4822_v24  ;;  %v4790_v12 = vpop.f32.mrf.mxu0 }
0x1185   : > { %v4806_v27 = vadd.f32 %v4796_v30, %v12495_v17  ;;  %v4791_v48 = vadd.f32 %v4790_v12, %v4693_v32  ;;  %v4819_v6 = vsel %vm465_vm1, %v4803_v16, 0.0  ;;  %v12579_v32 = vunpack.c.l.bf16 %v9682_v49 }
0x1186   : > { %4820 = vadd.xlane.f32.xlu0 %v4819_v6 }
0x1187   : > { %v4805_v26 = vadd.f32 %v4791_v48, %v12492_v2  ;;  %v4828_v46 = vsel %vm465_vm1, %v4806_v27, 0.0  ;;  %10739 = vmatprep.subr.mxu1 %v12579_v32 }
0x1188   : > { %4829 = vadd.xlane.f32.xlu1 %v4828_v46  ;;  %10740 = vmatpush3.msra.mxu1 %v12579_v32 }
0x1189   : > { %v4825_v34 = vsel %vm465_vm1, %v4805_v26, 0.0  ;;  %10741 = vmatprep.subr.mxu1 %v12588_v29 }
0x118a   : > { %4826 = vadd.xlane.f32.xlu0 %v4825_v34  ;;  %10742 = vmatpush3.msra.mxu1 %v12588_v29 }
0x11c3   : > { %v4812_v31 = vpop.xlane.xlu1 %4811 }
0x11c4   : > { %v4832_v60 = vmul.f32 0.03125, %v4812_v31 }
0x11c5   : > { %v4809_v15 = vpop.xlane.xlu0 %4808 }
0x11c6   : > { %v12550_v18 = vsub.f32 %v4800_v45, %v4832_v60  ;;  %v4831_v25 = vmul.f32 0.03125, %v4809_v15  ;;  %v12591_v45 = vunpack.c.l.bf16 %v9680_v50 }
0x11c8   : > { %v12552_v44 = vsub.f32 %v4799_v1, %v4831_v25  ;;  %v4848_v17 = vmul.f32 %v12550_v18, %v12550_v18  ;;  %10743 = vmatprep.subr.mxu1 %v12591_v45 }
0x11c9   : > { %v4818_v8 = vpop.xlane.xlu1 %4817  ;;  %10744 = vmatpush3.msra.mxu1 %v12591_v45 }
0x11ca   : > { %v4834_v37 = vmul.f32 0.03125, %v4818_v8  ;;  %v4858_v2 = vsel %vm465_vm1, %v4848_v17, 0.0  ;;  %v4847_v13 = vmul.f32 %v12552_v44, %v12552_v44  ;;  %v4913_v17 = vsub.s32 6, %v11662_v52 }
0x11cb   : > { %4859 = vadd.xlane.f32.xlu1 %v4858_v2  ;;  %v4815_v35 = vpop.xlane.xlu0 %4814  ;;  %v13598_v2 = vsub.s32 7, %v11662_v52 }
0x11cc   : > { %v12559_v55 = vsub.f32 %v4802_v62, %v4834_v37  ;;  %v4833_v0 = vmul.f32 0.03125, %v4815_v35  ;;  %v4855_v22 = vsel %vm465_vm1, %v4847_v13, 0.0  ;;  %v4914_v37 = vrot.slane %v12341_v61, %v4913_v17 }
0x11cd   : > { %4856 = vadd.xlane.f32.xlu0 %v4855_v22 }
0x11ce   : > { %v12562_v9 = vsub.f32 %v4801_v33, %v4833_v0  ;;  %v4850_v56 = vmul.f32 %v12559_v55, %v12559_v55 }
0x11d0   : > { %v4864_v58 = vsel %vm465_vm1, %v4850_v56, 0.0  ;;  %v4849_v10 = vmul.f32 %v12562_v9, %v12562_v9  ;;  %v4926_v56 = vrot.slane %v12341_v61, %v13598_v2 }
0x11d1   : > { %4865 = vadd.xlane.f32.xlu1 %v4864_v58 }
0x11d2   : > { %v4861_v41 = vsel %vm465_vm1, %v4849_v10, 0.0 }
0x11d3   : > { %4862 = vadd.xlane.f32.xlu0 %v4861_v41 }
0x120d   : > { %v4824_v63 = vpop.xlane.xlu1 %4823 }
0x120e   : > { %v4836_v1 = vmul.f32 0.03125, %v4824_v63 }
0x120f   : > { %v4821_v54 = vpop.xlane.xlu0 %4820 }
0x1210   : > { %v12598_v59 = vsub.f32 %v4804_v42, %v4836_v1  ;;  %v4835_v21 = vmul.f32 0.03125, %v4821_v54 }
0x1211   : > { %v4830_v4 = vpop.xlane.xlu1 %4829 }
0x1212   : > { %v12600_v14 = vsub.f32 %v4803_v16, %v4835_v21  ;;  %v4838_v62 = vmul.f32 0.03125, %v4830_v4  ;;  %v4852_v36 = vmul.f32 %v12598_v59, %v12598_v59 }
0x1213   : > { %v4827_v33 = vpop.xlane.xlu0 %4826 }
0x1214   : > { %v12604_v20 = vsub.f32 %v4806_v27, %v4838_v62  ;;  %v4837_v47 = vmul.f32 0.03125, %v4827_v33  ;;  %v4870_v57 = vsel %vm465_vm1, %v4852_v36, 0.0  ;;  %v4851_v5 = vmul.f32 %v12600_v14, %v12600_v14 }
0x1215   : > { %4871 = vadd.xlane.f32.xlu1 %v4870_v57 }
0x1216   : > { %v12609_v11 = vsub.f32 %v4805_v26, %v4837_v47  ;;  %v4867_v42 = vsel %vm465_vm1, %v4851_v5, 0.0  ;;  %v4854_v7 = vmul.f32 %v12604_v20, %v12604_v20 }
0x1217   : > { %4868 = vadd.xlane.f32.xlu0 %v4867_v42 }
0x1218   : > { %v4876_v51 = vsel %vm465_vm1, %v4854_v7, 0.0  ;;  %v4853_v16 = vmul.f32 %v12609_v11, %v12609_v11 }
0x1219   : > { %4877 = vadd.xlane.f32.xlu1 %v4876_v51 }
0x121a   : > { %v4873_v30 = vsel %vm465_vm1, %v4853_v16, 0.0 }
0x121b   : > { %4874 = vadd.xlane.f32.xlu0 %v4873_v30 }
0x1254   : > { %v4860_v24 = vpop.xlane.xlu1 %4859 }
0x1255   : > { %v4880_v12 = vmul.f32 0.03125, %v4860_v24 }
0x1256   : > { %v4857_v27 = vpop.xlane.xlu0 %4856 }
0x1257   : > { %v4888_v48 = vadd.f32 1e-05, %v4880_v12  ;;  %v4879_v6 = vmul.f32 0.03125, %v4857_v27 }
0x1259   : > { %11291 = vrsqrt.f32 %v4888_v48  ;;  %v4887_v26 = vadd.f32 1e-05, %v4879_v6 }
0x125a   : > { %v4866_v46 = vpop.xlane.xlu1 %4865 }
0x125b   : > { %11293 = vrsqrt.f32 %v4887_v26  ;;  %v4882_v34 = vmul.f32 0.03125, %v4866_v46 }
0x125c   : > { %v4863_v31 = vpop.xlane.xlu0 %4862 }
0x125d   : > { %v4890_v60 = vadd.f32 1e-05, %v4882_v34  ;;  %v4881_v15 = vmul.f32 0.03125, %v4863_v31 }
0x125f   : > { %11295 = vrsqrt.f32 %v4890_v60  ;;  %v4889_v25 = vadd.f32 1e-05, %v4881_v15 }
0x1261   : > { %11297 = vrsqrt.f32 %v4889_v25 }
0x1266   : > { %v11292_v8 = vpop.eup %11291 }
0x1267   : > { %v4904_v13 = vmul.f32 %v11292_v8, %v12550_v18 }
0x1268   : > { %v11294_v35 = vpop.eup %11293 }
0x1269   : > { %v4903_v0 = vmul.f32 %v11294_v35, %v12552_v44  ;;  %v4916_v22 = vmul.f32 %v4914_v37, %v4904_v13 }
0x126b   : > { %v4915_v58 = vmul.f32 %v4914_v37, %v4903_v0  ;;  %v12631_v38 = vadd.f32 %v4926_v56, %v4916_v22 }
0x126c   : > { %v11296_v10 = vpop.eup %11295 }
0x126d   : > { %v12628_v41 = vadd.f32 %v4926_v56, %v4915_v58  ;;  %v4906_v40 = vmul.f32 %v11296_v10, %v12559_v55 }
0x126e   : > { %v11298_v49 = vpop.eup %11297 }
0x126f   : > { %10745 = vmatprep.mubr.msk.f32.mxu1 %vm465_vm1, %v12628_v41  ;;  %v4905_v18 = vmul.f32 %v11298_v49, %v12562_v9  ;;  %v4918_v44 = vmul.f32 %v4914_v37, %v4906_v40 }
0x1270   : > { %10746 = vmatmul.mubr.msk.f32.vlgmr.msra.gmra.mxu1 %vm465_vm1, %v12631_v38 }
0x1271   : > { %v4917_v50 = vmul.f32 %v4914_v37, %v4905_v18  ;;  %v12640_v63 = vadd.f32 %v4926_v56, %v4918_v44 }
0x1273   : > { %v12638_v61 = vadd.f32 %v4926_v56, %v4917_v50 }
0x1275   : > { %10748 = vmatprep.mubr.msk.f32.mxu1 %vm465_vm1, %v12638_v61 }
0x1276   : > { %10749 = vmatmul.mubr.msk.f32.gmra.mxu1 %vm465_vm1, %v12640_v63 }
0x129e   : > { %v4872_v55 = vpop.xlane.xlu1 %4871 }
0x129f   : > { %v4884_v1 = vmul.f32 0.03125, %v4872_v55 }
0x12a0   : > { %v4869_v54 = vpop.xlane.xlu0 %4868 }
0x12a1   : > { %v4892_v21 = vadd.f32 1e-05, %v4884_v1  ;;  %v4883_v9 = vmul.f32 0.03125, %v4869_v54 }
0x12a2   : > { %v4878_v4 = vpop.xlane.xlu1 %4877 }
0x12a3   : > { %11299 = vrsqrt.f32 %v4892_v21  ;;  %v4891_v62 = vadd.f32 1e-05, %v4883_v9  ;;  %v4886_v36 = vmul.f32 0.03125, %v4878_v4 }
0x12a4   : > { %v4875_v33 = vpop.xlane.xlu0 %4874 }
0x12a5   : > { %11301 = vrsqrt.f32 %v4891_v62  ;;  %v4894_v47 = vadd.f32 1e-05, %v4886_v36  ;;  %v4885_v57 = vmul.f32 0.03125, %v4875_v33 }
0x12a7   : > { %11303 = vrsqrt.f32 %v4894_v47  ;;  %v4893_v5 = vadd.f32 1e-05, %v4885_v57 }
0x12a9   : > { %11305 = vrsqrt.f32 %v4893_v5 }
0x12b0   : > { %v11300_v42 = vpop.eup %11299 }
0x12b1   : > { %v4908_v7 = vmul.f32 %v11300_v42, %v12598_v59 }
0x12b2   : > { %v11302_v51 = vpop.eup %11301 }
0x12b3   : > { %v4907_v16 = vmul.f32 %v11302_v51, %v12600_v14  ;;  %v4920_v24 = vmul.f32 %v4914_v37, %v4908_v7 }
0x12b4   : > { %v11304_v30 = vpop.eup %11303 }
0x12b5   : > { %v4919_v12 = vmul.f32 %v4914_v37, %v4907_v16  ;;  %v4910_v27 = vmul.f32 %v11304_v30, %v12604_v20  ;;  %v12652_v46 = vadd.f32 %v4926_v56, %v4920_v24  ;;  %v9700_v20 = vld [vmem:[%s13596_s5 + $0x8] sm:$0xff] }
0x12b6   : > { %v11306_v48 = vpop.eup %11305 }
0x12b7   : > { %v12649_v6 = vadd.f32 %v4926_v56, %v4919_v12  ;;  %v4909_v26 = vmul.f32 %v11306_v48, %v12609_v11  ;;  %v4922_v34 = vmul.f32 %v4914_v37, %v4910_v27  ;;  %v4986_v11 = vrot.slane %v9700_v20, %v463_v53 }
0x12b9   : > { %10751 = vmatprep.mubr.msk.f32.mxu1 %vm465_vm1, %v12649_v6  ;;  %v4921_v59 = vmul.f32 %v4914_v37, %v4909_v26  ;;  %v12660_v31 = vadd.f32 %v4926_v56, %v4922_v34 }
0x12ba   : > { %10752 = vmatmul.mubr.msk.f32.gmra.mxu1 %vm465_vm1, %v12652_v46 }
0x12bb   : > { %v12658_v14 = vadd.f32 %v4926_v56, %v4921_v59 }
0x12bd   : > { %10754 = vmatprep.mubr.msk.f32.mxu1 %vm465_vm1, %v12658_v14 }
0x12be   : > { %10755 = vmatmul.mubr.msk.f32.gmra.mxu1 %vm465_vm1, %v12660_v31 }
0x1330   : > { %v10747_v60 = vpop.f32.mrf.mxu1 }
0x1331   : > { %v12671_v15 = vadd.f32 %v10747_v60, %v4986_v11 }
0x1332   : > { %v5077_v25 = vpop.f32.mrf.mxu1 }
0x1333   : > { %v12673_v8 = vadd.f32 %v5077_v25, %v4986_v11  ;;  %5120 = vrot.lane.b32.xlu0 %v12671_v15, %s11501_s13 }
0x1335   : > { %5118 = vrot.lane.b32.xlu1 %v12673_v8, %s11501_s13  ;;  %10761 = vmatprep.mubr.msk.f32.mxu1 %vm278_vm0, %v12673_v8 }
0x1336   : > { %v10750_v37 = vpop.f32.mrf.mxu1 }
0x1337   : > { %v12681_v13 = vadd.f32 %v10750_v37, %v4986_v11 }
0x1338   : > { %v5087_v35 = vpop.f32.mrf.mxu1 }
0x1339   : > { %v12683_v53 = vadd.f32 %v5087_v35, %v4986_v11  ;;  %5209 = vrot.lane.b32.xlu1 %v12681_v13, %s11501_s13 }
0x133b   : > { %5207 = vrot.lane.b32.xlu0 %v12683_v53, %s11501_s13 }
0x137a   : > { %v10753_v0 = vpop.f32.mrf.mxu1 }
0x137b   : > { %v12689_v22 = vadd.f32 %v10753_v0, %v4986_v11 }
0x137c   : > { %v5097_v56 = vpop.f32.mrf.mxu1 }
0x137d   : > { %v12691_v58 = vadd.f32 %v5097_v56, %v4986_v11  ;;  %5298 = vrot.lane.b32.xlu1 %v12689_v22, %s11501_s13 }
0x137e   : > { %v10756_v10 = vpop.f32.mrf.mxu1 }
0x137f   : > { %v12695_v40 = vadd.f32 %v10756_v10, %v4986_v11  ;;  %5296 = vrot.lane.b32.xlu0 %v12691_v58, %s11501_s13  ;;  %10775 = vmatprep.mubr.msk.f32.mxu0 %vm278_vm0, %v12691_v58 }
0x1380   : > { %v5107_v49 = vpop.f32.mrf.mxu1 }
0x1381   : > { %v12701_v18 = vadd.f32 %v5107_v49, %v4986_v11  ;;  %5387 = vrot.lane.b32.xlu1 %v12695_v40, %s11501_s13 }
0x1383   : > { %5385 = vrot.lane.b32.xlu0 %v12701_v18, %s11501_s13 }
0x13a5   : > { %v5121_v44 = vpop.permute.xlu0 %5120 }
0x13a6   : > { %10757 = vmatprep.subr.msk.mxu1 %vm278_vm0, %v5121_v44 }
0x13a7   : > { %v5119_v50 = vpop.permute.xlu1 %5118  ;;  %10758 = vmatpush3.xpose.msk.msra.mxu1 %vm278_vm0, %v5121_v44 }
0x13a8   : > { %10759 = vmatprep.subr.msk.mxu1 %vm278_vm0, %v5119_v50 }
0x13ab   : > { %v5210_v55 = vpop.permute.xlu1 %5209  ;;  %10760 = vmatpush3.xpose.msk.msra.mxu1 %vm278_vm0, %v5119_v50 }
0x13ac   : > { %10764 = vmatprep.subr.msk.mxu1 %vm278_vm0, %v5210_v55 }
0x13ad   : > { %v5208_v1 = vpop.permute.xlu0 %5207 }
0x13ae   : > { %10762 = vmatmul.mubr.msk.f32.vlgmr.msra.gmra.mxu1 %vm278_vm0, %v12671_v15 }
0x13af   : > { %10765 = vmatpush3.xpose.msk.msra.mxu1 %vm278_vm0, %v5210_v55  ;;  %10768 = vmatprep.mubr.msk.f32.mxu1 %vm278_vm0, %v12683_v53 }
0x13b0   : > { %10766 = vmatprep.subr.msk.mxu1 %vm278_vm0, %v5208_v1 }
0x13b3   : > { %10767 = vmatpush3.xpose.msk.msra.mxu1 %vm278_vm0, %v5208_v1 }
0x13b6   : > { %10769 = vmatmul.mubr.msk.f32.vlgmr.msra.gmra.mxu1 %vm278_vm0, %v12681_v13 }
0x13b7   : > { %10782 = vmatprep.mubr.msk.f32.mxu1 %vm278_vm0, %v12701_v18 }
0x13ef   : > { %v5299_v54 = vpop.permute.xlu1 %5298 }
0x13f0   : > { %10771 = vmatprep.subr.msk.mxu0 %vm278_vm0, %v5299_v54 }
0x13f1   : > { %10772 = vmatpush3.xpose.msk.msra.mxu0 %vm278_vm0, %v5299_v54  ;;  %v5297_v21 = vpop.permute.xlu0 %5296 }
0x13f2   : > { %10773 = vmatprep.subr.msk.mxu0 %vm278_vm0, %v5297_v21 }
0x13f3   : > { %v5388_v9 = vpop.permute.xlu1 %5387 }
0x13f4   : > { %10778 = vmatprep.subr.msk.mxu1 %vm278_vm0, %v5388_v9 }
0x13f5   : > { %10774 = vmatpush3.xpose.msk.msra.mxu0 %vm278_vm0, %v5297_v21  ;;  %10779 = vmatpush3.xpose.msk.msra.mxu1 %vm278_vm0, %v5388_v9  ;;  %v5386_v4 = vpop.permute.xlu0 %5385 }
0x13f6   : > { %10780 = vmatprep.subr.msk.mxu1 %vm278_vm0, %v5386_v4 }
0x13f8   : > { %10776 = vmatmul.mubr.msk.f32.vlgmr.msra.gmra.mxu0 %vm278_vm0, %v12689_v22 }
0x13f9   : > { %10781 = vmatpush3.xpose.msk.msra.mxu1 %vm278_vm0, %v5386_v4 }
0x13fc   : > { %10783 = vmatmul.mubr.msk.f32.vlgmr.msra.gmra.mxu1 %vm278_vm0, %v12695_v40 }
0x146e   : > { %v10763_v62 = vpop.f32.mrf.mxu1 }
0x146f   : > { %v5475_v36 = vsel %vm951_vm2, %v10763_v62, -inf }
0x1470   : > { %5476 = vmax.xlane.f32.xlu0 %v5475_v36  ;;  %v5196_v33 = vpop.f32.mrf.mxu1 }
0x1471   : > { %v5472_v47 = vsel %vm951_vm2, %v5196_v33, -inf }
0x1472   : > { %5473 = vmax.xlane.f32.xlu1 %v5472_v47 }
0x1476   : > { %v10770_v57 = vpop.f32.mrf.mxu1 }
0x1477   : > { %v5481_v5 = vsel %vm951_vm2, %v10770_v57, -inf }
0x1478   : > { %5482 = vmax.xlane.f32.xlu0 %v5481_v5  ;;  %v5285_v42 = vpop.f32.mrf.mxu1 }
0x1479   : > { %v5478_v7 = vsel %vm951_vm2, %v5285_v42, -inf }
0x147c   : > { %5479 = vmax.xlane.f32.xlu0 %v5478_v7 }
0x14b8   : > { %v10777_v51 = vpop.f32.mrf.mxu0 }
0x14b9   : > { %v5487_v16 = vsel %vm951_vm2, %v10777_v51, -inf }
0x14ba   : > { %5488 = vmax.xlane.f32.xlu1 %v5487_v16  ;;  %v5374_v30 = vpop.f32.mrf.mxu0 }
0x14bb   : > { %v5484_v12 = vsel %vm951_vm2, %v5374_v30, -inf }
0x14bc   : > { %v12740_v24 = vpop.f32.mrf.mxu1 }
0x14bd   : > { %v5493_v26 = vsel %vm951_vm2, %v12740_v24, -inf }
0x14be   : > { %5485 = vmax.xlane.f32.xlu1 %v5484_v12  ;;  %v5463_v27 = vpop.f32.mrf.mxu1 }
0x14bf   : > { %v5490_v48 = vsel %vm951_vm2, %v5463_v27, -inf }
0x14c0   : > { %5491 = vmax.xlane.f32.xlu0 %v5490_v48 }
0x14c2   : > { %5494 = vmax.xlane.f32.xlu1 %v5493_v26 }
0x14f9   : > { %v5477_v34 = vpop.xlane.xlu0 %5476 }
0x14fa   : > { %v5497_v59 = vsub.f32 %v10763_v62, %v5477_v34 }
0x14fb   : > { %v5474_v20 = vpop.xlane.xlu1 %5473 }
0x14fc   : > { %v5506_v11 = vmul.f32 1.442695, %v5497_v59  ;;  %v5496_v60 = vsub.f32 %v5196_v33, %v5474_v20 }
0x14fe   : > { %11307 = vpow2.f32 %v5506_v11  ;;  %v5504_v25 = vmul.f32 1.442695, %v5496_v60 }
0x1500   : > { %11309 = vpow2.f32 %v5504_v25 }
0x1501   : > { %v5483_v37 = vpop.xlane.xlu0 %5482 }
0x1502   : > { %v5499_v35 = vsub.f32 %v10770_v57, %v5483_v37 }
0x1504   : > { %v5510_v10 = vmul.f32 1.442695, %v5499_v35 }
0x1505   : > { %v5480_v0 = vpop.xlane.xlu0 %5479 }
0x1506   : > { %v5498_v56 = vsub.f32 %v5285_v42, %v5480_v0 }
0x1508   : > { %v5508_v49 = vmul.f32 1.442695, %v5498_v56 }
0x150a   : > { %11311 = vpow2.f32 %v5508_v49 }
0x150b   : > { %v12746_v44 = vpop.eup %11307  ;;  %11313 = vpow2.f32 %v5510_v10 }
0x150c   : > { %v5523_v50 = vsel %vm951_vm2, %v12746_v44, 0.0 }
0x150d   : > { %v12750_v55 = vpop.eup %11309  ;;  %5524 = vadd.xlane.f32.xlu1 %v5523_v50 }
0x150e   : > { %v5520_v1 = vsel %vm951_vm2, %v12750_v55, 0.0 }
0x150f   : > { %5521 = vadd.xlane.f32.xlu0 %v5520_v1 }
0x1517   : > { %v12754_v54 = vpop.eup %11311 }
0x1518   : > { %v5526_v21 = vsel %vm951_vm2, %v12754_v54, 0.0  ;;  %v12758_v9 = vpop.eup %11313 }
0x1519   : > { %5527 = vadd.xlane.f32.xlu0 %v5526_v21  ;;  %v5529_v4 = vsel %vm951_vm2, %v12758_v9, 0.0 }
0x151d   : > { %5530 = vadd.xlane.f32.xlu0 %v5529_v4 }
0x151e   : > { %5560 = vrot.lane.b32.xlu1 %v12673_v8, %s11502_s14 }
0x1522   : > { %5649 = vrot.lane.b32.xlu1 %v12681_v13, %s11502_s14 }
0x1526   : > { %5647 = vrot.lane.b32.xlu1 %v12683_v53, %s11502_s14 }
0x152a   : > { %5823 = vrot.lane.b32.xlu1 %v12695_v40, %s11502_s14 }
0x152e   : > { %5821 = vrot.lane.b32.xlu1 %v12701_v18, %s11502_s14 }
0x1532   : > { %6005 = vrot.lane.b32.xlu1 %v12681_v13, %s11503_s15 }
0x1533   : > { %5562 = vrot.lane.b32.xlu0 %v12671_v15, %s11502_s14 }
0x1536   : > { %5910 = vrot.lane.b32.xlu1 %v12671_v15, %s11504_s16 }
0x1537   : > { %5736 = vrot.lane.b32.xlu0 %v12689_v22, %s11502_s14 }
0x153a   : > { %6096 = vrot.lane.b32.xlu1 %v12689_v22, %s11503_s15 }
0x153b   : > { %5734 = vrot.lane.b32.xlu0 %v12691_v58, %s11502_s14 }
0x153f   : > { %5914 = vrot.lane.b32.xlu0 %v12671_v15, %s11503_s15 }
0x1543   : > { %v5489_v62 = vpop.xlane.xlu1 %5488  ;;  %5912 = vrot.lane.b32.xlu0 %v12673_v8, %s11503_s15 }
0x1544   : > { %v5501_v36 = vsub.f32 %v10777_v51, %v5489_v62 }
0x1546   : > { %v5514_v47 = vmul.f32 1.442695, %v5501_v36 }
0x1547   : > { %v5486_v33 = vpop.xlane.xlu1 %5485  ;;  %5908 = vrot.lane.b32.xlu0 %v12673_v8, %s11504_s16 }
0x1548   : > { %v5500_v57 = vsub.f32 %v5374_v30, %v5486_v33  ;;  %11315 = vpow2.f32 %v5514_v47 }
0x1549   : > { %v5492_v16 = vpop.xlane.xlu0 %5491 }
0x154a   : > { %v5512_v42 = vmul.f32 1.442695, %v5500_v57  ;;  %v5502_v12 = vsub.f32 %v5463_v27, %v5492_v16 }
0x154b   : > { %v5495_v5 = vpop.xlane.xlu1 %5494  ;;  %6003 = vrot.lane.b32.xlu0 %v12683_v53, %s11503_s15 }
0x154c   : > { %v5503_v7 = vsub.f32 %v12740_v24, %v5495_v5  ;;  %11317 = vpow2.f32 %v5512_v42  ;;  %v5516_v26 = vmul.f32 1.442695, %v5502_v12 }
0x154e   : > { %v5518_v48 = vmul.f32 1.442695, %v5503_v7 }
0x1550   : > { %11319 = vpow2.f32 %v5518_v48 }
0x1551   : > { %11321 = vpow2.f32 %v5516_v26 }
0x1555   : > { %v12793_v51 = vpop.eup %11315 }
0x1556   : > { %v5535_v30 = vsel %vm951_vm2, %v12793_v51, 0.0 }
0x1559   : > { %v12797_v34 = vpop.eup %11317 }
0x155a   : > { %v5532_v59 = vsel %vm951_vm2, %v12797_v34, 0.0 }
0x155d   : > { %v12801_v20 = vpop.eup %11319 }
0x155e   : > { %5536 = vadd.xlane.f32.xlu1 %v5535_v30  ;;  %v5541_v24 = vsel %vm951_vm2, %v12801_v20, 0.0  ;;  %v12805_v27 = vpop.eup %11321 }
0x155f   : > { %v5538_v11 = vsel %vm951_vm2, %v12805_v27, 0.0 }
0x1562   : > { %5533 = vadd.xlane.f32.xlu1 %v5532_v59 }
0x1566   : > { %5542 = vadd.xlane.f32.xlu1 %v5541_v24 }
0x156a   : > { %5539 = vadd.xlane.f32.xlu0 %v5538_v11 }
0x1577   : > { %6001 = vrot.lane.b32.xlu1 %v12681_v13, %s11504_s16 }
0x157b   : > { %6187 = vrot.lane.b32.xlu1 %v12695_v40, %s11503_s15 }
0x157f   : > { %6092 = vrot.lane.b32.xlu1 %v12689_v22, %s11504_s16 }
0x1580   : > { %5999 = vrot.lane.b32.xlu0 %v12683_v53, %s11504_s16 }
0x1583   : > { %6181 = vrot.lane.b32.xlu1 %v12701_v18, %s11504_s16 }
0x1584   : > { %6094 = vrot.lane.b32.xlu0 %v12691_v58, %s11503_s15 }
0x1588   : > { %6090 = vrot.lane.b32.xlu0 %v12691_v58, %s11504_s16 }
0x158c   : > { %6185 = vrot.lane.b32.xlu0 %v12701_v18, %s11503_s15 }
0x1590   : > { %6183 = vrot.lane.b32.xlu0 %v12695_v40, %s11504_s16 }
0x1596   : > { %v5525_v60 = vpop.xlane.xlu1 %5524 }
0x1598   : > { %v5522_v25 = vpop.xlane.xlu0 %5521 }
0x1599   : > { %11323 = vrcp.f32 %v5522_v25 }
0x159a   : > { %v5561_v37 = vpop.permute.xlu1 %5560  ;;  %11325 = vrcp.f32 %v5525_v60 }
0x159e   : > { %v5650_v35 = vpop.permute.xlu1 %5649 }
0x15a2   : > { %v5528_v0 = vpop.xlane.xlu0 %5527  ;;  %v5648_v50 = vpop.permute.xlu1 %5647 }
0x15a3   : > { %11327 = vrcp.f32 %v5528_v0 }
0x15a6   : > { %v11324_v56 = vpop.eup %11323  ;;  %v5531_v10 = vpop.xlane.xlu0 %5530 }
0x15a7   : > { %11329 = vrcp.f32 %v5531_v10  ;;  %v5552_v49 = vmul.f32 %v11324_v56, %v12750_v55  ;;  %v11326_v1 = vpop.eup %11325  ;;  %v5824_v62 = vpop.permute.xlu1 %5823 }
0x15a8   : > { %v5553_v4 = vmul.f32 %v11326_v1, %v12746_v44 }
0x15a9   : > { %10789 = vmatprep.mubr.msk.f32.mxu0 %vm951_vm2, %v5552_v49 }
0x15aa   : > { %v5563_v21 = vpop.permute.xlu0 %5562 }
0x15ab   : > { %10785 = vmatprep.subr.mxu0 %v5563_v21  ;;  %v5822_v44 = vpop.permute.xlu1 %5821 }
0x15ac   : > { %10786 = vmatpush3.msra.mxu0 %v5563_v21 }
0x15ad   : > { %10787 = vmatprep.subr.mxu0 %v5561_v37 }
0x15ae   : > { %10788 = vmatpush3.msra.mxu0 %v5561_v37  ;;  %v5737_v36 = vpop.permute.xlu0 %5736 }
0x15af   : > { %10790 = vmatmul.mubr.msk.f32.vlgmr.msra.gmra.mxu0 %vm951_vm2, %v5553_v4  ;;  %10792 = vmatprep.subr.mxu0 %v5650_v35  ;;  %v6006_v7 = vpop.permute.xlu1 %6005 }
0x15b0   : > { %v11328_v33 = vpop.eup %11327  ;;  %10799 = vmatprep.subr.mxu1 %v5737_v36  ;;  %10793 = vmatpush3.msra.mxu0 %v5650_v35 }
0x15b1   : > { %10800 = vmatpush3.msra.mxu1 %v5737_v36  ;;  %10794 = vmatprep.subr.mxu0 %v5648_v50  ;;  %v5554_v55 = vmul.f32 %v11328_v33, %v12754_v54 }
0x15b2   : > { %10795 = vmatpush3.msra.mxu0 %v5648_v50  ;;  %v5735_v47 = vpop.permute.xlu0 %5734 }
0x15b3   : > { %10796 = vmatprep.mubr.msk.f32.mxu0 %vm951_vm2, %v5554_v55  ;;  %10801 = vmatprep.subr.mxu1 %v5735_v47  ;;  %v5911_v54 = vpop.permute.xlu1 %5910 }
0x15b4   : > { %v11330_v57 = vpop.eup %11329  ;;  %10806 = vmatprep.subr.mxu0 %v5824_v62  ;;  %10802 = vmatpush3.msra.mxu1 %v5735_v47 }
0x15b5   : > { %v5555_v5 = vmul.f32 %v11330_v57, %v12758_v9 }
0x15b6   : > { %v5915_v42 = vpop.permute.xlu0 %5914 }
0x15b7   : > { %10797 = vmatmul.mubr.msk.f32.vlgmr.msra.gmra.mxu0 %vm951_vm2, %v5555_v5  ;;  %10813 = vmatprep.subr.msk.mxu1 %vm278_vm0, %v5915_v42  ;;  %v6097_v16 = vpop.permute.xlu1 %6096 }
0x15b8   : > { %10807 = vmatpush3.msra.mxu0 %v5824_v62 }
0x15b9   : > { %10808 = vmatprep.subr.mxu0 %v5822_v44 }
0x15ba   : > { %10809 = vmatpush3.msra.mxu0 %v5822_v44  ;;  %v5913_v12 = vpop.permute.xlu0 %5912 }
0x15bb   : > { %10820 = vmatprep.subr.msk.mxu0 %vm278_vm0, %v6006_v7 }
0x15be   : > { %v5909_v26 = vpop.permute.xlu0 %5908 }
0x15c2   : > { %v6004_v9 = vpop.permute.xlu0 %6003 }
0x15e7   : > { %v5537_v48 = vpop.xlane.xlu1 %5536 }
0x15e8   : > { %11331 = vrcp.f32 %v5537_v48 }
0x15eb   : > { %v5534_v30 = vpop.xlane.xlu1 %5533 }
0x15ec   : > { %11333 = vrcp.f32 %v5534_v30 }
0x15ef   : > { %v5543_v59 = vpop.xlane.xlu1 %5542 }
0x15f0   : > { %11335 = vrcp.f32 %v5543_v59 }
0x15f3   : > { %v5540_v24 = vpop.xlane.xlu0 %5539  ;;  %v6002_v35 = vpop.permute.xlu1 %6001 }
0x15f4   : > { %11337 = vrcp.f32 %v5540_v24 }
0x15f5   : > { %v11332_v11 = vpop.eup %11331 }
0x15f6   : > { %v5557_v0 = vmul.f32 %v11332_v11, %v12793_v51 }
0x15f7   : > { %v6000_v25 = vpop.permute.xlu0 %5999  ;;  %v6188_v50 = vpop.permute.xlu1 %6187 }
0x15f9   : > { %v11334_v60 = vpop.eup %11333 }
0x15fa   : > { %v5556_v37 = vmul.f32 %v11334_v60, %v12797_v34 }
0x15fb   : > { %v6095_v10 = vpop.permute.xlu0 %6094  ;;  %v6093_v21 = vpop.permute.xlu1 %6092 }
0x15fc   : > { %10803 = vmatprep.mubr.msk.f32.mxu1 %vm951_vm2, %v5556_v37 }
0x15fd   : > { %10804 = vmatmul.mubr.msk.f32.vlgmr.msra.gmra.mxu1 %vm951_vm2, %v5557_v0  ;;  %v11336_v56 = vpop.eup %11335 }
0x15fe   : > { %10814 = vmatpush3.xpose.msk.msra.mxu1 %vm278_vm0, %v5915_v42  ;;  %10817 = vmatprep.mubr.msk.f32.mxu1 %vm278_vm0, %v5909_v26  ;;  %v5559_v51 = vmul.f32 %v11336_v56, %v12801_v20 }
0x15ff   : > { %10815 = vmatprep.subr.msk.mxu1 %vm278_vm0, %v5913_v12  ;;  %v6091_v1 = vpop.permute.xlu0 %6090  ;;  %v6182_v20 = vpop.permute.xlu1 %6181 }
0x1601   : > { %v11338_v49 = vpop.eup %11337 }
0x1602   : > { %10816 = vmatpush3.xpose.msk.msra.mxu1 %vm278_vm0, %v5913_v12  ;;  %v5558_v34 = vmul.f32 %v11338_v49, %v12805_v27 }
0x1603   : > { %10827 = vmatprep.subr.msk.mxu1 %vm278_vm0, %v6097_v16  ;;  %v6186_v27 = vpop.permute.xlu0 %6185 }
0x1604   : > { %10810 = vmatprep.mubr.msk.f32.mxu0 %vm951_vm2, %v5558_v34 }
0x1605   : > { %10818 = vmatmul.mubr.msk.f32.vlgmr.msra.gmra.mxu1 %vm278_vm0, %v5911_v54  ;;  %10811 = vmatmul.mubr.msk.f32.vlgmr.msra.gmra.mxu0 %vm951_vm2, %v5559_v51 }
0x1606   : > { %10821 = vmatpush3.xpose.msk.msra.mxu0 %vm278_vm0, %v6006_v7  ;;  %10828 = vmatpush3.xpose.msk.msra.mxu1 %vm278_vm0, %v6097_v16 }
0x1607   : > { %10831 = vmatprep.mubr.msk.f32.mxu1 %vm278_vm0, %v6091_v1  ;;  %10822 = vmatprep.subr.msk.mxu0 %vm278_vm0, %v6004_v9  ;;  %v6184_v4 = vpop.permute.xlu0 %6183 }
0x1608   : > { %10824 = vmatprep.mubr.msk.f32.mxu0 %vm278_vm0, %v6000_v25  ;;  %10829 = vmatprep.subr.msk.mxu1 %vm278_vm0, %v6095_v10 }
0x160a   : > { %10823 = vmatpush3.xpose.msk.msra.mxu0 %vm278_vm0, %v6004_v9  ;;  %10830 = vmatpush3.xpose.msk.msra.mxu1 %vm278_vm0, %v6095_v10 }
0x160b   : > { %10834 = vmatprep.subr.msk.mxu0 %vm278_vm0, %v6188_v50 }
0x160d   : > { %10825 = vmatmul.mubr.msk.f32.vlgmr.msra.gmra.mxu0 %vm278_vm0, %v6002_v35  ;;  %10832 = vmatmul.mubr.msk.f32.vlgmr.msra.gmra.mxu1 %vm278_vm0, %v6093_v21 }
0x160e   : > { %10835 = vmatpush3.xpose.msk.msra.mxu0 %vm278_vm0, %v6188_v50  ;;  %10838 = vmatprep.mubr.msk.f32.mxu0 %vm278_vm0, %v6182_v20 }
0x160f   : > { %10836 = vmatprep.subr.msk.mxu0 %vm278_vm0, %v6186_v27 }
0x1612   : > { %10837 = vmatpush3.xpose.msk.msra.mxu0 %vm278_vm0, %v6186_v27 }
0x1615   : > { %10839 = vmatmul.mubr.msk.f32.vlgmr.msra.gmra.mxu0 %vm278_vm0, %v6184_v4 }
0x166f   : > { %v12867_v62 = vpop.f32.mrf.mxu0 }
0x1671   : > { %v12869_v36 = vpop.f32.mrf.mxu0 }
0x1677   : > { %v12873_v55 = vpop.f32.mrf.mxu0 }
0x1679   : > { %v12877_v57 = vpop.f32.mrf.mxu0 }
0x16bd   : > { %v12871_v33 = vpop.f32.mrf.mxu1 }
0x16bf   : > { %v12875_v47 = vpop.f32.mrf.mxu1 }
0x16c5   : > { %v10819_v44 = vpop.f32.mrf.mxu1  ;;  %v12880_v42 = vpop.f32.mrf.mxu0 }
0x16c6   : > { %v6275_v5 = vsel %vm951_vm2, %v10819_v44, -inf }
0x16c7   : > { %6276 = vmax.xlane.f32.xlu0 %v6275_v5  ;;  %v5990_v7 = vpop.f32.mrf.mxu1  ;;  %v12883_v16 = vpop.f32.mrf.mxu0 }
0x16c8   : > { %v6272_v54 = vsel %vm951_vm2, %v5990_v7, -inf }
0x16c9   : > { %6273 = vmax.xlane.f32.xlu1 %v6272_v54 }
0x16cd   : > { %v10826_v12 = vpop.f32.mrf.mxu0  ;;  %v10833_v48 = vpop.f32.mrf.mxu1 }
0x16ce   : > { %v6281_v26 = vsel %vm951_vm2, %v10826_v12, -inf  ;;  %v6287_v24 = vsel %vm951_vm2, %v10833_v48, -inf }
0x16cf   : > { %6282 = vmax.xlane.f32.xlu1 %v6281_v26  ;;  %v6081_v30 = vpop.f32.mrf.mxu0  ;;  %v6172_v59 = vpop.f32.mrf.mxu1 }
0x16d0   : > { %v6278_v9 = vsel %vm951_vm2, %v6081_v30, -inf  ;;  %v6284_v11 = vsel %vm951_vm2, %v6172_v59, -inf }
0x16d1   : > { %6279 = vmax.xlane.f32.xlu0 %v6278_v9 }
0x16d3   : > { %6288 = vmax.xlane.f32.xlu1 %v6287_v24 }
0x16d5   : > { %6285 = vmax.xlane.f32.xlu0 %v6284_v11  ;;  %v10840_v60 = vpop.f32.mrf.mxu0 }
0x16d6   : > { %v6293_v25 = vsel %vm951_vm2, %v10840_v60, -inf }
0x16d7   : > { %6294 = vmax.xlane.f32.xlu1 %v6293_v25  ;;  %v6263_v37 = vpop.f32.mrf.mxu0 }
0x16d8   : > { %v6290_v35 = vsel %vm951_vm2, %v6263_v37, -inf }
0x16d9   : > { %6291 = vmax.xlane.f32.xlu0 %v6290_v35 }
0x16e8   : > { %6360 = vrot.lane.b32.xlu1 %v12673_v8, %s11505_s17 }
0x16ec   : > { %6449 = vrot.lane.b32.xlu1 %v12681_v13, %s11505_s17 }
0x16ef   : > { %6362 = vrot.lane.b32.xlu0 %v12671_v15, %s11505_s17 }
0x16f0   : > { %6536 = vrot.lane.b32.xlu1 %v12689_v22, %s11505_s17 }
0x16f3   : > { %6447 = vrot.lane.b32.xlu0 %v12683_v53, %s11505_s17 }
0x16f7   : > { %6534 = vrot.lane.b32.xlu0 %v12691_v58, %s11505_s17 }
0x1750   : > { %v6277_v0 = vpop.xlane.xlu0 %6276 }
0x1751   : > { %v6297_v56 = vsub.f32 %v10819_v44, %v6277_v0 }
0x1752   : > { %v6274_v10 = vpop.xlane.xlu1 %6273 }
0x1753   : > { %v6306_v49 = vmul.f32 1.442695, %v6297_v56  ;;  %v6296_v50 = vsub.f32 %v5990_v7, %v6274_v10 }
0x1755   : > { %11339 = vpow2.f32 %v6306_v49  ;;  %v6304_v34 = vmul.f32 1.442695, %v6296_v50 }
0x1757   : > { %11341 = vpow2.f32 %v6304_v34 }
0x1758   : > { %v6283_v51 = vpop.xlane.xlu1 %6282 }
0x1759   : > { %v6299_v1 = vsub.f32 %v10826_v12, %v6283_v51 }
0x175a   : > { %v6280_v21 = vpop.xlane.xlu0 %6279 }
0x175b   : > { %v6310_v20 = vmul.f32 1.442695, %v6299_v1  ;;  %v6298_v27 = vsub.f32 %v6081_v30, %v6280_v21 }
0x175c   : > { %v6289_v4 = vpop.xlane.xlu1 %6288 }
0x175d   : > { %11343 = vpow2.f32 %v6310_v20  ;;  %v6308_v5 = vmul.f32 1.442695, %v6298_v27  ;;  %v6301_v54 = vsub.f32 %v10833_v48, %v6289_v4 }
0x175e   : > { %v6286_v26 = vpop.xlane.xlu0 %6285 }
0x175f   : > { %11345 = vpow2.f32 %v6308_v5  ;;  %v6314_v9 = vmul.f32 1.442695, %v6301_v54  ;;  %v6300_v24 = vsub.f32 %v6172_v59, %v6286_v26 }
0x1760   : > { %v6295_v44 = vpop.xlane.xlu1 %6294 }
0x1761   : > { %11347 = vpow2.f32 %v6314_v9  ;;  %v6312_v11 = vmul.f32 1.442695, %v6300_v24  ;;  %v6303_v7 = vsub.f32 %v10840_v60, %v6295_v44  ;;  %v11126_v44 = vpack.i.bf16 %v12591_v45, %v12588_v29 }
0x1762   : > { %v12903_v25 = vpop.eup %11339  ;;  %v6292_v35 = vpop.xlane.xlu0 %6291 }
0x1763   : > { %11349 = vpow2.f32 %v6312_v11  ;;  %v6318_v12 = vmul.f32 1.442695, %v6303_v7  ;;  %v6302_v0 = vsub.f32 %v6263_v37, %v6292_v35  ;;  %v6323_v30 = vsel %vm951_vm2, %v12903_v25, 0.0 }
0x1764   : > { %v12907_v56 = vpop.eup %11341  ;;  %v6361_v48 = vpop.permute.xlu1 %6360  ;;  %6324 = vadd.xlane.f32.xlu1 %v6323_v30 }
0x1765   : > { %11351 = vpow2.f32 %v6318_v12  ;;  %v6316_v10 = vmul.f32 1.442695, %v6302_v0  ;;  %v6320_v59 = vsel %vm951_vm2, %v12907_v56, 0.0 }
0x1766   : > { %6321 = vadd.xlane.f32.xlu0 %v6320_v59  ;;  %v6363_v60 = vpop.permute.xlu0 %6362 }
0x1767   : > { %11353 = vpow2.f32 %v6316_v10  ;;  %10841 = vmatprep.subr.mxu1 %v6363_v60 }
0x1768   : > { %v6450_v49 = vpop.permute.xlu1 %6449  ;;  %10842 = vmatpush3.msra.mxu1 %v6363_v60 }
0x1769   : > { %10843 = vmatprep.subr.mxu1 %v6361_v48  ;;  %10848 = vmatprep.subr.mxu0 %v6450_v49 }
0x176a   : > { %v12911_v37 = vpop.eup %11343  ;;  %10844 = vmatpush3.msra.mxu1 %v6361_v48  ;;  %10849 = vmatpush3.msra.mxu0 %v6450_v49  ;;  %v6448_v50 = vpop.permute.xlu0 %6447 }
0x176b   : > { %10850 = vmatprep.subr.mxu0 %v6448_v50  ;;  %v6329_v34 = vsel %vm951_vm2, %v12911_v37, 0.0 }
0x176c   : > { %v12915_v51 = vpop.eup %11345  ;;  %v6537_v1 = vpop.permute.xlu1 %6536  ;;  %6330 = vadd.xlane.f32.xlu1 %v6329_v34  ;;  %10851 = vmatpush3.msra.mxu0 %v6448_v50 }
0x176d   : > { %10855 = vmatprep.subr.mxu1 %v6537_v1  ;;  %v6326_v21 = vsel %vm951_vm2, %v12915_v51, 0.0 }
0x176e   : > { %v12919_v20 = vpop.eup %11347  ;;  %6327 = vadd.xlane.f32.xlu0 %v6326_v21  ;;  %v6535_v29 = vpop.permute.xlu0 %6534 }
0x176f   : > { %v6335_v27 = vsel %vm951_vm2, %v12919_v20, 0.0 }
0x1770   : > { %v12923_v4 = vpop.eup %11349  ;;  %6336 = vadd.xlane.f32.xlu1 %v6335_v27 }
0x1771   : > { %v6332_v5 = vsel %vm951_vm2, %v12923_v4, 0.0 }
0x1772   : > { %v12927_v54 = vpop.eup %11351  ;;  %6333 = vadd.xlane.f32.xlu0 %v6332_v5 }
0x1773   : > { %v6341_v26 = vsel %vm951_vm2, %v12927_v54, 0.0 }
0x1774   : > { %v12931_v9 = vpop.eup %11353  ;;  %6342 = vadd.xlane.f32.xlu1 %v6341_v26 }
0x1775   : > { %v6338_v24 = vsel %vm951_vm2, %v12931_v9, 0.0 }
0x1776   : > { %6339 = vadd.xlane.f32.xlu0 %v6338_v24 }
0x1785   : > { %6623 = vrot.lane.b32.xlu1 %v12695_v40, %s11505_s17 }
0x1789   : > { %11127 = vrot.lane.b32.xlu1 %v11126_v44, %s11508_s20 }
0x178c   : > { %6621 = vrot.lane.b32.xlu0 %v12701_v18, %s11505_s17 }
0x178d   : > { %6978 = vrot.lane.b32.xlu1 %v12673_v8, %s11506_s18 }
0x1790   : > { %6980 = vrot.lane.b32.xlu0 %v12671_v15, %s11506_s18 }
0x1791   : > { %6974 = vrot.lane.b32.xlu1 %v12673_v8, %s11507_s19 }
0x1794   : > { %7071 = vrot.lane.b32.xlu0 %v12681_v13, %s11506_s18 }
0x1795   : > { %7069 = vrot.lane.b32.xlu1 %v12683_v53, %s11506_s18 }
0x1798   : > { %6976 = vrot.lane.b32.xlu0 %v12671_v15, %s11507_s19 }
0x1799   : > { %7065 = vrot.lane.b32.xlu1 %v12683_v53, %s11507_s19 }
0x179c   : > { %7162 = vrot.lane.b32.xlu0 %v12689_v22, %s11506_s18 }
0x179d   : > { %7160 = vrot.lane.b32.xlu1 %v12691_v58, %s11506_s18 }
0x17a0   : > { %7067 = vrot.lane.b32.xlu0 %v12681_v13, %s11507_s19 }
0x17a1   : > { %7156 = vrot.lane.b32.xlu1 %v12691_v58, %s11507_s19 }
0x17a4   : > { %7253 = vrot.lane.b32.xlu0 %v12695_v40, %s11506_s18 }
0x17a5   : > { %7251 = vrot.lane.b32.xlu1 %v12701_v18, %s11506_s18 }
0x17a8   : > { %7158 = vrot.lane.b32.xlu0 %v12689_v22, %s11507_s19 }
0x17a9   : > { %7249 = vrot.lane.b32.xlu1 %v12695_v40, %s11507_s19 }
0x17ac   : > { %7247 = vrot.lane.b32.xlu0 %v12701_v18, %s11507_s19 }
0x17ed   : > { %v6325_v45 = vpop.xlane.xlu1 %6324 }
0x17ee   : > { %11355 = vrcp.f32 %v6325_v45 }
0x17ef   : > { %v6322_v11 = vpop.xlane.xlu0 %6321 }
0x17f0   : > { %11357 = vrcp.f32 %v6322_v11 }
0x17f5   : > { %v6331_v7 = vpop.xlane.xlu1 %6330 }
0x17f6   : > { %11359 = vrcp.f32 %v6331_v7 }
0x17f7   : > { %v6328_v35 = vpop.xlane.xlu0 %6327 }
0x17f8   : > { %11361 = vrcp.f32 %v6328_v35 }
0x17f9   : > { %v6337_v12 = vpop.xlane.xlu1 %6336 }
0x17fa   : > { %11363 = vrcp.f32 %v6337_v12 }
0x17fb   : > { %v6334_v0 = vpop.xlane.xlu0 %6333  ;;  %v11356_v30 = vpop.eup %11355 }
0x17fc   : > { %11365 = vrcp.f32 %v6334_v0  ;;  %v6353_v49 = vmul.f32 %v11356_v30, %v12903_v25 }
0x17fd   : > { %v11358_v48 = vpop.eup %11357  ;;  %v6343_v10 = vpop.xlane.xlu1 %6342 }
0x17fe   : > { %v6352_v59 = vmul.f32 %v11358_v48, %v12907_v56  ;;  %11367 = vrcp.f32 %v6343_v10 }
0x17ff   : > { %v6340_v60 = vpop.xlane.xlu0 %6339 }
0x1800   : > { %11369 = vrcp.f32 %v6340_v60  ;;  %10845 = vmatprep.mubr.msk.f32.mxu1 %vm951_vm2, %v6352_v59 }
0x1801   : > { %v6624_v50 = vpop.permute.xlu1 %6623  ;;  %10846 = vmatmul.mubr.msk.f32.vlgmr.msra.gmra.mxu1 %vm951_vm2, %v6353_v49 }
0x1802   : > { %10856 = vmatpush3.msra.mxu1 %v6537_v1  ;;  %10862 = vmatprep.subr.mxu0 %v6624_v50 }
0x1803   : > { %10857 = vmatprep.subr.mxu1 %v6535_v29  ;;  %v6622_v34 = vpop.permute.xlu0 %6621  ;;  %v11360_v21 = vpop.eup %11359 }
0x1804   : > { %10858 = vmatpush3.msra.mxu1 %v6535_v29  ;;  %v6355_v25 = vmul.f32 %v11360_v21, %v12911_v37 }
0x1805   : > { %v11362_v27 = vpop.eup %11361  ;;  %v11128_v5 = vpop.permute.xlu1 %11127 }
0x1806   : > { %v11129_v26 = vunpack.i.l.bf16 %v11128_v5  ;;  %v6354_v56 = vmul.f32 %v11362_v27, %v12915_v51  ;;  %v11130_v1 = vunpack.i.h.bf16 %v11128_v5 }
0x1807   : > { %v12979_v24 = vpop.permute.xlu0 %6980  ;;  %v11364_v44 = vpop.eup %11363 }
0x1808   : > { %10852 = vmatprep.mubr.msk.f32.mxu0 %vm951_vm2, %v6354_v56  ;;  %10869 = vmatprep.subr.mxu1 %v11129_v26  ;;  %v6357_v51 = vmul.f32 %v11364_v44, %v12919_v20 }
0x1809   : > { %v11366_v45 = vpop.eup %11365  ;;  %v6979_v11 = vpop.permute.xlu1 %6978  ;;  %10853 = vmatmul.mubr.msk.f32.vlgmr.msra.gmra.mxu0 %vm951_vm2, %v6355_v25 }
0x180a   : > { %10863 = vmatpush3.msra.mxu0 %v6624_v50  ;;  %v6356_v29 = vmul.f32 %v11366_v45, %v12923_v4 }
0x180b   : > { %10864 = vmatprep.subr.mxu0 %v6622_v34  ;;  %v7072_v7 = vpop.permute.xlu0 %7071  ;;  %v11368_v35 = vpop.eup %11367 }
0x180c   : > { %10865 = vmatpush3.msra.mxu0 %v6622_v34  ;;  %10859 = vmatprep.mubr.msk.f32.mxu1 %vm951_vm2, %v6356_v29  ;;  %v6359_v30 = vmul.f32 %v11368_v35, %v12927_v54 }
0x180d   : > { %v11370_v37 = vpop.eup %11369  ;;  %v12987_v12 = vpop.permute.xlu1 %6974  ;;  %10860 = vmatmul.mubr.msk.f32.vlgmr.msra.gmra.mxu1 %vm951_vm2, %v6357_v51  ;;  %10883 = vmatprep.subr.mxu0 %v11130_v1 }
0x180e   : > { %10870 = vmatpush3.msra.mxu1 %v11129_v26  ;;  %v6358_v0 = vmul.f32 %v11370_v37, %v12931_v9 }
0x180f   : > { %10897 = vmatprep.subr.msk.mxu1 %vm278_vm0, %v12979_v24  ;;  %v6977_v4 = vpop.permute.xlu0 %6976 }
0x1810   : > { %10866 = vmatprep.mubr.msk.f32.mxu0 %vm951_vm2, %v6358_v0 }
0x1811   : > { %v7070_v20 = vpop.permute.xlu1 %7069  ;;  %10867 = vmatmul.mubr.msk.f32.vlgmr.msra.gmra.mxu0 %vm951_vm2, %v6359_v30 }
0x1812   : > { %10884 = vmatpush3.msra.mxu0 %v11130_v1  ;;  %10885 = vmatprep.mubr.msk.f32.mxu0 %vm278_vm0, %v12869_v36 }
0x1813   : > { %10904 = vmatprep.subr.msk.mxu0 %vm278_vm0, %v7072_v7  ;;  %v7163_v48 = vpop.permute.xlu0 %7162 }
0x1815   : > { %v7066_v10 = vpop.permute.xlu1 %7065  ;;  %10886 = vmatmul.mubr.msk.f32.vlgmr.msra.gmra.mxu0 %vm278_vm0, %v12867_v62 }
0x1816   : > { %10905 = vmatpush3.xpose.msk.msra.mxu0 %vm278_vm0, %v7072_v7  ;;  %10888 = vmatprep.mubr.msk.f32.mxu0 %vm278_vm0, %v12877_v57 }
0x1817   : > { %10906 = vmatprep.subr.msk.mxu0 %vm278_vm0, %v7070_v20  ;;  %v7068_v54 = vpop.permute.xlu0 %7067 }
0x1819   : > { %10889 = vmatmul.mubr.msk.f32.gmra.mxu0 %vm278_vm0, %v12873_v55  ;;  %v7161_v9 = vpop.permute.xlu1 %7160 }
0x181a   : > { %10907 = vmatpush3.xpose.msk.msra.mxu0 %vm278_vm0, %v7070_v20  ;;  %10891 = vmatprep.mubr.msk.f32.mxu0 %vm278_vm0, %v12875_v47 }
0x181b   : > { %v7254_v36 = vpop.permute.xlu0 %7253 }
0x181c   : > { %10918 = vmatprep.subr.msk.mxu0 %vm278_vm0, %v7254_v36 }
0x181d   : > { %10892 = vmatmul.mubr.msk.f32.gmra.mxu0 %vm278_vm0, %v12871_v33  ;;  %v7157_v57 = vpop.permute.xlu1 %7156 }
0x181e   : > { %10894 = vmatprep.mubr.msk.f32.mxu0 %vm278_vm0, %v12883_v16 }
0x181f   : > { %v7159_v62 = vpop.permute.xlu0 %7158 }
0x1821   : > { %10895 = vmatmul.mubr.msk.f32.gmra.mxu0 %vm278_vm0, %v12880_v42  ;;  %v7252_v47 = vpop.permute.xlu1 %7251 }
0x1822   : > { %10908 = vmatprep.mubr.msk.f32.mxu0 %vm278_vm0, %v7066_v10 }
0x1823   : > { %v7248_v55 = vpop.permute.xlu0 %7247 }
0x1825   : > { %10909 = vmatmul.mubr.msk.f32.vlgmr.msra.gmra.mxu0 %vm278_vm0, %v7068_v54  ;;  %v7250_v33 = vpop.permute.xlu1 %7249 }
0x1826   : > { %10919 = vmatpush3.xpose.msk.msra.mxu0 %vm278_vm0, %v7254_v36  ;;  %10922 = vmatprep.mubr.msk.f32.mxu0 %vm278_vm0, %v7248_v55 }
0x1827   : > { %10920 = vmatprep.subr.msk.mxu0 %vm278_vm0, %v7252_v47 }
0x182a   : > { %10921 = vmatpush3.xpose.msk.msra.mxu0 %vm278_vm0, %v7252_v47 }
0x182d   : > { %10923 = vmatmul.mubr.msk.f32.vlgmr.msra.gmra.mxu0 %vm278_vm0, %v7250_v33 }
0x18c1   : > { %v10847_v16 = vpop.f32.mrf.mxu1 }
0x18c3   : > { %v6438_v59 = vpop.f32.mrf.mxu1 }
0x18c4   : > { %10871 = vmatprep.mubr.msk.f32.mxu1 %vm278_vm0, %v6438_v59 }
0x18c5   : > { %10872 = vmatmul.mubr.msk.f32.vlgmr.msra.gmra.mxu1 %vm278_vm0, %v10847_v16 }
0x18c6   : > { %10898 = vmatpush3.xpose.msk.msra.mxu1 %vm278_vm0, %v12979_v24 }
0x18c7   : > { %10899 = vmatprep.subr.msk.mxu1 %vm278_vm0, %v6979_v11 }
0x18c9   : > { %v10854_v42 = vpop.f32.mrf.mxu0 }
0x18ca   : > { %10900 = vmatpush3.xpose.msk.msra.mxu1 %vm278_vm0, %v6979_v11 }
0x18cb   : > { %10911 = vmatprep.subr.msk.mxu1 %vm278_vm0, %v7163_v48  ;;  %v6525_v60 = vpop.f32.mrf.mxu0 }
0x18cc   : > { %10874 = vmatprep.mubr.msk.f32.mxu1 %vm278_vm0, %v6525_v60 }
0x18cd   : > { %v10861_v49 = vpop.f32.mrf.mxu1  ;;  %10875 = vmatmul.mubr.msk.f32.gmra.mxu1 %vm278_vm0, %v10854_v42 }
0x18cf   : > { %v6612_v50 = vpop.f32.mrf.mxu1 }
0x18d0   : > { %10877 = vmatprep.mubr.msk.f32.mxu1 %vm278_vm0, %v6612_v50 }
0x18d1   : > { %v10868_v34 = vpop.f32.mrf.mxu0  ;;  %10878 = vmatmul.mubr.msk.f32.gmra.mxu1 %vm278_vm0, %v10861_v49 }
0x18d3   : > { %v6699_v21 = vpop.f32.mrf.mxu0 }
0x18d4   : > { %10880 = vmatprep.mubr.msk.f32.mxu1 %vm278_vm0, %v6699_v21 }
0x18d5   : > { %10881 = vmatmul.mubr.msk.f32.gmra.mxu1 %vm278_vm0, %v10868_v34  ;;  %v13037_v27 = vpop.f32.mrf.mxu0 }
0x18d6   : > { %10901 = vmatprep.mubr.msk.f32.mxu1 %vm278_vm0, %v12987_v12 }
0x18d7   : > { %v13041_v5 = vpop.f32.mrf.mxu0 }
0x18d9   : > { %v13043_v26 = vpop.f32.mrf.mxu0  ;;  %10902 = vmatmul.mubr.msk.f32.vlgmr.msra.gmra.mxu1 %vm278_vm0, %v6977_v4 }
0x18da   : > { %10912 = vmatpush3.xpose.msk.msra.mxu1 %vm278_vm0, %v7163_v48  ;;  %10915 = vmatprep.mubr.msk.f32.mxu1 %vm278_vm0, %v7157_v57 }
0x18db   : > { %10913 = vmatprep.subr.msk.mxu1 %vm278_vm0, %v7161_v9  ;;  %v13049_v56 = vpop.f32.mrf.mxu0 }
0x18dd   : > { %v13051_v24 = vpop.f32.mrf.mxu0 }
0x18de   : > { %10914 = vmatpush3.xpose.msk.msra.mxu1 %vm278_vm0, %v7161_v9 }
0x18df   : > { %v13054_v25 = vpop.f32.mrf.mxu0 }
0x18e1   : > { %10916 = vmatmul.mubr.msk.f32.vlgmr.msra.gmra.mxu1 %vm278_vm0, %v7159_v62  ;;  %v13057_v44 = vpop.f32.mrf.mxu0 }
0x18e3   : > { %v13059_v45 = vpop.f32.mrf.mxu0 }
0x18e5   : > { %v10910_v1 = vpop.f32.mrf.mxu0 }
0x18e6   : > { %v7347_v7 = vsel %vm951_vm2, %v10910_v1, -inf }
0x18e7   : > { %v7147_v11 = vpop.f32.mrf.mxu0 }
0x18e8   : > { %v7344_v29 = vsel %vm951_vm2, %v7147_v11, -inf }
0x18e9   : > { %7345 = vmax.xlane.f32.xlu0 %v7344_v29 }
0x18ed   : > { %7348 = vmax.xlane.f32.xlu0 %v7347_v7  ;;  %v10924_v16 = vpop.f32.mrf.mxu0 }
0x18ee   : > { %v7359_v34 = vsel %vm951_vm2, %v10924_v16, -inf }
0x18ef   : > { %v7329_v50 = vpop.f32.mrf.mxu0 }
0x1972   : > { %v7346_v35 = vpop.xlane.xlu0 %7345 }
0x1973   : > { %v7364_v10 = vsub.f32 %v7147_v11, %v7346_v35 }
0x1975   : > { %v7374_v62 = vmul.f32 1.442695, %v7364_v10 }
0x1976   : > { %v7349_v0 = vpop.xlane.xlu0 %7348 }
0x1977   : > { %v7365_v20 = vsub.f32 %v10910_v1, %v7349_v0  ;;  %v7356_v1 = vsel %vm951_vm2, %v7329_v50, -inf }
0x1979   : > { %v7376_v9 = vmul.f32 1.442695, %v7365_v20 }
0x197b   : > { %11371 = vpow2.f32 %v7376_v9 }
0x197c   : > { %11373 = vpow2.f32 %v7374_v62 }
0x1985   : > { %v13063_v51 = vpop.f32.mrf.mxu1 }
0x1987   : > { %v13065_v37 = vpop.f32.mrf.mxu1 }
0x1988   : > { %v13087_v21 = vpop.eup %11371 }
0x1989   : > { %v11374_v11 = vpop.eup %11373  ;;  %v7395_v29 = vsel %vm951_vm2, %v13087_v21, 0.0 }
0x198a   : > { %v7392_v7 = vsel %vm951_vm2, %v11374_v11, 0.0 }
0x198d   : > { %v13067_v12 = vpop.f32.mrf.mxu1 }
0x198f   : > { %v13069_v4 = vpop.f32.mrf.mxu1 }
0x1991   : > { %v13071_v30 = vpop.f32.mrf.mxu1 }
0x1993   : > { %v13073_v48 = vpop.f32.mrf.mxu1 }
0x1995   : > { %v13075_v54 = vpop.f32.mrf.mxu1 }
0x1997   : > { %v13077_v36 = vpop.f32.mrf.mxu1 }
0x1999   : > { %v10903_v57 = vpop.f32.mrf.mxu1 }
0x199a   : > { %v7341_v55 = vsel %vm951_vm2, %v10903_v57, -inf }
0x199b   : > { %7342 = vmax.xlane.f32.xlu1 %v7341_v55  ;;  %v7056_v47 = vpop.f32.mrf.mxu1 }
0x199c   : > { %v7338_v33 = vsel %vm951_vm2, %v7056_v47, -inf }
0x199d   : > { %7339 = vmax.xlane.f32.xlu0 %v7338_v33 }
0x19a1   : > { %v13081_v59 = vpop.f32.mrf.mxu1 }
0x19a2   : > { %v7353_v42 = vsel %vm951_vm2, %v13081_v59, -inf }
0x19a3   : > { %7354 = vmax.xlane.f32.xlu0 %v7353_v42  ;;  %v7238_v60 = vpop.f32.mrf.mxu1 }
0x19a4   : > { %v7350_v49 = vsel %vm951_vm2, %v7238_v60, -inf }
0x19a5   : > { %7351 = vmax.xlane.f32.xlu1 %v7350_v49 }
0x19a7   : > { %7360 = vmax.xlane.f32.xlu0 %v7359_v34 }
0x19a9   : > { %7357 = vmax.xlane.f32.xlu1 %v7356_v1 }
0x19ab   : > { %7396 = vadd.xlane.f32.xlu0 %v7395_v29 }
0x19ad   : > { %7393 = vadd.xlane.f32.xlu1 %v7392_v7 }
0x1a24   : > { %v7343_v0 = vpop.xlane.xlu1 %7342 }
0x1a26   : > { %v7340_v35 = vpop.xlane.xlu0 %7339 }
0x1a2c   : > { %v7355_v20 = vpop.xlane.xlu0 %7354 }
0x1a2e   : > { %v7352_v10 = vpop.xlane.xlu1 %7351 }
0x1a30   : > { %v7361_v9 = vpop.xlane.xlu0 %7360 }
0x1a31   : > { %v7369_v62 = vsub.f32 %v10924_v16, %v7361_v9 }
0x1a32   : > { %v7358_v55 = vpop.xlane.xlu1 %7357 }
0x1a33   : > { %v7384_v33 = vmul.f32 1.442695, %v7369_v62  ;;  %v7368_v42 = vsub.f32 %v7329_v50, %v7358_v55  ;;  %v7363_v50 = vsub.f32 %v10903_v57, %v7343_v0  ;;  %v7366_v55 = vsub.f32 %v7238_v60, %v7352_v10 }
0x1a34   : > { %v7367_v60 = vsub.f32 %v13081_v59, %v7355_v20 }
0x1a35   : > { %11375 = vpow2.f32 %v7384_v33  ;;  %v7382_v49 = vmul.f32 1.442695, %v7368_v42  ;;  %v7372_v62 = vmul.f32 1.442695, %v7363_v50  ;;  %v7378_v42 = vmul.f32 1.442695, %v7366_v55 }
0x1a36   : > { %v7394_v34 = vpop.xlane.xlu1 %7393 }
0x1a37   : > { %11377 = vpow2.f32 %v7382_v49 }
0x1a38   : > { %11379 = vrcp.f32 %v7394_v34 }
0x1a39   : > { %11381 = vpow2.f32 %v7372_v62 }
0x1a42   : > { %v13093_v1 = vpop.eup %11375 }
0x1a43   : > { %v7407_v29 = vsel %vm951_vm2, %v13093_v1, 0.0 }
0x1a44   : > { %v13097_v7 = vpop.eup %11377  ;;  %7408 = vadd.xlane.f32.xlu0 %v7407_v29 }
0x1a45   : > { %v11380_v2 = vpop.eup %11379  ;;  %v7404_v16 = vsel %vm951_vm2, %v13097_v7, 0.0 }
0x1a46   : > { %7405 = vadd.xlane.f32.xlu1 %v7404_v16  ;;  %v7420_v9 = vmul.f32 %v11380_v2, %v11374_v11  ;;  %v7362_v2 = vsub.f32 %v7056_v47, %v7340_v35  ;;  %v13112_v33 = vpop.eup %11381  ;;  %v7380_v35 = vmul.f32 1.442695, %v7367_v60 }
0x1a47   : > { %v7389_v49 = vsel %vm951_vm2, %v13112_v33, 0.0 }
0x1a48   : > { %10936 = vmatprep.mubr.msk.f32.mxu0 %vm951_vm2, %v7420_v9  ;;  %v7370_v11 = vmul.f32 1.442695, %v7362_v2 }
0x1a4a   : > { %11383 = vpow2.f32 %v7370_v11 }
0x1a4b   : > { %11385 = vpow2.f32 %v7378_v42 }
0x1a4c   : > { %11387 = vpow2.f32 %v7380_v35 }
0x1a57   : > { %7428 = vrot.lane.b32.xlu1 %v12671_v15, %s11509_s22  ;;  %v13116_v34 = vpop.eup %11383 }
0x1a58   : > { %v7386_v57 = vsel %vm951_vm2, %v13116_v34, 0.0  ;;  %v13120_v0 = vpop.eup %11385 }
0x1a59   : > { %v7398_v47 = vsel %vm951_vm2, %v13120_v0, 0.0  ;;  %v13135_v10 = vpop.eup %11387 }
0x1a5a   : > { %7426 = vrot.lane.b32.xlu0 %v12673_v8, %s11509_s22  ;;  %v7401_v59 = vsel %vm951_vm2, %v13135_v10, 0.0 }
0x1a5b   : > { %7515 = vrot.lane.b32.xlu1 %v12681_v13, %s11509_s22 }
0x1a5f   : > { %7513 = vrot.lane.b32.xlu1 %v12683_v53, %s11509_s22 }
0x1a63   : > { %7600 = vrot.lane.b32.xlu1 %v12691_v58, %s11509_s22 }
0x1a79   : > { %7390 = vadd.xlane.f32.xlu0 %v7389_v49 }
0x1a87   : > { %7387 = vadd.xlane.f32.xlu1 %v7386_v57 }
0x1a8b   : > { %7399 = vadd.xlane.f32.xlu1 %v7398_v47 }
0x1a8f   : > { %7602 = vrot.lane.b32.xlu0 %v12689_v22, %s11509_s22 }
0x1a9c   : > { %7687 = vrot.lane.b32.xlu1 %v12701_v18, %s11509_s22 }
0x1aa0   : > { %7775 = vrot.lane.b32.xlu1 %v12579_v32, %s11508_s20  ;;  %v7397_v32 = vpop.xlane.xlu0 %7396 }
0x1aa1   : > { %11389 = vrcp.f32 %v7397_v32 }
0x1aa4   : > { %7915 = vrot.lane.b32.xlu1 %v12673_v8, %s11511_s24 }
0x1aa8   : > { %7917 = vrot.lane.b32.xlu1 %v12671_v15, %s11511_s24 }
0x1aac   : > { %8103 = vrot.lane.b32.xlu1 %v12689_v22, %s11510_s23 }
0x1aae   : > { %7402 = vadd.xlane.f32.xlu0 %v7401_v59  ;;  %v11390_v62 = vpop.eup %11389 }
0x1aaf   : > { %v7421_v11 = vmul.f32 %v11390_v62, %v13087_v21 }
0x1ab0   : > { %8008 = vrot.lane.b32.xlu1 %v12681_v13, %s11511_s24 }
0x1ab4   : > { %8194 = vrot.lane.b32.xlu1 %v12695_v40, %s11510_s23 }
0x1ab8   : > { %8099 = vrot.lane.b32.xlu1 %v12689_v22, %s11511_s24 }
0x1abc   : > { %8188 = vrot.lane.b32.xlu1 %v12701_v18, %s11511_s24 }
0x1ac4   : > { %7689 = vrot.lane.b32.xlu0 %v12695_v40, %s11509_s22 }
0x1ac8   : > { %7921 = vrot.lane.b32.xlu0 %v12671_v15, %s11510_s23 }
0x1acc   : > { %7919 = vrot.lane.b32.xlu0 %v12673_v8, %s11510_s23 }
0x1acd   : > { %v7409_v20 = vpop.xlane.xlu0 %7408 }
0x1acf   : > { %v7406_v29 = vpop.xlane.xlu1 %7405 }
0x1ad0   : > { %11391 = vrcp.f32 %v7406_v29  ;;  %8012 = vrot.lane.b32.xlu0 %v12681_v13, %s11510_s23 }
0x1ad1   : > { %v7427_v9 = vpop.permute.xlu0 %7426 }
0x1ad3   : > { %v7429_v16 = vpop.permute.xlu1 %7428 }
0x1ad4   : > { %10925 = vmatprep.subr.mxu1 %v7429_v16  ;;  %8010 = vrot.lane.b32.xlu0 %v12683_v53, %s11510_s23 }
0x1ad5   : > { %10926 = vmatpush3.msra.mxu1 %v7429_v16 }
0x1ad6   : > { %10927 = vmatprep.subr.mxu1 %v7427_v9 }
0x1ad7   : > { %v7516_v50 = vpop.permute.xlu1 %7515  ;;  %10928 = vmatpush3.msra.mxu1 %v7427_v9 }
0x1ad8   : > { %10932 = vmatprep.subr.mxu0 %v7516_v50  ;;  %8006 = vrot.lane.b32.xlu0 %v12683_v53, %s11511_s24 }
0x1ad9   : > { %10933 = vmatpush3.msra.mxu0 %v7516_v50 }
0x1adb   : > { %v7514_v2 = vpop.permute.xlu1 %7513 }
0x1adc   : > { %10934 = vmatprep.subr.mxu0 %v7514_v2  ;;  %8101 = vrot.lane.b32.xlu0 %v12691_v58, %s11510_s23 }
0x1add   : > { %v11392_v55 = vpop.eup %11391  ;;  %10935 = vmatpush3.msra.mxu0 %v7514_v2 }
0x1ade   : > { %10937 = vmatmul.mubr.msk.f32.vlgmr.msra.gmra.mxu0 %vm951_vm2, %v7421_v11  ;;  %v7424_v42 = vmul.f32 %v11392_v55, %v13097_v7 }
0x1adf   : > { %v7601_v21 = vpop.permute.xlu1 %7600 }
0x1ae0   : > { %8097 = vrot.lane.b32.xlu0 %v12691_v58, %s11511_s24  ;;  %10950 = vmatprep.mubr.msk.f32.mxu0 %vm951_vm2, %v7424_v42 }
0x1ae4   : > { %8192 = vrot.lane.b32.xlu0 %v12701_v18, %s11510_s23 }
0x1ae8   : > { %8190 = vrot.lane.b32.xlu0 %v12695_v40, %s11511_s24 }
0x1b02   : > { %v7391_v49 = vpop.xlane.xlu0 %7390 }
0x1b03   : > { %11393 = vrcp.f32 %v7391_v49 }
0x1b06   : > { %v7603_v57 = vpop.permute.xlu0 %7602 }
0x1b07   : > { %10939 = vmatprep.subr.mxu1 %v7603_v57 }
0x1b10   : > { %v7388_v47 = vpop.xlane.xlu1 %7387  ;;  %v11394_v7 = vpop.eup %11393 }
0x1b11   : > { %11395 = vrcp.f32 %v7388_v47  ;;  %v7419_v29 = vmul.f32 %v11394_v7, %v13112_v33 }
0x1b14   : > { %v7400_v60 = vpop.xlane.xlu1 %7399 }
0x1b15   : > { %11397 = vrcp.f32 %v7400_v60 }
0x1b16   : > { %11399 = vrcp.f32 %v7409_v20 }
0x1b18   : > { %v7688_v59 = vpop.permute.xlu1 %7687 }
0x1b1c   : > { %v7776_v50 = vpop.permute.xlu1 %7775 }
0x1b1e   : > { %v11396_v35 = vpop.eup %11395 }
0x1b1f   : > { %v7418_v32 = vmul.f32 %v11396_v35, %v13116_v34 }
0x1b20   : > { %v7916_v62 = vpop.permute.xlu1 %7915 }
0x1b21   : > { %10929 = vmatprep.mubr.msk.f32.mxu1 %vm951_vm2, %v7418_v32 }
0x1b22   : > { %v11398_v16 = vpop.eup %11397  ;;  %10930 = vmatmul.mubr.msk.f32.vlgmr.msra.gmra.mxu1 %vm951_vm2, %v7419_v29 }
0x1b23   : > { %10940 = vmatpush3.msra.mxu1 %v7603_v57  ;;  %v7422_v9 = vmul.f32 %v11398_v16, %v13120_v0  ;;  %v11400_v11 = vpop.eup %11399 }
0x1b24   : > { %10941 = vmatprep.subr.mxu1 %v7601_v21  ;;  %v7918_v2 = vpop.permute.xlu1 %7917  ;;  %v7425_v42 = vmul.f32 %v11400_v11, %v13093_v1 }
0x1b25   : > { %10942 = vmatpush3.msra.mxu1 %v7601_v21  ;;  %10943 = vmatprep.mubr.msk.f32.mxu1 %vm951_vm2, %v7422_v9 }
0x1b26   : > { %10953 = vmatprep.subr.mxu1 %v7776_v50 }
0x1b28   : > { %v8104_v33 = vpop.permute.xlu1 %8103 }
0x1b2c   : > { %v8009_v0 = vpop.permute.xlu1 %8008 }
0x1b30   : > { %v8195_v21 = vpop.permute.xlu1 %8194 }
0x1b34   : > { %v8100_v60 = vpop.permute.xlu1 %8099 }
0x1b37   : > { %v7403_v34 = vpop.xlane.xlu0 %7402 }
0x1b38   : > { %11401 = vrcp.f32 %v7403_v34  ;;  %v8189_v35 = vpop.permute.xlu1 %8188 }
0x1b3b   : > { %v7690_v55 = vpop.permute.xlu0 %7689 }
0x1b3c   : > { %10946 = vmatprep.subr.mxu0 %v7690_v55 }
0x1b3d   : > { %10947 = vmatpush3.msra.mxu0 %v7690_v55 }
0x1b3e   : > { %10948 = vmatprep.subr.mxu0 %v7688_v59 }
0x1b3f   : > { %10949 = vmatpush3.msra.mxu0 %v7688_v59  ;;  %v7922_v49 = vpop.permute.xlu0 %7921 }
0x1b40   : > { %10951 = vmatmul.mubr.msk.f32.vlgmr.msra.gmra.mxu0 %vm951_vm2, %v7425_v42  ;;  %10967 = vmatprep.subr.msk.mxu0 %vm278_vm0, %v7922_v49 }
0x1b41   : > { %10968 = vmatpush3.xpose.msk.msra.mxu0 %vm278_vm0, %v7922_v49  ;;  %10971 = vmatprep.mubr.msk.f32.mxu0 %vm278_vm0, %v7916_v62 }
0x1b43   : > { %v7920_v20 = vpop.permute.xlu0 %7919 }
0x1b44   : > { %10969 = vmatprep.subr.msk.mxu0 %vm278_vm0, %v7920_v20 }
0x1b45   : > { %v11402_v57 = vpop.eup %11401  ;;  %10970 = vmatpush3.xpose.msk.msra.mxu0 %vm278_vm0, %v7920_v20 }
0x1b46   : > { %v7423_v1 = vmul.f32 %v11402_v57, %v13135_v10 }
0x1b47   : > { %v8013_v47 = vpop.permute.xlu0 %8012 }
0x1b48   : > { %10944 = vmatmul.mubr.msk.f32.vlgmr.msra.gmra.mxu1 %vm951_vm2, %v7423_v1  ;;  %10972 = vmatmul.mubr.msk.f32.vlgmr.msra.gmra.mxu0 %vm278_vm0, %v7918_v2 }
0x1b49   : > { %10954 = vmatpush3.msra.mxu1 %v7776_v50  ;;  %10974 = vmatprep.subr.msk.mxu0 %vm278_vm0, %v8013_v47 }
0x1b4a   : > { %10975 = vmatpush3.xpose.msk.msra.mxu0 %vm278_vm0, %v8013_v47  ;;  %10981 = vmatprep.subr.msk.mxu1 %vm278_vm0, %v8104_v33 }
0x1b4b   : > { %v8011_v7 = vpop.permute.xlu0 %8010 }
0x1b4c   : > { %10976 = vmatprep.subr.msk.mxu0 %vm278_vm0, %v8011_v7 }
0x1b4e   : > { %10977 = vmatpush3.xpose.msk.msra.mxu0 %vm278_vm0, %v8011_v7  ;;  %v6941_v7 = vadd.f32 %v13037_v27, %v13063_v51 }
0x1b4f   : > { %10988 = vmatprep.subr.msk.mxu0 %vm278_vm0, %v8195_v21  ;;  %v8007_v10 = vpop.permute.xlu0 %8006 }
0x1b50   : > { %10978 = vmatprep.mubr.msk.f32.mxu0 %vm278_vm0, %v8007_v10 }
0x1b51   : > { %10979 = vmatmul.mubr.msk.f32.vlgmr.msra.gmra.mxu0 %vm278_vm0, %v8009_v0 }
0x1b52   : > { %10989 = vmatpush3.xpose.msk.msra.mxu0 %vm278_vm0, %v8195_v21  ;;  %10992 = vmatprep.mubr.msk.f32.mxu0 %vm278_vm0, %v8189_v35  ;;  %v6936_v35 = vadd.f32 %v13041_v5, %v13065_v37 }
0x1b53   : > { %v8102_v59 = vpop.permute.xlu0 %8101 }
0x1b57   : > { %v8098_v32 = vpop.permute.xlu0 %8097 }
0x1b5b   : > { %v8193_v29 = vpop.permute.xlu0 %8192 }
0x1b5c   : > { %10990 = vmatprep.subr.msk.mxu0 %vm278_vm0, %v8193_v29 }
0x1b5d   : > { %10991 = vmatpush3.xpose.msk.msra.mxu0 %vm278_vm0, %v8193_v29 }
0x1b5f   : > { %v8191_v16 = vpop.permute.xlu0 %8190 }
0x1b60   : > { %10993 = vmatmul.mubr.msk.f32.vlgmr.msra.gmra.mxu0 %vm278_vm0, %v8191_v16 }
0x1b9e   : > { %v10938_v9 = vpop.f32.mrf.mxu0 }
0x1ba0   : > { %v7591_v2 = vpop.f32.mrf.mxu0 }
0x1be2   : > { %v10931_v50 = vpop.f32.mrf.mxu1 }
0x1be4   : > { %v7504_v62 = vpop.f32.mrf.mxu1 }
0x1be5   : > { %10955 = vmatprep.mubr.msk.f32.mxu1 %vm278_vm0, %v7504_v62 }
0x1be6   : > { %10956 = vmatmul.mubr.msk.f32.vlgmr.msra.gmra.mxu1 %vm278_vm0, %v10931_v50 }
0x1be7   : > { %10982 = vmatpush3.xpose.msk.msra.mxu1 %vm278_vm0, %v8104_v33  ;;  %10958 = vmatprep.mubr.msk.f32.mxu1 %vm278_vm0, %v7591_v2 }
0x1be8   : > { %10983 = vmatprep.subr.msk.mxu1 %vm278_vm0, %v8102_v59 }
0x1bea   : > { %10959 = vmatmul.mubr.msk.f32.gmra.mxu1 %vm278_vm0, %v10938_v9 }
0x1beb   : > { %10984 = vmatpush3.xpose.msk.msra.mxu1 %vm278_vm0, %v8102_v59 }
0x1c00   : > { %v10952_v34 = vpop.f32.mrf.mxu0 }
0x1c02   : > { %v7765_v11 = vpop.f32.mrf.mxu0 }
0x1c08   : > { %v10945_v55 = vpop.f32.mrf.mxu1  ;;  %v10973_v42 = vpop.f32.mrf.mxu0 }
0x1c09   : > { %v8282_v0 = vsel %vm951_vm2, %v10973_v42, -inf }
0x1c0a   : > { %v7678_v49 = vpop.f32.mrf.mxu1  ;;  %8283 = vmax.xlane.f32.xlu0 %v8282_v0  ;;  %v7997_v20 = vpop.f32.mrf.mxu0 }
0x1c0b   : > { %10961 = vmatprep.mubr.msk.f32.mxu1 %vm278_vm0, %v7678_v49  ;;  %v8279_v33 = vsel %vm951_vm2, %v7997_v20, -inf }
0x1c0c   : > { %10962 = vmatmul.mubr.msk.f32.gmra.mxu1 %vm278_vm0, %v10945_v55  ;;  %8280 = vmax.xlane.f32.xlu1 %v8279_v33 }
0x1c0d   : > { %10964 = vmatprep.mubr.msk.f32.mxu1 %vm278_vm0, %v7765_v11 }
0x1c10   : > { %10965 = vmatmul.mubr.msk.f32.gmra.mxu1 %vm278_vm0, %v10952_v34 }
0x1c11   : > { %v10980_v57 = vpop.f32.mrf.mxu0  ;;  %10985 = vmatprep.mubr.msk.f32.mxu1 %vm278_vm0, %v8098_v32  ;;  %v6951_v32 = vadd.f32 %v13043_v26, %v13067_v12  ;;  %v6961_v26 = vadd.f32 %v13051_v24, %v13071_v30  ;;  %v6966_v24 = vadd.f32 %v13059_v45, %v13077_v36 }
0x1c12   : > { %v8288_v21 = vsel %vm951_vm2, %v10980_v57, -inf }
0x1c13   : > { %8289 = vmax.xlane.f32.xlu1 %v8288_v21  ;;  %v8088_v1 = vpop.f32.mrf.mxu0 }
0x1c14   : > { %10986 = vmatmul.mubr.msk.f32.vlgmr.msra.gmra.mxu1 %vm278_vm0, %v8100_v60  ;;  %v8285_v47 = vsel %vm951_vm2, %v8088_v1, -inf  ;;  %v6946_v60 = vadd.f32 %v13049_v56, %v13069_v4  ;;  %v6956_v56 = vadd.f32 %v13054_v25, %v13073_v48 }
0x1c15   : > { %8286 = vmax.xlane.f32.xlu0 %v8285_v47 }
0x1c93   : > { %v8284_v51 = vpop.xlane.xlu0 %8283 }
0x1c94   : > { %v8304_v5 = vsub.f32 %v10973_v42, %v8284_v51  ;;  %v6971_v42 = vadd.f32 %v13057_v44, %v13075_v54 }
0x1c95   : > { %v8281_v2 = vpop.xlane.xlu1 %8280 }
0x1c96   : > { %v8303_v34 = vsub.f32 %v7997_v20, %v8281_v2  ;;  %v8313_v55 = vmul.f32 1.442695, %v8304_v5 }
0x1c98   : > { %v8311_v12 = vmul.f32 1.442695, %v8303_v34  ;;  %11403 = vpow2.f32 %v8313_v55 }
0x1c9a   : > { %11405 = vpow2.f32 %v8311_v12 }
0x1c9c   : > { %v8290_v37 = vpop.xlane.xlu1 %8289 }
0x1c9d   : > { %v8306_v0 = vsub.f32 %v10980_v57, %v8290_v37 }
0x1c9e   : > { %v8287_v11 = vpop.xlane.xlu0 %8286 }
0x1c9f   : > { %v8305_v49 = vsub.f32 %v8088_v1, %v8287_v11  ;;  %v8317_v4 = vmul.f32 1.442695, %v8306_v0  ;;  %v10994_v1 = vpop.f32.mrf.mxu0 }
0x1ca1   : > { %v8315_v20 = vmul.f32 1.442695, %v8305_v49  ;;  %11407 = vpow2.f32 %v8317_v4 }
0x1ca3   : > { %11409 = vpow2.f32 %v8315_v20 }
0x1ca5   : > { %v13254_v45 = vpop.eup %11403 }
0x1ca6   : > { %v10957_v10 = vpop.f32.mrf.mxu1 }
0x1ca7   : > { %v13223_v59 = vadd.f32 %v10957_v10, %v6941_v7 }
0x1ca8   : > { %v7868_v29 = vpop.f32.mrf.mxu1 }
0x1ca9   : > { %v13227_v16 = vadd.f32 %v7868_v29, %v6936_v35  ;;  %v8270_v29 = vpop.f32.mrf.mxu0 }
0x1caa   : > { %v10960_v9 = vpop.f32.mrf.mxu1  ;;  %v8297_v36 = vsel %vm951_vm2, %v8270_v29, -inf }
0x1cab   : > { %v13231_v50 = vadd.f32 %v10960_v9, %v6951_v32  ;;  %v8300_v32 = vsel %vm951_vm2, %v10994_v1, -inf  ;;  %v11406_v9 = vpop.eup %11405 }
0x1cac   : > { %v7878_v62 = vpop.f32.mrf.mxu1  ;;  %v8327_v51 = vsel %vm951_vm2, %v11406_v9, 0.0 }
0x1cad   : > { %v13233_v27 = vadd.f32 %v7878_v62, %v6946_v60  ;;  %v8330_v60 = vsel %vm951_vm2, %v13254_v45, 0.0 }
0x1cae   : > { %v13259_v62 = vpop.eup %11407 }
0x1caf   : > { %v8336_v5 = vsel %vm951_vm2, %v13259_v62, 0.0 }
0x1cb0   : > { %v13262_v2 = vpop.eup %11409 }
0x1cb1   : > { %v8333_v37 = vsel %vm951_vm2, %v13262_v2, 0.0 }
0x1ccc   : > { %v10963_v33 = vpop.f32.mrf.mxu1 }
0x1ccd   : > { %v13239_v21 = vadd.f32 %v10963_v33, %v6961_v26 }
0x1cce   : > { %v7888_v47 = vpop.f32.mrf.mxu1 }
0x1ccf   : > { %v13243_v57 = vadd.f32 %v7888_v47, %v6956_v56 }
0x1cd0   : > { %v10966_v7 = vpop.f32.mrf.mxu1 }
0x1cd1   : > { %v13247_v30 = vadd.f32 %v10966_v7, %v6971_v42 }
0x1cd2   : > { %v7898_v25 = vpop.f32.mrf.mxu1 }
0x1cd3   : > { %v13249_v48 = vadd.f32 %v7898_v25, %v6966_v24 }
0x1cd4   : > { %v10987_v10 = vpop.f32.mrf.mxu1 }
0x1cd5   : > { %v8294_v35 = vsel %vm951_vm2, %v10987_v10, -inf }
0x1cd6   : > { %8295 = vmax.xlane.f32.xlu1 %v8294_v35  ;;  %v8179_v44 = vpop.f32.mrf.mxu1 }
0x1cd7   : > { %v8291_v54 = vsel %vm951_vm2, %v8179_v44, -inf }
0x1cd8   : > { %8292 = vmax.xlane.f32.xlu0 %v8291_v54 }
0x1cda   : > { %8301 = vmax.xlane.f32.xlu1 %v8300_v32 }
0x1cdc   : > { %8298 = vmax.xlane.f32.xlu0 %v8297_v36 }
0x1cde   : > { %8331 = vadd.xlane.f32.xlu1 %v8330_v60 }
0x1ce0   : > { %8328 = vadd.xlane.f32.xlu0 %v8327_v51 }
0x1ce2   : > { %8337 = vadd.xlane.f32.xlu1 %v8336_v5 }
0x1ce4   : > { %8334 = vadd.xlane.f32.xlu0 %v8333_v37 }
0x1d5f   : > { %v8296_v34 = vpop.xlane.xlu1 %8295 }
0x1d60   : > { %v8308_v25 = vsub.f32 %v10987_v10, %v8296_v34 }
0x1d61   : > { %v8293_v11 = vpop.xlane.xlu0 %8292 }
0x1d62   : > { %v8321_v35 = vmul.f32 1.442695, %v8308_v25 }
0x1d63   : > { %v8302_v55 = vpop.xlane.xlu1 %8301 }
0x1d64   : > { %v8310_v0 = vsub.f32 %v10994_v1, %v8302_v55  ;;  %v8307_v1 = vsub.f32 %v8179_v44, %v8293_v11 }
0x1d65   : > { %v8299_v26 = vpop.xlane.xlu0 %8298 }
0x1d66   : > { %v8325_v12 = vmul.f32 1.442695, %v8310_v0  ;;  %v8309_v49 = vsub.f32 %v8270_v29, %v8299_v26  ;;  %v8319_v54 = vmul.f32 1.442695, %v8307_v1 }
0x1d68   : > { %11411 = vpow2.f32 %v8325_v12  ;;  %v8323_v33 = vmul.f32 1.442695, %v8309_v49 }
0x1d69   : > { %v8329_v56 = vpop.xlane.xlu0 %8328 }
0x1d6a   : > { %11413 = vpow2.f32 %v8323_v33 }
0x1d6b   : > { %11415 = vrcp.f32 %v8329_v56 }
0x1d6c   : > { %11417 = vpow2.f32 %v8321_v35 }
0x1d6d   : > { %11419 = vpow2.f32 %v8319_v54 }
0x1d75   : > { %v13268_v4 = vpop.eup %11411 }
0x1d76   : > { %v8348_v47 = vsel %vm951_vm2, %v13268_v4, 0.0 }
0x1d77   : > { %v13272_v42 = vpop.eup %11413  ;;  %8349 = vadd.xlane.f32.xlu1 %v8348_v47 }
0x1d78   : > { %v11416_v20 = vpop.eup %11415  ;;  %v8345_v7 = vsel %vm951_vm2, %v13272_v42, 0.0 }
0x1d79   : > { %8346 = vadd.xlane.f32.xlu0 %v8345_v7  ;;  %v8359_v24 = vmul.f32 %v11416_v20, %v11406_v9 }
0x1d7b   : > { %10999 = vmatprep.mubr.msk.f32.mxu1 %vm951_vm2, %v8359_v24 }
0x1d88   : > { %8367 = vrot.lane.b32.xlu1 %v12673_v8, %s11512_s27  ;;  %v13289_v8 = vpop.eup %11417 }
0x1d8c   : > { %8456 = vrot.lane.b32.xlu1 %v12681_v13, %s11512_s27  ;;  %v13291_v13 = vpop.eup %11419 }
0x1d8f   : > { %8369 = vrot.lane.b32.xlu0 %v12671_v15, %s11512_s27  ;;  %v8342_v15 = vsel %vm951_vm2, %v13289_v8, 0.0 }
0x1d90   : > { %8543 = vrot.lane.b32.xlu1 %v12689_v22, %s11512_s27  ;;  %v8332_v22 = vpop.xlane.xlu1 %8331 }
0x1d91   : > { %11421 = vrcp.f32 %v8332_v22 }
0x1d93   : > { %8454 = vrot.lane.b32.xlu0 %v12683_v53, %s11512_s27  ;;  %v8339_v53 = vsel %vm951_vm2, %v13291_v13, 0.0 }
0x1d94   : > { %v8338_v10 = vpop.xlane.xlu1 %8337 }
0x1d97   : > { %8541 = vrot.lane.b32.xlu0 %v12691_v58, %s11512_s27  ;;  %v8335_v58 = vpop.xlane.xlu0 %8334 }
0x1d98   : > { %11423 = vrcp.f32 %v8335_v58 }
0x1d99   : > { %11425 = vrcp.f32 %v8338_v10 }
0x1d9e   : > { %v11422_v36 = vpop.eup %11421 }
0x1da5   : > { %v11424_v60 = vpop.eup %11423 }
0x1da6   : > { %v8361_v5 = vmul.f32 %v11424_v60, %v13262_v2 }
0x1db4   : > { %8343 = vadd.xlane.f32.xlu1 %v8342_v15 }
0x1db6   : > { %8340 = vadd.xlane.f32.xlu0 %v8339_v53 }
0x1dc5   : > { %8630 = vrot.lane.b32.xlu1 %v12695_v40, %s11512_s27 }
0x1dc9   : > { %8716 = vrot.lane.b32.xlu1 %v12573_v28, %s11508_s20  ;;  %v8360_v28 = vmul.f32 %v11422_v36, %v13254_v45  ;;  %s13564_s20 = scalar_lea.vmem %s13597_s6, %s9524_s26 }
0x1dcc   : > { %8628 = vrot.lane.b32.xlu0 %v12701_v18, %s11512_s27  ;;  %v11426_v18 = vpop.eup %11425 }
0x1dcd   : > { %v8362_v34 = vmul.f32 %v11426_v18, %v13259_v62 }
0x1e00   : > { %v8350_v44 = vpop.xlane.xlu1 %8349 }
0x1e02   : > { %v8347_v29 = vpop.xlane.xlu0 %8346 }
0x1e03   : > { %11427 = vrcp.f32 %v8347_v29 }
0x1e04   : > { %v8368_v32 = vpop.permute.xlu1 %8367  ;;  %11429 = vrcp.f32 %v8350_v44 }
0x1e06   : > { %v8370_v9 = vpop.permute.xlu0 %8369 }
0x1e07   : > { %10995 = vmatprep.subr.mxu1 %v8370_v9 }
0x1e08   : > { %v8457_v40 = vpop.permute.xlu1 %8456  ;;  %10996 = vmatpush3.msra.mxu1 %v8370_v9 }
0x1e09   : > { %10997 = vmatprep.subr.mxu1 %v8368_v32 }
0x1e0a   : > { %10998 = vmatpush3.msra.mxu1 %v8368_v32  ;;  %v8455_v51 = vpop.permute.xlu0 %8454 }
0x1e0b   : > { %11000 = vmatmul.mubr.msk.f32.vlgmr.msra.gmra.mxu1 %vm951_vm2, %v8360_v28  ;;  %11002 = vmatprep.subr.mxu1 %v8457_v40 }
0x1e0c   : > { %v8544_v37 = vpop.permute.xlu1 %8543  ;;  %11003 = vmatpush3.msra.mxu1 %v8457_v40  ;;  %11006 = vmatprep.mubr.msk.f32.mxu1 %vm951_vm2, %v8361_v5 }
0x1e0d   : > { %11004 = vmatprep.subr.mxu1 %v8455_v51  ;;  %11009 = vmatprep.subr.mxu0 %v8544_v37 }
0x1e0e   : > { %11005 = vmatpush3.msra.mxu1 %v8455_v51  ;;  %11010 = vmatpush3.msra.mxu0 %v8544_v37  ;;  %v8542_v45 = vpop.permute.xlu0 %8541 }
0x1e0f   : > { %11007 = vmatmul.mubr.msk.f32.vlgmr.msra.gmra.mxu1 %vm951_vm2, %v8362_v34  ;;  %11011 = vmatprep.subr.mxu0 %v8542_v45 }
0x1e10   : > { %v11428_v11 = vpop.eup %11427  ;;  %11012 = vmatpush3.msra.mxu0 %v8542_v45 }
0x1e11   : > { %v8365_v2 = vmul.f32 %v11428_v11, %v13272_v42  ;;  %v11430_v62 = vpop.eup %11429 }
0x1e12   : > { %v8366_v49 = vmul.f32 %v11430_v62, %v13268_v4 }
0x1e13   : > { %11020 = vmatprep.mubr.msk.f32.mxu1 %vm951_vm2, %v8365_v2 }
0x1e3d   : > { %v8344_v55 = vpop.xlane.xlu1 %8343 }
0x1e3e   : > { %11431 = vrcp.f32 %v8344_v55 }
0x1e3f   : > { %v8341_v0 = vpop.xlane.xlu0 %8340 }
0x1e40   : > { %11433 = vrcp.f32 %v8341_v0 }
0x1e41   : > { %v8631_v26 = vpop.permute.xlu1 %8630 }
0x1e42   : > { %11016 = vmatprep.subr.mxu1 %v8631_v26 }
0x1e43   : > { %11017 = vmatpush3.msra.mxu1 %v8631_v26  ;;  %v8629_v12 = vpop.permute.xlu0 %8628 }
0x1e44   : > { %11018 = vmatprep.subr.mxu1 %v8629_v12 }
0x1e45   : > { %11019 = vmatpush3.msra.mxu1 %v8629_v12  ;;  %v8717_v33 = vpop.permute.xlu1 %8716 }
0x1e46   : > { %11021 = vmatmul.mubr.msk.f32.vlgmr.msra.gmra.mxu1 %vm951_vm2, %v8366_v49  ;;  %11023 = vmatprep.subr.mxu0 %v8717_v33 }
0x1e4b   : > { %v11432_v56 = vpop.eup %11431 }
0x1e4c   : > { %v8364_v20 = vmul.f32 %v11432_v56, %v13289_v8 }
0x1e4d   : > { %v11434_v47 = vpop.eup %11433 }
0x1e4e   : > { %v8363_v42 = vmul.f32 %v11434_v47, %v13291_v13  ;;  %v13328_v13 = vld [vmem:[%s13596_s5 + $0x8] sm:$0xff] }
0x1e4f   : > { %v8859_v15 = vrot.slane %v13328_v13, %v4338_v39 }
0x1e50   : > { %11013 = vmatprep.mubr.msk.f32.mxu0 %vm951_vm2, %v8363_v42 }
0x1e51   : > { %11014 = vmatmul.mubr.msk.f32.vlgmr.msra.gmra.mxu0 %vm951_vm2, %v8364_v20 }
0x1e52   : > { %11024 = vmatpush3.msra.mxu0 %v8717_v33 }
0x1ecb   : > { %v11001_v7 = vpop.f32.mrf.mxu1 }
0x1ecd   : > { %v8445_v24 = vpop.f32.mrf.mxu1 }
0x1ece   : > { %11025 = vmatprep.mubr.msk.f32.mxu0 %vm278_vm0, %v8445_v24 }
0x1ecf   : > { %v11008_v4 = vpop.f32.mrf.mxu1  ;;  %11026 = vmatmul.mubr.msk.f32.vlgmr.msra.gmra.mxu0 %vm278_vm0, %v11001_v7 }
0x1ed1   : > { %v8532_v25 = vpop.f32.mrf.mxu1 }
0x1ed2   : > { %11028 = vmatprep.mubr.msk.f32.mxu0 %vm278_vm0, %v8532_v25 }
0x1ed3   : > { %11029 = vmatmul.mubr.msk.f32.gmra.mxu0 %vm278_vm0, %v11008_v4 }
0x1f06   : > { %v11022_v1 = vpop.f32.mrf.mxu1 }
0x1f08   : > { %v8706_v8 = vpop.f32.mrf.mxu1 }
0x1f11   : > { %v11015_v35 = vpop.f32.mrf.mxu0 }
0x1f13   : > { %v8619_v54 = vpop.f32.mrf.mxu0 }
0x1f14   : > { %11031 = vmatprep.mubr.msk.f32.mxu0 %vm278_vm0, %v8619_v54 }
0x1f15   : > { %11032 = vmatmul.mubr.msk.f32.gmra.mxu0 %vm278_vm0, %v11015_v35 }
0x1f16   : > { %11034 = vmatprep.mubr.msk.f32.mxu0 %vm278_vm0, %v8706_v8 }
0x1f19   : > { %11035 = vmatmul.mubr.msk.f32.gmra.mxu0 %vm278_vm0, %v11022_v1 }
0x1f8f   : > { %v11027_v53 = vpop.f32.mrf.mxu0 }
0x1f90   : > { %v8849_v22 = vadd.f32 %v11027_v53, %v13223_v59 }
0x1f91   : > { %v8809_v58 = vpop.f32.mrf.mxu0 }
0x1f92   : > { %v8861_v10 = vadd.f32 %v8859_v15, %v8849_v22  ;;  %v8848_v44 = vadd.f32 %v8809_v58, %v13227_v16 }
0x1f93   : > { %v11030_v29 = vpop.f32.mrf.mxu0 }
0x1f94   : > { %v8860_v32 = vadd.f32 %v8859_v15, %v8848_v44  ;;  %v8851_v36 = vadd.f32 %v11030_v29, %v13231_v50  ;;  %v8869_v9 = vadd.f32 %v8861_v10, %v12631_v38  ;;  %v11489_v10 = vld [vmem:[%s13594_s3 + $0x38] sm:$0xff]  ;;  %v11490_v29 = vld [vmem:[%s13594_s3 + $0x30] sm:$0xff] }
0x1f95   : > { %v8819_v60 = vpop.f32.mrf.mxu0  ;;  %v4947_v44 = vunpack.c.h.bf16 %v11489_v10 }
0x1f96   : > { %v8850_v40 = vadd.f32 %v8819_v60, %v13233_v27  ;;  %v8879_v28 = vsel %vm465_vm1, %v8869_v9, 0.0  ;;  %v8868_v39 = vadd.f32 %v8860_v32, %v12628_v41  ;;  %v8863_v18 = vadd.f32 %v8859_v15, %v8851_v36  ;;  %v11491_v36 = vld [vmem:[%s13594_s3 + $0x28] sm:$0xff]  ;;  %v11492_v60 = vld [vmem:[%s13594_s3 + $0x20] sm:$0xff] }
0x1f97   : > { %8880 = vadd.xlane.f32.xlu1 %v8879_v28  ;;  %11037 = vmatprep.subr.mxu1 %v4947_v44  ;;  %v4945_v32 = vunpack.c.h.bf16 %v11490_v29 }
0x1f98   : > { %v8862_v59 = vadd.f32 %v8859_v15, %v8850_v40  ;;  %v8876_v51 = vsel %vm465_vm1, %v8868_v39, 0.0  ;;  %v8871_v50 = vadd.f32 %v8863_v18, %v12640_v63  ;;  %11038 = vmatpush3.msra.mxu1 %v4947_v44  ;;  %v4941_v40 = vunpack.c.h.bf16 %v11492_v60 }
0x1f99   : > { %8877 = vadd.xlane.f32.xlu0 %v8876_v51  ;;  %11039 = vmatprep.subr.mxu1 %v4945_v32 }
0x1f9a   : > { %v8870_v16 = vadd.f32 %v8862_v59, %v12638_v61  ;;  %v8885_v38 = vsel %vm465_vm1, %v8871_v50, 0.0  ;;  %11040 = vmatpush3.msra.mxu1 %v4945_v32 }
0x1f9c   : > { %v8882_v5 = vsel %vm465_vm1, %v8870_v16, 0.0 }
0x1f9d   : > { %8883 = vadd.xlane.f32.xlu0 %v8882_v5 }
0x1fa1   : > { %8886 = vadd.xlane.f32.xlu0 %v8885_v38 }
0x1fd5   : > { %v11033_v27 = vpop.f32.mrf.mxu0 }
0x1fd6   : > { %v8853_v37 = vadd.f32 %v11033_v27, %v13239_v21 }
0x1fd7   : > { %v8829_v41 = vpop.f32.mrf.mxu0 }
0x1fd8   : > { %v8865_v34 = vadd.f32 %v8859_v15, %v8853_v37  ;;  %v8852_v45 = vadd.f32 %v8829_v41, %v13243_v57 }
0x1fd9   : > { %v11036_v11 = vpop.f32.mrf.mxu0 }
0x1fda   : > { %v8864_v2 = vadd.f32 %v8859_v15, %v8852_v45  ;;  %v8855_v55 = vadd.f32 %v11036_v11, %v13247_v30  ;;  %v8873_v61 = vadd.f32 %v8865_v34, %v12652_v46 }
0x1fdb   : > { %v8839_v0 = vpop.f32.mrf.mxu0 }
0x1fdc   : > { %v8867_v62 = vadd.f32 %v8859_v15, %v8855_v55  ;;  %v8854_v63 = vadd.f32 %v8839_v0, %v13249_v48  ;;  %v8891_v26 = vsel %vm465_vm1, %v8873_v61, 0.0  ;;  %v8872_v12 = vadd.f32 %v8864_v2, %v12649_v6 }
0x1fdd   : > { %8892 = vadd.xlane.f32.xlu0 %v8891_v26 }
0x1fde   : > { %v8866_v21 = vadd.f32 %v8859_v15, %v8854_v63  ;;  %v8888_v49 = vsel %vm465_vm1, %v8872_v12, 0.0  ;;  %v8875_v57 = vadd.f32 %v8867_v62, %v12660_v31 }
0x1fdf   : > { %8889 = vadd.xlane.f32.xlu1 %v8888_v49 }
0x1fe0   : > { %v8897_v33 = vsel %vm465_vm1, %v8875_v57, 0.0  ;;  %v8874_v30 = vadd.f32 %v8866_v21, %v12658_v14 }
0x1fe1   : > { %8898 = vadd.xlane.f32.xlu0 %v8897_v33 }
0x1fe2   : > { %v8894_v46 = vsel %vm465_vm1, %v8874_v30, 0.0 }
0x1fe3   : > { %8895 = vadd.xlane.f32.xlu1 %v8894_v46 }
0x2020   : > { %v8881_v48 = vpop.xlane.xlu1 %8880 }
0x2021   : > { %v8901_v56 = vmul.f32 0.03125, %v8881_v48 }
0x2022   : > { %v8878_v47 = vpop.xlane.xlu0 %8877 }
0x2023   : > { %v13357_v42 = vsub.f32 %v8869_v9, %v8901_v56  ;;  %v8900_v6 = vmul.f32 0.03125, %v8878_v47  ;;  %v4943_v9 = vunpack.c.h.bf16 %v11491_v36 }
0x2025   : > { %v13359_v20 = vsub.f32 %v8868_v39, %v8900_v6  ;;  %v8917_v31 = vmul.f32 %v13357_v42, %v13357_v42  ;;  %11041 = vmatprep.subr.mxu1 %v4943_v9 }
0x2026   : > { %v8884_v7 = vpop.xlane.xlu0 %8883  ;;  %11042 = vmatpush3.msra.mxu1 %v4943_v9 }
0x2027   : > { %v8902_v24 = vmul.f32 0.03125, %v8884_v7  ;;  %v8927_v4 = vsel %vm465_vm1, %v8917_v31, 0.0  ;;  %v8916_v14 = vmul.f32 %v13359_v20, %v13359_v20  ;;  %11043 = vmatprep.subr.mxu1 %v4941_v40  ;;  %v8983_v31 = vrot.slane %v13328_v13, %v4463_v19 }
0x2028   : > { %8928 = vadd.xlane.f32.xlu0 %v8927_v4  ;;  %11044 = vmatpush3.msra.mxu1 %v4941_v40 }
0x2029   : > { %v13366_v25 = vsub.f32 %v8870_v16, %v8902_v24  ;;  %v8924_v1 = vsel %vm465_vm1, %v8916_v14, 0.0 }
0x202a   : > { %8925 = vadd.xlane.f32.xlu1 %v8924_v1  ;;  %v8887_v35 = vpop.xlane.xlu0 %8886  ;;  %v8995_v1 = vrot.slane %v13328_v13, %v4475_v43 }
0x202b   : > { %v8903_v54 = vmul.f32 0.03125, %v8887_v35  ;;  %v8918_v8 = vmul.f32 %v13366_v25, %v13366_v25 }
0x202d   : > { %v13371_v15 = vsub.f32 %v8871_v50, %v8903_v54  ;;  %v8930_v53 = vsel %vm465_vm1, %v8918_v8, 0.0 }
0x202e   : > { %8931 = vadd.xlane.f32.xlu1 %v8930_v53 }
0x202f   : > { %v8919_v22 = vmul.f32 %v13371_v15, %v13371_v15 }
0x2031   : > { %v8933_v58 = vsel %vm465_vm1, %v8919_v22, 0.0 }
0x2032   : > { %8934 = vadd.xlane.f32.xlu0 %v8933_v58 }
0x2066   : > { %v8893_v28 = vpop.xlane.xlu0 %8892 }
0x2067   : > { %v8905_v39 = vmul.f32 0.03125, %v8893_v28 }
0x2068   : > { %v8890_v18 = vpop.xlane.xlu1 %8889 }
0x2069   : > { %v13389_v59 = vsub.f32 %v8873_v61, %v8905_v39  ;;  %v8904_v51 = vmul.f32 0.03125, %v8890_v18 }
0x206a   : > { %v8899_v16 = vpop.xlane.xlu0 %8898 }
0x206b   : > { %v13391_v5 = vsub.f32 %v8872_v12, %v8904_v51  ;;  %v8907_v50 = vmul.f32 0.03125, %v8899_v16  ;;  %v8921_v38 = vmul.f32 %v13389_v59, %v13389_v59 }
0x206c   : > { %v8896_v27 = vpop.xlane.xlu1 %8895 }
0x206d   : > { %v13395_v37 = vsub.f32 %v8875_v57, %v8907_v50  ;;  %v8906_v41 = vmul.f32 0.03125, %v8896_v27  ;;  %v8939_v34 = vsel %vm465_vm1, %v8921_v38, 0.0  ;;  %v8920_v45 = vmul.f32 %v13391_v5, %v13391_v5 }
0x206e   : > { %8940 = vadd.xlane.f32.xlu0 %v8939_v34  ;;  %v9925_v34 = vld [vmem:[%s13595_s4 + $0x78] sm:$0xff]  }
0x206f   : > { %v13400_v11 = vsub.f32 %v8874_v30, %v8906_v41  ;;  %v8936_v2 = vsel %vm465_vm1, %v8920_v45, 0.0  ;;  %v8923_v55 = vmul.f32 %v13395_v37, %v13395_v37 }
0x2070   : > { %8937 = vadd.xlane.f32.xlu1 %v8936_v2 }
0x2071   : > { %v8945_v61 = vsel %vm465_vm1, %v8923_v55, 0.0  ;;  %v8922_v0 = vmul.f32 %v13400_v11, %v13400_v11  ;;  %v9910_v55 = vunpack.c.h.bf16 %v9925_v34 }
0x2072   : > { %8946 = vadd.xlane.f32.xlu0 %v8945_v61 }
0x2073   : > { %v8942_v62 = vsel %vm465_vm1, %v8922_v0, 0.0  ;;  %11057 = vmatprep.subr.mxu0 %v9910_v55 }
0x2074   : > { %8943 = vadd.xlane.f32.xlu1 %v8942_v62  ;;  %11058 = vmatpush3.msra.mxu0 %v9910_v55 }
0x20b1   : > { %v8929_v63 = vpop.xlane.xlu0 %8928 }
0x20b2   : > { %v8949_v26 = vmul.f32 0.03125, %v8929_v63 }
0x20b3   : > { %v8926_v12 = vpop.xlane.xlu1 %8925 }
0x20b4   : > { %v8957_v21 = vadd.f32 1e-05, %v8949_v26  ;;  %v8948_v49 = vmul.f32 0.03125, %v8926_v12  ;;  %v9924_v26 = vld [vmem:[%s13595_s4 + $0x70] sm:$0xff]  }
0x20b5   : > { %v9906_v12 = vunpack.c.h.bf16 %v9924_v26 }
0x20b6   : > { %11435 = vrsqrt.f32 %v8957_v21  ;;  %v8956_v57 = vadd.f32 1e-05, %v8948_v49  ;;  %v9905_v21 = vunpack.c.l.bf16 %v9924_v26 }
0x20b7   : > { %v8932_v33 = vpop.xlane.xlu1 %8931 }
0x20b8   : > { %11437 = vrsqrt.f32 %v8956_v57  ;;  %v8950_v30 = vmul.f32 0.03125, %v8932_v33  ;;  %v9923_v57 = vld [vmem:[%s13595_s4 + $0x68] sm:$0xff]  }
0x20b9   : > { %v9902_v33 = vunpack.c.h.bf16 %v9923_v57 }
0x20ba   : > { %v8958_v46 = vadd.f32 1e-05, %v8950_v30  ;;  %v9901_v30 = vunpack.c.l.bf16 %v9923_v57 }
0x20bb   : > { %v8935_v48 = vpop.xlane.xlu0 %8934 }
0x20bc   : > { %11439 = vrsqrt.f32 %v8958_v46  ;;  %v8951_v56 = vmul.f32 0.03125, %v8935_v48  ;;  %v9922_v46 = vld [vmem:[%s13595_s4 + $0x60] sm:$0xff]  }
0x20bd   : > { %v9898_v48 = vunpack.c.h.bf16 %v9922_v46 }
0x20be   : > { %v8959_v47 = vadd.f32 1e-05, %v8951_v56  ;;  %v9897_v56 = vunpack.c.l.bf16 %v9922_v46 }
0x20c0   : > { %11441 = vrsqrt.f32 %v8959_v47  ;;  %v9921_v47 = vld [vmem:[%s13595_s4 + $0x58] sm:$0xff]  }
0x20c3   : > { %v11436_v6 = vpop.eup %11435 }
0x20c4   : > { %v8973_v7 = vmul.f32 %v11436_v6, %v13357_v42  ;;  %v9894_v6 = vunpack.c.h.bf16 %v9921_v47 }
0x20c5   : > { %v11438_v24 = vpop.eup %11437 }
0x20c6   : > { %v8972_v4 = vmul.f32 %v11438_v24, %v13359_v20  ;;  %v8985_v14 = vmul.f32 %v8983_v31, %v8973_v7  ;;  %v9893_v7 = vunpack.c.l.bf16 %v9921_v47 }
0x20c8   : > { %v8984_v35 = vmul.f32 %v8983_v31, %v8972_v4  ;;  %v13420_v22 = vadd.f32 %v8995_v1, %v8985_v14  ;;  %v9919_v4 = vld [vmem:[%s13595_s4 + $0x48] sm:$0xff]  }
0x20c9   : > { %v11440_v54 = vpop.eup %11439 }
0x20ca   : > { %v13417_v8 = vadd.f32 %v8995_v1, %v8984_v35  ;;  %v8974_v53 = vmul.f32 %v11440_v54, %v13366_v25  ;;  %v9918_v35 = vld [vmem:[%s13595_s4 + $0x40] sm:$0xff]   ;;  %v9885_v54 = vunpack.c.l.bf16 %v9919_v4 }
0x20cc   : > { %11045 = vmatprep.mubr.msk.f32.mxu1 %vm465_vm1, %v13417_v8  ;;  %v8986_v19 = vmul.f32 %v8983_v31, %v8974_v53  ;;  %v9882_v53 = vunpack.c.h.bf16 %v9918_v35 }
0x20cd   : > { %v11442_v42 = vpop.eup %11441  ;;  %11046 = vmatmul.mubr.msk.f32.vlgmr.msra.gmra.mxu1 %vm465_vm1, %v13420_v22 }
0x20ce   : > { %v8975_v20 = vmul.f32 %v11442_v42, %v13371_v15  ;;  %v13427_v58 = vadd.f32 %v8995_v1, %v8986_v19  ;;  %v9881_v19 = vunpack.c.l.bf16 %v9918_v35  ;;  %v13482_v42 = vrot.slane %v13328_v13, %v4487_v3 }
0x20d0   : > { %11048 = vmatprep.mubr.msk.f32.mxu1 %vm465_vm1, %v13427_v58  ;;  %v8987_v43 = vmul.f32 %v8983_v31, %v8975_v20 }
0x20d2   : > { %v13431_v10 = vadd.f32 %v8995_v1, %v8987_v43 }
0x20d4   : > { %11049 = vmatmul.mubr.msk.f32.gmra.mxu1 %vm465_vm1, %v13431_v10 }
0x20f7   : > { %v8941_v25 = vpop.xlane.xlu0 %8940 }
0x20f8   : > { %v8953_v44 = vmul.f32 0.03125, %v8941_v25 }
0x20f9   : > { %v8938_v29 = vpop.xlane.xlu1 %8937 }
0x20fa   : > { %v8961_v32 = vadd.f32 1e-05, %v8953_v44  ;;  %v8952_v36 = vmul.f32 0.03125, %v8938_v29 }
0x20fb   : > { %v8947_v9 = vpop.xlane.xlu0 %8946 }
0x20fc   : > { %11443 = vrsqrt.f32 %v8961_v32  ;;  %v8960_v60 = vadd.f32 1e-05, %v8952_v36  ;;  %v8955_v15 = vmul.f32 0.03125, %v8947_v9 }
0x20fd   : > { %v8944_v40 = vpop.xlane.xlu1 %8943 }
0x20fe   : > { %11445 = vrsqrt.f32 %v8960_v60  ;;  %v8963_v28 = vadd.f32 1e-05, %v8955_v15  ;;  %v8954_v39 = vmul.f32 0.03125, %v8944_v40 }
0x2100   : > { %11447 = vrsqrt.f32 %v8963_v28  ;;  %v8962_v18 = vadd.f32 1e-05, %v8954_v39 }
0x2102   : > { %11449 = vrsqrt.f32 %v8962_v18 }
0x2109   : > { %v11444_v51 = vpop.eup %11443 }
0x210a   : > { %v8977_v16 = vmul.f32 %v11444_v51, %v13389_v59  ;;  %v9909_v59 = vunpack.c.l.bf16 %v9925_v34 }
0x210b   : > { %v11446_v50 = vpop.eup %11445 }
0x210c   : > { %v8976_v38 = vmul.f32 %v11446_v50, %v13391_v5  ;;  %v8989_v41 = vmul.f32 %v8983_v31, %v8977_v16  ;;  %11059 = vmatprep.subr.mxu0 %v9909_v59 }
0x210d   : > { %v11448_v27 = vpop.eup %11447  ;;  %11060 = vmatpush3.msra.mxu0 %v9909_v59 }
0x210e   : > { %v8979_v45 = vmul.f32 %v11448_v27, %v13395_v37  ;;  %v8988_v2 = vmul.f32 %v8983_v31, %v8976_v38  ;;  %v13444_v63 = vadd.f32 %v8995_v1, %v8989_v41  ;;  %11061 = vmatprep.subr.mxu0 %v9906_v12 }
0x210f   : > { %v11450_v61 = vpop.eup %11449  ;;  %11062 = vmatpush3.msra.mxu0 %v9906_v12 }
0x2110   : > { %v13441_v0 = vadd.f32 %v8995_v1, %v8988_v2  ;;  %v8978_v62 = vmul.f32 %v11450_v61, %v13400_v11  ;;  %v8991_v5 = vmul.f32 %v8983_v31, %v8979_v45  ;;  %11063 = vmatprep.subr.mxu0 %v9905_v21 }
0x2111   : > { %11064 = vmatpush3.msra.mxu0 %v9905_v21 }
0x2112   : > { %11051 = vmatprep.mubr.msk.f32.mxu1 %vm465_vm1, %v13441_v0  ;;  %v8990_v37 = vmul.f32 %v8983_v31, %v8978_v62  ;;  %v13455_v49 = vadd.f32 %v8995_v1, %v8991_v5  ;;  %11065 = vmatprep.subr.mxu0 %v9902_v33  ;;  %v9920_v31 = vld [vmem:[%s13595_s4 + $0x50] sm:$0xff]  }
0x2113   : > { %11052 = vmatmul.mubr.msk.f32.gmra.mxu1 %vm465_vm1, %v13444_v63  ;;  %11066 = vmatpush3.msra.mxu0 %v9902_v33  ;;  %v9890_v24 = vunpack.c.h.bf16 %v9920_v31  ;;  %v9889_v14 = vunpack.c.l.bf16 %v9920_v31 }
0x2114   : > { %v13453_v11 = vadd.f32 %v8995_v1, %v8990_v37  ;;  %11067 = vmatprep.subr.mxu0 %v9901_v30  ;;  %v9886_v1 = vunpack.c.h.bf16 %v9919_v4 }
0x2115   : > { %11068 = vmatpush3.msra.mxu0 %v9901_v30 }
0x2116   : > { %11054 = vmatprep.mubr.msk.f32.mxu1 %vm465_vm1, %v13453_v11  ;;  %11069 = vmatprep.subr.mxu0 %v9898_v48 }
0x2117   : > { %11055 = vmatmul.mubr.msk.f32.gmra.mxu1 %vm465_vm1, %v13455_v49  ;;  %11070 = vmatpush3.msra.mxu0 %v9898_v48 }
0x2118   : > { %11071 = vmatprep.subr.mxu0 %v9897_v56 }
0x2119   : > { %11072 = vmatpush3.msra.mxu0 %v9897_v56 }
0x211a   : > { %11073 = vmatprep.subr.mxu0 %v9894_v6 }
0x211b   : > { %11074 = vmatpush3.msra.mxu0 %v9894_v6 }
0x211c   : > { %11075 = vmatprep.subr.mxu0 %v9893_v7 }
0x211d   : > { %11076 = vmatpush3.msra.mxu0 %v9893_v7 }
0x211e   : > { %11077 = vmatprep.subr.mxu0 %v9890_v24 }
0x211f   : > { %11078 = vmatpush3.msra.mxu0 %v9890_v24 }
0x2120   : > { %11079 = vmatprep.subr.mxu0 %v9889_v14 }
0x2121   : > { %11080 = vmatpush3.msra.mxu0 %v9889_v14 }
0x2122   : > { %11081 = vmatprep.subr.mxu0 %v9886_v1 }
0x2123   : > { %11082 = vmatpush3.msra.mxu0 %v9886_v1 }
0x2124   : > { %11083 = vmatprep.subr.mxu0 %v9885_v54 }
0x2125   : > { %11084 = vmatpush3.msra.mxu0 %v9885_v54 }
0x2126   : > { %11085 = vmatprep.subr.mxu0 %v9882_v53 }
0x2127   : > { %11086 = vmatpush3.msra.mxu0 %v9882_v53 }
0x2128   : > { %11087 = vmatprep.subr.mxu0 %v9881_v19 }
0x2129   : > { %11088 = vmatpush3.msra.mxu0 %v9881_v19 }
0x218d   : > { %v11047_v20 = vpop.f32.mrf.mxu1 }
0x218e   : > { %v9104_v43 = vadd.f32 %v11047_v20, %v13482_v42 }
0x218f   : > { %v9098_v25 = vpop.f32.mrf.mxu1 }
0x2190   : > { %v9146_v44 = vmul.f32 0.044715, %v9104_v43  ;;  %v9099_v29 = vadd.f32 %v9098_v25, %v13482_v42  ;;  %v9138_v57 = vmul.f32 0.5, %v9104_v43 }
0x2192   : > { %v9154_v32 = vmul.f32 %v9146_v44, %v9104_v43  ;;  %v9145_v36 = vmul.f32 0.044715, %v9099_v29  ;;  %v9137_v12 = vmul.f32 0.5, %v9099_v29 }
0x2194   : > { %v9162_v9 = vmul.f32 %v9154_v32, %v9104_v43  ;;  %v9153_v60 = vmul.f32 %v9145_v36, %v9099_v29  ;;  %v11050_v15 = vpop.f32.mrf.mxu1 }
0x2195   : > { %v9114_v40 = vadd.f32 %v11050_v15, %v13482_v42 }
0x2196   : > { %v9170_v28 = vadd.f32 %v9162_v9, %v9104_v43  ;;  %v9108_v39 = vpop.f32.mrf.mxu1  ;;  %v9161_v18 = vmul.f32 %v9153_v60, %v9099_v29 }
0x2197   : > { %v9148_v51 = vmul.f32 0.044715, %v9114_v40  ;;  %v9109_v3 = vadd.f32 %v9108_v39, %v13482_v42  ;;  %v9140_v31 = vmul.f32 0.5, %v9114_v40 }
0x2198   : > { %v9178_v16 = vmul.f32 0.7978846, %v9170_v28  ;;  %v9169_v50 = vadd.f32 %v9161_v18, %v9099_v29 }
0x2199   : > { %v9156_v38 = vmul.f32 %v9148_v51, %v9114_v40  ;;  %v9147_v27 = vmul.f32 0.044715, %v9109_v3  ;;  %v9139_v47 = vmul.f32 0.5, %v9109_v3 }
0x219a   : > { %11451 = vtanh.f32 %v9178_v16  ;;  %v9177_v41 = vmul.f32 0.7978846, %v9169_v50 }
0x219b   : > { %v9155_v34 = vmul.f32 %v9147_v27, %v9109_v3  ;;  %v9164_v45 = vmul.f32 %v9156_v38, %v9114_v40 }
0x219c   : > { %11453 = vtanh.f32 %v9177_v41 }
0x219d   : > { %v9163_v2 = vmul.f32 %v9155_v34, %v9109_v3  ;;  %v9172_v55 = vadd.f32 %v9164_v45, %v9114_v40 }
0x219f   : > { %v9171_v61 = vadd.f32 %v9163_v2, %v9109_v3  ;;  %v9180_v62 = vmul.f32 0.7978846, %v9172_v55 }
0x21a1   : > { %v9179_v59 = vmul.f32 0.7978846, %v9171_v61  ;;  %11455 = vtanh.f32 %v9180_v62 }
0x21a3   : > { %11457 = vtanh.f32 %v9179_v59 }
0x21a7   : > { %v11452_v5 = vpop.eup %11451 }
0x21a8   : > { %v9194_v37 = vadd.f32 1.0, %v11452_v5 }
0x21a9   : > { %v11454_v26 = vpop.eup %11453 }
0x21aa   : > { %v9193_v21 = vadd.f32 1.0, %v11454_v26  ;;  %v9202_v30 = vmul.f32 %v9194_v37, %v9138_v57 }
0x21ac   : > { %v9201_v33 = vmul.f32 %v9193_v21, %v9137_v12 }
0x21ae   : > { %v11456_v46 = vpop.eup %11455  ;;  %11089 = vmatprep.mubr.f32.mxu0 %v9201_v33 }
0x21af   : > { %11090 = vmatmul.mubr.f32.vlgmr.msra.gmra.mxu0 %v9202_v30  ;;  %v9196_v56 = vadd.f32 1.0, %v11456_v46  ;;  %v9212_v46 = vrot.slane %v13328_v13, %v4692_v23 }
0x21b0   : > { %v11458_v48 = vpop.eup %11457 }
0x21b1   : > { %v9195_v6 = vadd.f32 1.0, %v11458_v48  ;;  %v9204_v24 = vmul.f32 %v9196_v56, %v9140_v31 }
0x21b3   : > { %v9203_v7 = vmul.f32 %v9195_v6, %v9139_v47 }
0x21b5   : > { %11092 = vmatprep.mubr.f32.mxu0 %v9203_v7 }
0x21b6   : > { %11093 = vmatmul.mubr.f32.gmra.mxu0 %v9204_v24 }
0x21d3   : > { %v11053_v4 = vpop.f32.mrf.mxu1 }
0x21d4   : > { %v9124_v14 = vadd.f32 %v11053_v4, %v13482_v42 }
0x21d5   : > { %v9118_v1 = vpop.f32.mrf.mxu1 }
0x21d6   : > { %v9150_v35 = vmul.f32 0.044715, %v9124_v14  ;;  %v9119_v54 = vadd.f32 %v9118_v1, %v13482_v42  ;;  %v9142_v62 = vmul.f32 0.5, %v9124_v14 }
0x21d7   : > { %v11056_v53 = vpop.f32.mrf.mxu1 }
0x21d8   : > { %v9158_v19 = vmul.f32 %v9150_v35, %v9124_v14  ;;  %v9149_v20 = vmul.f32 0.044715, %v9119_v54  ;;  %v9134_v43 = vadd.f32 %v11056_v53, %v13482_v42  ;;  %v9141_v2 = vmul.f32 0.5, %v9119_v54 }
0x21d9   : > { %v9128_v25 = vpop.f32.mrf.mxu1 }
0x21da   : > { %v9157_v44 = vmul.f32 %v9149_v20, %v9119_v54  ;;  %v9152_v29 = vmul.f32 0.044715, %v9134_v43  ;;  %v9129_v32 = vadd.f32 %v9128_v25, %v13482_v42  ;;  %v9166_v36 = vmul.f32 %v9158_v19, %v9124_v14 }
0x21db   : > { %v9144_v57 = vmul.f32 0.5, %v9134_v43 }
0x21dc   : > { %v9160_v9 = vmul.f32 %v9152_v29, %v9134_v43  ;;  %v9151_v60 = vmul.f32 0.044715, %v9129_v32  ;;  %v9165_v15 = vmul.f32 %v9157_v44, %v9119_v54  ;;  %v9174_v40 = vadd.f32 %v9166_v36, %v9124_v14 }
0x21dd   : > { %v9143_v12 = vmul.f32 0.5, %v9129_v32 }
0x21de   : > { %v9159_v28 = vmul.f32 %v9151_v60, %v9129_v32  ;;  %v9173_v39 = vadd.f32 %v9165_v15, %v9119_v54  ;;  %v9182_v18 = vmul.f32 0.7978846, %v9174_v40  ;;  %v9168_v51 = vmul.f32 %v9160_v9, %v9134_v43 }
0x21e0   : > { %v9181_v3 = vmul.f32 0.7978846, %v9173_v39  ;;  %11459 = vtanh.f32 %v9182_v18  ;;  %v9167_v16 = vmul.f32 %v9159_v28, %v9129_v32  ;;  %v9176_v50 = vadd.f32 %v9168_v51, %v9134_v43 }
0x21e2   : > { %11461 = vtanh.f32 %v9181_v3  ;;  %v9175_v38 = vadd.f32 %v9167_v16, %v9129_v32  ;;  %v9184_v27 = vmul.f32 0.7978846, %v9176_v50 }
0x21e4   : > { %v9183_v41 = vmul.f32 0.7978846, %v9175_v38  ;;  %11463 = vtanh.f32 %v9184_v27 }
0x21e6   : > { %11465 = vtanh.f32 %v9183_v41 }
0x21ed   : > { %v11460_v42 = vpop.eup %11459 }
0x21ee   : > { %v9198_v45 = vadd.f32 1.0, %v11460_v42 }
0x21ef   : > { %v11462_v34 = vpop.eup %11461 }
0x21f0   : > { %v9197_v55 = vadd.f32 1.0, %v11462_v34  ;;  %v9206_v26 = vmul.f32 %v9198_v45, %v9142_v62 }
0x21f1   : > { %v11464_v61 = vpop.eup %11463 }
0x21f2   : > { %v9205_v59 = vmul.f32 %v9197_v55, %v9141_v2  ;;  %v9200_v37 = vadd.f32 1.0, %v11464_v61 }
0x21f3   : > { %v11466_v5 = vpop.eup %11465 }
0x21f4   : > { %11095 = vmatprep.mubr.f32.mxu0 %v9205_v59  ;;  %v9199_v21 = vadd.f32 1.0, %v11466_v5  ;;  %v9208_v30 = vmul.f32 %v9200_v37, %v9144_v57 }
0x21f5   : > { %11096 = vmatmul.mubr.f32.gmra.mxu0 %v9206_v26 }
0x21f6   : > { %v9207_v33 = vmul.f32 %v9199_v21, %v9143_v12 }
0x21f8   : > { %11098 = vmatprep.mubr.f32.mxu0 %v9207_v33 }
0x21f9   : > { %11099 = vmatmul.mubr.f32.gmra.mxu0 %v9208_v30 }
0x226f   : > { %v11091_v48 = vpop.f32.mrf.mxu0 }
0x2270   : > { %v9285_v56 = vadd.f32 %v11091_v48, %v9212_v46 }
0x2271   : > { %v9279_v47 = vpop.f32.mrf.mxu0 }
0x2272   : > { %v9319_v6 = vadd.f32 %v9285_v56, %v13420_v22  ;;  %v9280_v31 = vadd.f32 %v9279_v47, %v9212_v46 }
0x2274   : > { %v9318_v7 = vadd.f32 %v9280_v31, %v13417_v8  ;;  %v9329_v24 = vsel %vm465_vm1, %v9319_v6, 0.0 }
0x2275   : > { %9330 = vadd.xlane.f32.xlu0 %v9329_v24 }
0x2276   : > { %v11094_v4 = vpop.f32.mrf.mxu0  ;;  %v9326_v14 = vsel %vm465_vm1, %v9318_v7, 0.0 }
0x2277   : > { %v9295_v1 = vadd.f32 %v11094_v4, %v9212_v46  ;;  %9327 = vadd.xlane.f32.xlu1 %v9326_v14 }
0x2278   : > { %v9289_v35 = vpop.f32.mrf.mxu0 }
0x2279   : > { %v9321_v54 = vadd.f32 %v9295_v1, %v13431_v10  ;;  %v9290_v23 = vadd.f32 %v9289_v35, %v9212_v46 }
0x227b   : > { %v9320_v53 = vadd.f32 %v9290_v23, %v13427_v58  ;;  %v9335_v19 = vsel %vm465_vm1, %v9321_v54, 0.0 }
0x227c   : > { %9336 = vadd.xlane.f32.xlu0 %v9335_v19 }
0x227d   : > { %v9332_v22 = vsel %vm465_vm1, %v9320_v53, 0.0 }
0x227e   : > { %9333 = vadd.xlane.f32.xlu1 %v9332_v22 }
0x22b5   : > { %v11097_v8 = vpop.f32.mrf.mxu0 }
0x22b6   : > { %v9305_v20 = vadd.f32 %v11097_v8, %v9212_v46 }
0x22b7   : > { %v9299_v43 = vpop.f32.mrf.mxu0 }
0x22b8   : > { %v9323_v25 = vadd.f32 %v9305_v20, %v13444_v63  ;;  %v9300_v44 = vadd.f32 %v9299_v43, %v9212_v46 }
0x22b9   : > { %v11100_v29 = vpop.f32.mrf.mxu0 }
0x22ba   : > { %v9322_v32 = vadd.f32 %v9300_v44, %v13441_v0  ;;  %v9315_v36 = vadd.f32 %v11100_v29, %v9212_v46  ;;  %v9341_v10 = vsel %vm465_vm1, %v9323_v25, 0.0 }
0x22bb   : > { %9342 = vadd.xlane.f32.xlu0 %v9341_v10  ;;  %v9309_v58 = vpop.f32.mrf.mxu0 }
0x22bc   : > { %v9325_v9 = vadd.f32 %v9315_v36, %v13455_v49  ;;  %v9310_v60 = vadd.f32 %v9309_v58, %v9212_v46  ;;  %v9338_v15 = vsel %vm465_vm1, %v9322_v32, 0.0  ;;  %v9433_v36 = vrot.slane %v13328_v13, %v4913_v17 }
0x22bd   : > { %9339 = vadd.xlane.f32.xlu1 %v9338_v15  ;;  %v13599_v58 = vsub.s32 7, %v11662_v52 }
0x22be   : > { %v9324_v40 = vadd.f32 %v9310_v60, %v13453_v11  ;;  %v9347_v28 = vsel %vm465_vm1, %v9325_v9, 0.0 }
0x22bf   : > { %9348 = vadd.xlane.f32.xlu0 %v9347_v28 }
0x22c0   : > { %v9344_v63 = vsel %vm465_vm1, %v9324_v40, 0.0 }
0x22c1   : > { %9345 = vadd.xlane.f32.xlu1 %v9344_v63 }
0x22fe   : > { %v9331_v0 = vpop.xlane.xlu0 %9330 }
0x22ff   : > { %v9351_v39 = vmul.f32 0.03125, %v9331_v0 }
0x2300   : > { %v9328_v18 = vpop.xlane.xlu1 %9327 }
0x2301   : > { %v13511_v51 = vsub.f32 %v9319_v6, %v9351_v39  ;;  %v9350_v3 = vmul.f32 0.03125, %v9328_v18 }
0x2303   : > { %v13513_v16 = vsub.f32 %v9318_v7, %v9350_v3  ;;  %v9367_v49 = vmul.f32 %v13511_v51, %v13511_v51 }
0x2305   : > { %v9337_v50 = vpop.xlane.xlu0 %9336  ;;  %v9377_v11 = vsel %vm465_vm1, %v9367_v49, 0.0  ;;  %v9366_v38 = vmul.f32 %v13513_v16, %v13513_v16 }
0x2306   : > { %v9353_v27 = vmul.f32 0.03125, %v9337_v50  ;;  %9378 = vadd.xlane.f32.xlu0 %v9377_v11 }
0x2307   : > { %v9334_v41 = vpop.xlane.xlu1 %9333  ;;  %v9374_v42 = vsel %vm465_vm1, %v9366_v38, 0.0 }
0x2308   : > { %v13521_v34 = vsub.f32 %v9321_v54, %v9353_v27  ;;  %v9352_v45 = vmul.f32 0.03125, %v9334_v41  ;;  %9375 = vadd.xlane.f32.xlu1 %v9374_v42 }
0x230a   : > { %v13523_v2 = vsub.f32 %v9320_v53, %v9352_v45  ;;  %v9369_v55 = vmul.f32 %v13521_v34, %v13521_v34 }
0x230c   : > { %v9383_v61 = vsel %vm465_vm1, %v9369_v55, 0.0  ;;  %v9368_v62 = vmul.f32 %v13523_v2, %v13523_v2 }
0x230d   : > { %9384 = vadd.xlane.f32.xlu0 %v9383_v61 }
0x230e   : > { %v9380_v59 = vsel %vm465_vm1, %v9368_v62, 0.0 }
0x230f   : > { %9381 = vadd.xlane.f32.xlu1 %v9380_v59 }
0x2344   : > { %v9343_v5 = vpop.xlane.xlu0 %9342 }
0x2345   : > { %v9355_v26 = vmul.f32 0.03125, %v9343_v5 }
0x2346   : > { %v9340_v37 = vpop.xlane.xlu1 %9339 }
0x2347   : > { %v13531_v12 = vsub.f32 %v9323_v25, %v9355_v26  ;;  %v9354_v21 = vmul.f32 0.03125, %v9340_v37 }
0x2348   : > { %v9349_v57 = vpop.xlane.xlu0 %9348 }
0x2349   : > { %v13533_v33 = vsub.f32 %v9322_v32, %v9354_v21  ;;  %v9357_v30 = vmul.f32 0.03125, %v9349_v57  ;;  %v9371_v46 = vmul.f32 %v13531_v12, %v13531_v12 }
0x234a   : > { %v9346_v48 = vpop.xlane.xlu1 %9345 }
0x234b   : > { %v13537_v56 = vsub.f32 %v9325_v9, %v9357_v30  ;;  %v9356_v47 = vmul.f32 0.03125, %v9346_v48  ;;  %v9389_v6 = vsel %vm465_vm1, %v9371_v46, 0.0  ;;  %v9370_v31 = vmul.f32 %v13533_v33, %v13533_v33 }
0x234c   : > { %9390 = vadd.xlane.f32.xlu0 %v9389_v6  ;;  %v9445_v9 = vrot.slane %v13328_v13, %v13599_v58 }
0x234d   : > { %v13542_v7 = vsub.f32 %v9324_v40, %v9356_v47  ;;  %v9386_v24 = vsel %vm465_vm1, %v9370_v31, 0.0  ;;  %v9373_v4 = vmul.f32 %v13537_v56, %v13537_v56 }
0x234e   : > { %9387 = vadd.xlane.f32.xlu1 %v9386_v24 }
0x234f   : > { %v9395_v14 = vsel %vm465_vm1, %v9373_v4, 0.0  ;;  %v9372_v1 = vmul.f32 %v13542_v7, %v13542_v7 }
0x2350   : > { %9396 = vadd.xlane.f32.xlu0 %v9395_v14 }
0x2351   : > { %v9392_v35 = vsel %vm465_vm1, %v9372_v1, 0.0 }
0x2352   : > { %9393 = vadd.xlane.f32.xlu1 %v9392_v35 }
0x238f   : > { %v9379_v54 = vpop.xlane.xlu0 %9378 }
0x2390   : > { %v9399_v23 = vmul.f32 0.03125, %v9379_v54 }
0x2391   : > { %v9376_v53 = vpop.xlane.xlu1 %9375 }
0x2392   : > { %v9407_v19 = vadd.f32 1e-05, %v9399_v23  ;;  %v9398_v22 = vmul.f32 0.03125, %v9376_v53 }
0x2394   : > { %11467 = vrsqrt.f32 %v9407_v19  ;;  %v9406_v8 = vadd.f32 1e-05, %v9398_v22 }
0x2396   : > { %11469 = vrsqrt.f32 %v9406_v8  ;;  %v9385_v20 = vpop.xlane.xlu0 %9384 }
0x2397   : > { %v9401_v43 = vmul.f32 0.03125, %v9385_v20 }
0x2398   : > { %v9382_v25 = vpop.xlane.xlu1 %9381 }
0x2399   : > { %v9409_v44 = vadd.f32 1e-05, %v9401_v43  ;;  %v9400_v29 = vmul.f32 0.03125, %v9382_v25 }
0x239b   : > { %11471 = vrsqrt.f32 %v9409_v44  ;;  %v9408_v32 = vadd.f32 1e-05, %v9400_v29 }
0x239d   : > { %11473 = vrsqrt.f32 %v9408_v32 }
0x23a1   : > { %v11468_v10 = vpop.eup %11467 }
0x23a2   : > { %v9423_v60 = vmul.f32 %v11468_v10, %v13511_v51 }
0x23a3   : > { %v11470_v15 = vpop.eup %11469 }
0x23a4   : > { %v9435_v40 = vmul.f32 %v9433_v36, %v9423_v60  ;;  %v9422_v28 = vmul.f32 %v11470_v15, %v13513_v16 }
0x23a6   : > { %v9447_v17 = vadd.f32 %v9445_v9, %v9435_v40  ;;  %v9434_v52 = vmul.f32 %v9433_v36, %v9422_v28 }
0x23a8   : > { %v11472_v63 = vpop.eup %11471  ;;  %9455 = vst.msk [vmem:[%s13564_s20 + $0x8] sm:$0xff] %vm465_vm1, %v9447_v17  ;;  %v9446_v13 = vadd.f32 %v9445_v9, %v9434_v52 }
0x23a9   : > { %v9425_v0 = vmul.f32 %v11472_v63, %v13521_v34 }
0x23aa   : > { %v11474_v39 = vpop.eup %11473  ;;  %9454 = vst.msk [vmem:[%s13564_s20] sm:$0xff] %vm465_vm1, %v9446_v13 }
0x23ab   : > { %v9437_v18 = vmul.f32 %v9433_v36, %v9425_v0  ;;  %v9424_v51 = vmul.f32 %v11474_v39, %v13523_v2 }
0x23ad   : > { %v9449_v3 = vadd.f32 %v9445_v9, %v9437_v18  ;;  %v9436_v16 = vmul.f32 %v9433_v36, %v9424_v51 }
0x23af   : > { %9457 = vst.msk [vmem:[%s13564_s20 + $0x18] sm:$0xff] %vm465_vm1, %v9449_v3  ;;  %v9448_v49 = vadd.f32 %v9445_v9, %v9436_v16 }
0x23b1   : > { %9456 = vst.msk [vmem:[%s13564_s20 + $0x10] sm:$0xff] %vm465_vm1, %v9448_v49 }
0x23d5   : > { %v9391_v50 = vpop.xlane.xlu0 %9390 }
0x23d6   : > { %v9403_v11 = vmul.f32 0.03125, %v9391_v50 }
0x23d7   : > { %v9388_v38 = vpop.xlane.xlu1 %9387 }
0x23d8   : > { %v9411_v27 = vadd.f32 1e-05, %v9403_v11  ;;  %v9402_v41 = vmul.f32 0.03125, %v9388_v38 }
0x23d9   : > { %v9397_v42 = vpop.xlane.xlu0 %9396 }
0x23da   : > { %11475 = vrsqrt.f32 %v9411_v27  ;;  %v9410_v34 = vadd.f32 1e-05, %v9402_v41  ;;  %v9405_v45 = vmul.f32 0.03125, %v9397_v42 }
0x23db   : > { %v9394_v55 = vpop.xlane.xlu1 %9393 }
0x23dc   : > { %11477 = vrsqrt.f32 %v9410_v34  ;;  %v9413_v2 = vadd.f32 1e-05, %v9405_v45  ;;  %v9404_v61 = vmul.f32 0.03125, %v9394_v55 }
0x23de   : > { %11479 = vrsqrt.f32 %v9413_v2  ;;  %v9412_v62 = vadd.f32 1e-05, %v9404_v61 }
0x23e0   : > { %11481 = vrsqrt.f32 %v9412_v62 }
0x23e7   : > { %v11476_v59 = vpop.eup %11475 }
0x23e8   : > { %v9427_v5 = vmul.f32 %v11476_v59, %v13531_v12 }
0x23e9   : > { %v11478_v26 = vpop.eup %11477 }
0x23ea   : > { %v9439_v37 = vmul.f32 %v9433_v36, %v9427_v5  ;;  %v9426_v21 = vmul.f32 %v11478_v26, %v13533_v33 }
0x23eb   : > { %v11480_v57 = vpop.eup %11479 }
0x23ec   : > { %v9451_v30 = vadd.f32 %v9445_v9, %v9439_v37  ;;  %v9438_v46 = vmul.f32 %v9433_v36, %v9426_v21  ;;  %v9429_v48 = vmul.f32 %v11480_v57, %v13537_v56 }
0x23ed   : > { %v11482_v47 = vpop.eup %11481 }
0x23ee   : > { %9459 = vst.msk [vmem:[%s13564_s20 + $0x28] sm:$0xff] %vm465_vm1, %v9451_v30  ;;  %v9450_v6 = vadd.f32 %v9445_v9, %v9438_v46  ;;  %v9441_v31 = vmul.f32 %v9433_v36, %v9429_v48  ;;  %v9428_v24 = vmul.f32 %v11482_v47, %v13542_v7 }
0x23f0   : > { %9458 = vst.msk [vmem:[%s13564_s20 + $0x20] sm:$0xff] %vm465_vm1, %v9450_v6  ;;  %v9453_v12 = vadd.f32 %v9445_v9, %v9441_v31  ;;  %v9440_v4 = vmul.f32 %v9433_v36, %v9428_v24 }
0x23f2   : > { %9461 = vst.msk [vmem:[%s13564_s20 + $0x38] sm:$0xff] %vm465_vm1, %v9453_v12  ;;  %v9452_v14 = vadd.f32 %v9445_v9, %v9440_v4 }
0x23f4   : > { %9460 = vst.msk [vmem:[%s13564_s20 + $0x30] sm:$0xff] %vm465_vm1, %v9452_v14 }
0x23f5 PF: > { %s16_s21 = sadd.s32 1, %s11499_s21  }
0x23f6   : > { %p13_p4 = scmp.ge.s32.totalorder %s16_s21, 4  }
0x23f8   :  { %15 = sbr.rel (!%p13_p4) target bundleno = 1 (0x1), region = 77 }

</bundles_post_ra>
